<compile_context>
chip_gen: v6e
topology: v6e:2x2x1
jax: 0.10.0
libtpu: 0.0.40
codegen_flags: <defaults>
</compile_context>

<pallas_src>
import numpy as np
import jax
import jax.numpy as jnp
from jax.experimental import pallas as pl
from jax.experimental.pallas import tpu as pltpu


def mixd_ffn_pallas(x, w1, b1, w_dw, b_dw, w2, b2, H, W):
    """Fused MixD_FFN forward.

    x     : (B, N, C1) token sequence, N == H*W
    w1,b1 : fc1 params, PyTorch layout  w1:(C2, C1)  b1:(C2,)
    w_dw  : depthwise Conv2d(C2, C2, 3, 1, 1, groups=C2) weight, (C2, 1, 3, 3)
    b_dw  : (C2,)
    w2,b2 : fc2 params, PyTorch layout  w2:(C1, C2)  b2:(C1,)
    """
    B, N, C1 = x.shape
    assert N == H * W
    # The roll-based horizontal taps rely on sublane-aligned per-ky windows.
    assert W % 8 == 0, "aligned-window + pltpu.roll taps require W % 8 == 0"
    C2 = w1.shape[0]

    # Zero rows padded above/below the flattened (H*W, C2) image so every
    # vertical 3x3 tap is a plain shifted read; rounded up to a sublane
    # multiple so all window loads stay aligned.
    PAD = ((W + 1 + 7) // 8) * 8
    assert PAD >= W + 1 and PAD % 8 == 0

    # One-time weight relayout (outside the hot path):
    #   Linear weights -> (in, out) bf16 MXU operands,
    #   depthwise weight -> (9, C2) f32 with row k = ky*3 + kx.
    w1_mat = jnp.transpose(w1).astype(jnp.bfloat16)                 # (C1, C2)
    w2_mat = jnp.transpose(w2).astype(jnp.bfloat16)                 # (C2, C1)
    wdw_mat = jnp.transpose(w_dw.reshape(C2, 3, 3), (1, 2, 0)).reshape(9, C2)
    wdw_mat = wdw_mat.astype(jnp.float32)
    b1_r = b1.reshape(1, C2).astype(jnp.float32)
    bdw_r = b_dw.reshape(1, C2).astype(jnp.float32)
    b2_r = b2.reshape(1, C1).astype(jnp.float32)

    pow2_w = (W & (W - 1)) == 0  # use cheap AND-mask for power-of-two widths

    def kernel(x_ref, w1_ref, b1_ref, wdw_ref, bdw_ref, w2_ref, b2_ref,
               o_ref, hp_ref):
        # ---- fc1 : (N, C1) @ (C1, C2), bf16 operands, f32 accumulate ------
        xv = x_ref[...].astype(jnp.bfloat16)                        # (N, C1)
        h = jnp.dot(xv, w1_ref[...],
                    preferred_element_type=jnp.float32) + b1_ref[...]

        # ---- depthwise 3x3 conv, stride 1, pad 1 --------------------------
        # Stage h into a row-padded VMEM buffer.  Only the two PAD regions
        # are zeroed (the middle N rows are overwritten immediately); done
        # every step so each TensorCore's private scratch is initialized.
        zpad = jnp.zeros((PAD, C2), jnp.float32)
        hp_ref[:PAD, :] = zpad
        hp_ref[PAD + N:, :] = zpad
        hp_ref[PAD:PAD + N, :] = h

        # Column index of token n = i*W + j, and the hoisted border masks.
        row_id = jax.lax.broadcasted_iota(jnp.int32, (N, 1), 0)
        col = (row_id & (W - 1)) if pow2_w else jax.lax.rem(row_id, W)
        left_ok = col >= 1           # token has an in-image left neighbour
        right_ok = col < (W - 1)     # token has an in-image right neighbour

        # Depthwise bias initializes the accumulator (no trailing add pass).
        acc = jnp.broadcast_to(bdw_ref[...], (N, C2))
        for ky in range(3):
            # One sublane-aligned (N, C2) window per ky (start % 8 == 0).
            start = PAD + (ky - 1) * W
            win = hp_ref[pl.ds(start, N), :]
            # Horizontal +/-1 taps via XLU rolls (positive static shifts);
            # the wrapped-in element is exactly the one the mask zeroes.
            left = jnp.where(left_ok, pltpu.roll(win, shift=1, axis=0), 0.0)
            right = jnp.where(right_ok,
                              pltpu.roll(win, shift=N - 1, axis=0), 0.0)
            acc = (acc
                   + left * wdw_ref[ky * 3 + 0:ky * 3 + 1, :]
                   + win * wdw_ref[ky * 3 + 1:ky * 3 + 2, :]
                   + right * wdw_ref[ky * 3 + 2:ky * 3 + 3, :])
        ax = acc

        # NOTE: the reference also computes GELU(ax + fc1(x)) into `fuse`,
        # but that value is never used (fuse_mode='add'), so it is skipped.

        # ---- fc2 : (N, C2) @ (C2, C1), bf16 operands, f32 accumulate ------
        out = jnp.dot(ax.astype(jnp.bfloat16), w2_ref[...],
                      preferred_element_type=jnp.float32) + b2_ref[...]
        o_ref[...] = out.astype(o_ref.dtype)

    # TODO(synk): at production DAEFormer sizes (N = 56*56+, larger C2) add a
    # second "parallel" N-tile grid axis with a +/-W-row halo so the working
    # set fits v7x's 64 MiB VMEM and both TCs stay busy when B == 1; the
    # constant-index weight specs could then also be single-buffered
    # (pipeline_mode=pl.Buffered(1)) to save VMEM.
    return pl.pallas_call(
        kernel,
        out_shape=jax.ShapeDtypeStruct((B, N, C1), x.dtype),
        grid=(B,),
        in_specs=[
            pl.BlockSpec((pl.Squeezed(), N, C1), lambda b: (b, 0, 0)),
            pl.BlockSpec((C1, C2), lambda b: (0, 0)),
            pl.BlockSpec((1, C2), lambda b: (0, 0)),
            pl.BlockSpec((9, C2), lambda b: (0, 0)),
            pl.BlockSpec((1, C2), lambda b: (0, 0)),
            pl.BlockSpec((C2, C1), lambda b: (0, 0)),
            pl.BlockSpec((1, C1), lambda b: (0, 0)),
        ],
        out_specs=pl.BlockSpec((pl.Squeezed(), N, C1), lambda b: (b, 0, 0)),
        scratch_shapes=[pltpu.VMEM((N + 2 * PAD, C2), jnp.float32)],
        compiler_params=pltpu.CompilerParams(
            dimension_semantics=("parallel",),  # one batch element per TC on v7x
            vmem_limit_bytes=32 * 1024 * 1024,
        ),
    )(x, w1_mat, b1_r, wdw_mat, bdw_r, w2_mat, b2_r)


# ----------------------------------------------------------------------------
# Pure-JAX reference mirroring the PyTorch MixD_FFN forward (fuse_mode='add')
# ----------------------------------------------------------------------------
def reference_forward(x, w1, b1, w_dw, b_dw, w2, b2, H, W):
    B, N, C1 = x.shape
    C2 = w1.shape[0]
    hp = jax.lax.Precision.HIGHEST
    h = jnp.einsum("bnc,dc->bnd", x, w1, precision=hp) + b1      # fc1
    himg = h.transpose(0, 2, 1).reshape(B, C2, H, W)
    conv = jax.lax.conv_general_dilated(
        himg, w_dw, window_strides=(1, 1), padding=((1, 1), (1, 1)),
        dimension_numbers=("NCHW", "OIHW", "NCHW"),
        feature_group_count=C2, precision=hp)
    conv = conv + b_dw[None, :, None, None]
    ax = conv.reshape(B, C2, N).transpose(0, 2, 1)               # dwconv tokens
    return jnp.einsum("bnd,cd->bnc", ax, w2, precision=hp) + b2  # fc2


# ----------------------------------------------------------------------------
if __name__ == "__main__":
    B, H, W = 2, 16, 16          # N = H*W tokens
    N = H * W
    C1, C2 = 128, 256            # fc1: C1 -> C2, fc2: C2 -> C1

    key = jax.random.PRNGKey(0)
    ks = jax.random.split(key, 7)
    x    = jax.random.normal(ks[0], (B, N, C1), jnp.float32)
    w1   = 0.05 * jax.random.normal(ks[1], (C2, C1), jnp.float32)
    b1   = 0.05 * jax.random.normal(ks[2], (C2,), jnp.float32)
    w_dw = 0.10 * jax.random.normal(ks[3], (C2, 1, 3, 3), jnp.float32)
    b_dw = 0.05 * jax.random.normal(ks[4], (C2,), jnp.float32)
    w2   = 0.05 * jax.random.normal(ks[5], (C1, C2), jnp.float32)
    b2   = 0.05 * jax.random.normal(ks[6], (C1,), jnp.float32)

    fwd = jax.jit(mixd_ffn_pallas, static_argnums=(7, 8))
    out = jax.block_until_ready(fwd(x, w1, b1, w_dw, b_dw, w2, b2, H, W))
    assert out.shape == (B, N, C1), out.shape

    ref = jax.block_until_ready(
        reference_forward(x, w1, b1, w_dw, b_dw, w2, b2, H, W))
    # fc1/fc2 operands are bf16 on the MXU (f32 accumulate), so tolerance is
    # loosened vs. the all-f32 variant while still catching layout bugs
    # (those produce errors ~O(0.1)).
    np.testing.assert_allclose(np.asarray(out), np.asarray(ref),
                               rtol=2e-2, atol=2e-2)
    print("KERNEL_OK")
</pallas_src>

<mosaic_0001>
module attributes {stable_mosaic.version = 11 : i64} {
  func.func @kernel(%arg0: i32, %arg1: memref<1x256x128xf32, #tpu.memory_space<vmem>>, %arg2: memref<128x256xbf16, #tpu.memory_space<vmem>>, %arg3: memref<1x256xf32, #tpu.memory_space<vmem>>, %arg4: memref<9x256xf32, #tpu.memory_space<vmem>>, %arg5: memref<1x256xf32, #tpu.memory_space<vmem>>, %arg6: memref<256x128xbf16, #tpu.memory_space<vmem>>, %arg7: memref<1x128xf32, #tpu.memory_space<vmem>>, %arg8: memref<1x256x128xf32, #tpu.memory_space<vmem>>, %arg9: memref<304x256xf32, #tpu.memory_space<vmem>>) attributes {dimension_semantics = [#tpu.dimension_semantics<parallel>], iteration_bounds = array<i64: 2>, scalar_prefetch = 0 : i64, scratch_operands = 1 : i64, tpu.core_type = #tpu.core_type<tc>, window_params = [{transform_indices = @transform_0, window_bounds = array<i64: 1, 256, 128>}, {pipeline_mode = #tpu.pipeline_mode<synchronous>, transform_indices = @transform_1, window_bounds = array<i64: 128, 256>}, {pipeline_mode = #tpu.pipeline_mode<synchronous>, transform_indices = @transform_2, window_bounds = array<i64: 1, 256>}, {pipeline_mode = #tpu.pipeline_mode<synchronous>, transform_indices = @transform_3, window_bounds = array<i64: 9, 256>}, {pipeline_mode = #tpu.pipeline_mode<synchronous>, transform_indices = @transform_4, window_bounds = array<i64: 1, 256>}, {pipeline_mode = #tpu.pipeline_mode<synchronous>, transform_indices = @transform_5, window_bounds = array<i64: 256, 128>}, {pipeline_mode = #tpu.pipeline_mode<synchronous>, transform_indices = @transform_6, window_bounds = array<i64: 1, 128>}, {transform_indices = @transform_7, window_bounds = array<i64: 1, 256, 128>}]} {
    %c0 = arith.constant 0 : index
    %c0_0 = arith.constant 0 : index
    %c0_1 = arith.constant 0 : index
    %0 = vector.load %arg1[%c0, %c0_0, %c0_1] : memref<1x256x128xf32, #tpu.memory_space<vmem>>, vector<1x256x128xf32>
    %1 = vector.shape_cast %0 : vector<1x256x128xf32> to vector<256x128xf32>
    %2 = arith.truncf %1 : vector<256x128xf32> to vector<256x128xbf16>
    %c0_2 = arith.constant 0 : index
    %c0_3 = arith.constant 0 : index
    %3 = vector.load %arg2[%c0_2, %c0_3] : memref<128x256xbf16, #tpu.memory_space<vmem>>, vector<128x256xbf16>
    %cst = arith.constant dense<0.000000e+00> : vector<256x256xf32>
    %4 = tpu.matmul %2, %3, %cst {dimension_numbers = #tpu.dot_dimension_numbers<[1], [0], [0], [1], [0, 0, 1, 1], [], []>} : vector<256x128xbf16>, vector<128x256xbf16>, vector<256x256xf32> -> vector<256x256xf32>
    %c0_4 = arith.constant 0 : index
    %c0_5 = arith.constant 0 : index
    %5 = vector.load %arg3[%c0_4, %c0_5] : memref<1x256xf32, #tpu.memory_space<vmem>>, vector<1x256xf32>
    %6 = vector.broadcast %5 : vector<1x256xf32> to vector<256x256xf32>
    %7 = arith.addf %4, %6 : vector<256x256xf32>
    %cst_6 = arith.constant 0.000000e+00 : f32
    %8 = vector.broadcast %cst_6 : f32 to vector<24x256xf32>
    %c0_7 = arith.constant 0 : index
    %c0_8 = arith.constant 0 : index
    %9 = vector.load %arg9[%c0_7, %c0_8] : memref<304x256xf32, #tpu.memory_space<vmem>>, vector<24x256xf32>
    tpu.vector_store %arg9[%c0_7, %c0_8], %8 {strides = array<i32>} : memref<304x256xf32, #tpu.memory_space<vmem>>, vector<24x256xf32>,
    %c280 = arith.constant 280 : index
    %c0_9 = arith.constant 0 : index
    %10 = vector.load %arg9[%c280, %c0_9] : memref<304x256xf32, #tpu.memory_space<vmem>>, vector<24x256xf32>
    tpu.vector_store %arg9[%c280, %c0_9], %8 {strides = array<i32>} : memref<304x256xf32, #tpu.memory_space<vmem>>, vector<24x256xf32>,
    %c24 = arith.constant 24 : index
    %c0_10 = arith.constant 0 : index
    %11 = vector.load %arg9[%c24, %c0_10] : memref<304x256xf32, #tpu.memory_space<vmem>>, vector<256x256xf32>
    tpu.vector_store %arg9[%c24, %c0_10], %7 {strides = array<i32>} : memref<304x256xf32, #tpu.memory_space<vmem>>, vector<256x256xf32>,
    %12 = tpu.iota {dimensions = array<i32: 0>} : vector<256x1xi32>
    %c15_i32 = arith.constant 15 : i32
    %13 = vector.broadcast %c15_i32 : i32 to vector<256x1xi32>
    %14 = arith.andi %12, %13 : vector<256x1xi32>
    %c1_i32 = arith.constant 1 : i32
    %15 = vector.broadcast %c1_i32 : i32 to vector<256x1xi32>
    %16 = arith.cmpi sge, %14, %15 : vector<256x1xi32>
    %c15_i32_11 = arith.constant 15 : i32
    %17 = vector.broadcast %c15_i32_11 : i32 to vector<256x1xi32>
    %18 = arith.cmpi slt, %14, %17 : vector<256x1xi32>
    %c0_12 = arith.constant 0 : index
    %c0_13 = arith.constant 0 : index
    %19 = vector.load %arg5[%c0_12, %c0_13] : memref<1x256xf32, #tpu.memory_space<vmem>>, vector<1x256xf32>
    %20 = vector.shape_cast %19 : vector<1x256xf32> to vector<1x256xf32>
    %21 = vector.broadcast %20 : vector<1x256xf32> to vector<256x256xf32>
    %c8 = arith.constant 8 : index
    %c0_14 = arith.constant 0 : index
    %22 = vector.load %arg9[%c8, %c0_14] : memref<304x256xf32, #tpu.memory_space<vmem>>, vector<256x256xf32>
    %c1_i32_15 = arith.constant 1 : i32
    %23 = tpu.dynamic_rotate %22 by %c1_i32_15 dim 0 : vector<256x256xf32>, i32 -> vector<256x256xf32>
    %cst_16 = arith.constant 0.000000e+00 : f32
    %24 = vector.shape_cast %16 : vector<256x1xi1> to vector<256x1xi1>
    %25 = vector.broadcast %24 : vector<256x1xi1> to vector<256x256xi1>
    %26 = vector.broadcast %cst_16 : f32 to vector<256x256xf32>
    %27 = arith.select %25, %23, %26 : vector<256x256xi1>, vector<256x256xf32>
    %c255_i32 = arith.constant 255 : i32
    %28 = tpu.dynamic_rotate %22 by %c255_i32 dim 0 : vector<256x256xf32>, i32 -> vector<256x256xf32>
    %cst_17 = arith.constant 0.000000e+00 : f32
    %29 = vector.shape_cast %18 : vector<256x1xi1> to vector<256x1xi1>
    %30 = vector.broadcast %29 : vector<256x1xi1> to vector<256x256xi1>
    %31 = vector.broadcast %cst_17 : f32 to vector<256x256xf32>
    %32 = arith.select %30, %28, %31 : vector<256x256xi1>, vector<256x256xf32>
    %c0_18 = arith.constant 0 : index
    %c0_19 = arith.constant 0 : index
    %33 = vector.load %arg4[%c0_18, %c0_19] : memref<9x256xf32, #tpu.memory_space<vmem>>, vector<1x256xf32>
    %34 = vector.broadcast %33 : vector<1x256xf32> to vector<256x256xf32>
    %35 = arith.mulf %27, %34 : vector<256x256xf32>
    %36 = arith.addf %21, %35 : vector<256x256xf32>
    %c1 = arith.constant 1 : index
    %c0_20 = arith.constant 0 : index
    %37 = vector.load %arg4[%c1, %c0_20] : memref<9x256xf32, #tpu.memory_space<vmem>>, vector<1x256xf32>
    %38 = vector.broadcast %37 : vector<1x256xf32> to vector<256x256xf32>
    %39 = arith.mulf %22, %38 : vector<256x256xf32>
    %40 = arith.addf %36, %39 : vector<256x256xf32>
    %c2 = arith.constant 2 : index
    %c0_21 = arith.constant 0 : index
    %41 = vector.load %arg4[%c2, %c0_21] : memref<9x256xf32, #tpu.memory_space<vmem>>, vector<1x256xf32>
    %42 = vector.broadcast %41 : vector<1x256xf32> to vector<256x256xf32>
    %43 = arith.mulf %32, %42 : vector<256x256xf32>
    %44 = arith.addf %40, %43 : vector<256x256xf32>
    %c24_22 = arith.constant 24 : index
    %c0_23 = arith.constant 0 : index
    %45 = vector.load %arg9[%c24_22, %c0_23] : memref<304x256xf32, #tpu.memory_space<vmem>>, vector<256x256xf32>
    %c1_i32_24 = arith.constant 1 : i32
    %46 = tpu.dynamic_rotate %45 by %c1_i32_24 dim 0 : vector<256x256xf32>, i32 -> vector<256x256xf32>
    %cst_25 = arith.constant 0.000000e+00 : f32
    %47 = vector.shape_cast %16 : vector<256x1xi1> to vector<256x1xi1>
    %48 = vector.broadcast %47 : vector<256x1xi1> to vector<256x256xi1>
    %49 = vector.broadcast %cst_25 : f32 to vector<256x256xf32>
    %50 = arith.select %48, %46, %49 : vector<256x256xi1>, vector<256x256xf32>
    %c255_i32_26 = arith.constant 255 : i32
    %51 = tpu.dynamic_rotate %45 by %c255_i32_26 dim 0 : vector<256x256xf32>, i32 -> vector<256x256xf32>
    %cst_27 = arith.constant 0.000000e+00 : f32
    %52 = vector.shape_cast %18 : vector<256x1xi1> to vector<256x1xi1>
    %53 = vector.broadcast %52 : vector<256x1xi1> to vector<256x256xi1>
    %54 = vector.broadcast %cst_27 : f32 to vector<256x256xf32>
    %55 = arith.select %53, %51, %54 : vector<256x256xi1>, vector<256x256xf32>
    %c3 = arith.constant 3 : index
    %c0_28 = arith.constant 0 : index
    %56 = vector.load %arg4[%c3, %c0_28] : memref<9x256xf32, #tpu.memory_space<vmem>>, vector<1x256xf32>
    %57 = vector.broadcast %56 : vector<1x256xf32> to vector<256x256xf32>
    %58 = arith.mulf %50, %57 : vector<256x256xf32>
    %59 = arith.addf %44, %58 : vector<256x256xf32>
    %c4 = arith.constant 4 : index
    %c0_29 = arith.constant 0 : index
    %60 = vector.load %arg4[%c4, %c0_29] : memref<9x256xf32, #tpu.memory_space<vmem>>, vector<1x256xf32>
    %61 = vector.broadcast %60 : vector<1x256xf32> to vector<256x256xf32>
    %62 = arith.mulf %45, %61 : vector<256x256xf32>
    %63 = arith.addf %59, %62 : vector<256x256xf32>
    %c5 = arith.constant 5 : index
    %c0_30 = arith.constant 0 : index
    %64 = vector.load %arg4[%c5, %c0_30] : memref<9x256xf32, #tpu.memory_space<vmem>>, vector<1x256xf32>
    %65 = vector.broadcast %64 : vector<1x256xf32> to vector<256x256xf32>
    %66 = arith.mulf %55, %65 : vector<256x256xf32>
    %67 = arith.addf %63, %66 : vector<256x256xf32>
    %c40 = arith.constant 40 : index
    %c0_31 = arith.constant 0 : index
    %68 = vector.load %arg9[%c40, %c0_31] : memref<304x256xf32, #tpu.memory_space<vmem>>, vector<256x256xf32>
    %c1_i32_32 = arith.constant 1 : i32
    %69 = tpu.dynamic_rotate %68 by %c1_i32_32 dim 0 : vector<256x256xf32>, i32 -> vector<256x256xf32>
    %cst_33 = arith.constant 0.000000e+00 : f32
    %70 = vector.shape_cast %16 : vector<256x1xi1> to vector<256x1xi1>
    %71 = vector.broadcast %70 : vector<256x1xi1> to vector<256x256xi1>
    %72 = vector.broadcast %cst_33 : f32 to vector<256x256xf32>
    %73 = arith.select %71, %69, %72 : vector<256x256xi1>, vector<256x256xf32>
    %c255_i32_34 = arith.constant 255 : i32
    %74 = tpu.dynamic_rotate %68 by %c255_i32_34 dim 0 : vector<256x256xf32>, i32 -> vector<256x256xf32>
    %cst_35 = arith.constant 0.000000e+00 : f32
    %75 = vector.shape_cast %18 : vector<256x1xi1> to vector<256x1xi1>
    %76 = vector.broadcast %75 : vector<256x1xi1> to vector<256x256xi1>
    %77 = vector.broadcast %cst_35 : f32 to vector<256x256xf32>
    %78 = arith.select %76, %74, %77 : vector<256x256xi1>, vector<256x256xf32>
    %c6 = arith.constant 6 : index
    %c0_36 = arith.constant 0 : index
    %79 = vector.load %arg4[%c6, %c0_36] : memref<9x256xf32, #tpu.memory_space<vmem>>, vector<1x256xf32>
    %80 = vector.broadcast %79 : vector<1x256xf32> to vector<256x256xf32>
    %81 = arith.mulf %73, %80 : vector<256x256xf32>
    %82 = arith.addf %67, %81 : vector<256x256xf32>
    %c7 = arith.constant 7 : index
    %c0_37 = arith.constant 0 : index
    %83 = vector.load %arg4[%c7, %c0_37] : memref<9x256xf32, #tpu.memory_space<vmem>>, vector<1x256xf32>
    %84 = vector.broadcast %83 : vector<1x256xf32> to vector<256x256xf32>
    %85 = arith.mulf %68, %84 : vector<256x256xf32>
    %86 = arith.addf %82, %85 : vector<256x256xf32>
    %c8_38 = arith.constant 8 : index
    %c0_39 = arith.constant 0 : index
    %87 = vector.load %arg4[%c8_38, %c0_39] : memref<9x256xf32, #tpu.memory_space<vmem>>, vector<1x256xf32>
    %88 = vector.broadcast %87 : vector<1x256xf32> to vector<256x256xf32>
    %89 = arith.mulf %78, %88 : vector<256x256xf32>
    %90 = arith.addf %86, %89 : vector<256x256xf32>
    %91 = arith.truncf %90 : vector<256x256xf32> to vector<256x256xbf16>
    %c0_40 = arith.constant 0 : index
    %c0_41 = arith.constant 0 : index
    %92 = vector.load %arg6[%c0_40, %c0_41] : memref<256x128xbf16, #tpu.memory_space<vmem>>, vector<256x128xbf16>
    %cst_42 = arith.constant dense<0.000000e+00> : vector<256x128xf32>
    %93 = tpu.matmul %91, %92, %cst_42 {dimension_numbers = #tpu.dot_dimension_numbers<[1], [0], [0], [1], [0, 0, 1, 1], [], []>} : vector<256x256xbf16>, vector<256x128xbf16>, vector<256x128xf32> -> vector<256x128xf32>
    %c0_43 = arith.constant 0 : index
    %c0_44 = arith.constant 0 : index
    %94 = vector.load %arg7[%c0_43, %c0_44] : memref<1x128xf32, #tpu.memory_space<vmem>>, vector<1x128xf32>
    %95 = vector.broadcast %94 : vector<1x128xf32> to vector<256x128xf32>
    %96 = arith.addf %93, %95 : vector<256x128xf32>
    %c0_45 = arith.constant 0 : index
    %c0_46 = arith.constant 0 : index
    %c0_47 = arith.constant 0 : index
    %97 = vector.load %arg8[%c0_45, %c0_46, %c0_47] : memref<1x256x128xf32, #tpu.memory_space<vmem>>, vector<1x256x128xf32>
    %98 = vector.shape_cast %97 : vector<1x256x128xf32> to vector<256x128xf32>
    %99 = vector.shape_cast %96 : vector<256x128xf32> to vector<1x256x128xf32>
    tpu.vector_store %arg8[%c0_45, %c0_46, %c0_47], %99 {strides = array<i32>} : memref<1x256x128xf32, #tpu.memory_space<vmem>>, vector<1x256x128xf32>,
    return
  }
  func.func @transform_0(%arg0: i32) -> (i32, i32, i32) {
    %c0_i32 = arith.constant 0 : i32
    %c0_i32_0 = arith.constant 0 : i32
    %c0_i32_1 = arith.constant 0 : i32
    return %arg0, %c0_i32, %c0_i32_0 : i32, i32, i32
  }
  func.func @transform_1(%arg0: i32) -> (i32, i32) {
    %c0_i32 = arith.constant 0 : i32
    %c0_i32_0 = arith.constant 0 : i32
    %c0_i32_1 = arith.constant 0 : i32
    return %c0_i32, %c0_i32_0 : i32, i32
  }
  func.func @transform_2(%arg0: i32) -> (i32, i32) {
    %c0_i32 = arith.constant 0 : i32
    %c0_i32_0 = arith.constant 0 : i32
    %c0_i32_1 = arith.constant 0 : i32
    return %c0_i32, %c0_i32_0 : i32, i32
  }
  func.func @transform_3(%arg0: i32) -> (i32, i32) {
    %c0_i32 = arith.constant 0 : i32
    %c0_i32_0 = arith.constant 0 : i32
    %c0_i32_1 = arith.constant 0 : i32
    return %c0_i32, %c0_i32_0 : i32, i32
  }
  func.func @transform_4(%arg0: i32) -> (i32, i32) {
    %c0_i32 = arith.constant 0 : i32
    %c0_i32_0 = arith.constant 0 : i32
    %c0_i32_1 = arith.constant 0 : i32
    return %c0_i32, %c0_i32_0 : i32, i32
  }
  func.func @transform_5(%arg0: i32) -> (i32, i32) {
    %c0_i32 = arith.constant 0 : i32
    %c0_i32_0 = arith.constant 0 : i32
    %c0_i32_1 = arith.constant 0 : i32
    return %c0_i32, %c0_i32_0 : i32, i32
  }
  func.func @transform_6(%arg0: i32) -> (i32, i32) {
    %c0_i32 = arith.constant 0 : i32
    %c0_i32_0 = arith.constant 0 : i32
    %c0_i32_1 = arith.constant 0 : i32
    return %c0_i32, %c0_i32_0 : i32, i32
  }
  func.func @transform_7(%arg0: i32) -> (i32, i32, i32) {
    %c0_i32 = arith.constant 0 : i32
    %c0_i32_0 = arith.constant 0 : i32
    %c0_i32_1 = arith.constant 0 : i32
    return %arg0, %c0_i32, %c0_i32_0 : i32, i32, i32
  }
}

</mosaic_0001>

<bundles_post_ra>
// kernel: mixd_ffn_pallas.1
= control target key start
LH: loop header
LB: loop body
LE: loop exit
PB: predicated region body
PF: predicated region fallthrough
CT: control target
= control target key end

     0   :  { %12 = vsyncpa [#allocation4], 0  ;;  %s8106_s0 = inlined_call_operand.vmem [shape: f32[2,256,128], index: 0, kind: input, shape index: {}]   ;;  %s8107_s1 = inlined_call_operand.vmem [shape: bf16[128,256], index: 1, kind: input, shape index: {}]   ;;  %s8108_s2 = inlined_call_operand.vmem [shape: f32[1,256], index: 2, kind: input, shape index: {}]   ;;  %s8109_s3 = inlined_call_operand.vmem [shape: f32[9,256], index: 3, kind: input, shape index: {}]   ;;  %s8110_s4 = inlined_call_operand.vmem [shape: f32[1,256], index: 4, kind: input, shape index: {}]   ;;  %s8111_s5 = inlined_call_operand.vmem [shape: bf16[256,128], index: 5, kind: input, shape index: {}]   ;;  %s8112_s6 = inlined_call_operand.vmem [shape: f32[1,128], index: 6, kind: input, shape index: {}]   ;;  %s8113_s7 = inlined_call_operand.hbm [shape: f32[2,256,128], index: 7, kind: output, shape index: {}]  }
   0x1   :  { %14 = vsyncpa [#allocation4 + $0x1], 0  ;;  %s3787_s24 = smov 0   ;;  %s3789_s25 = smov 0  }
   0x2   :  { %s3791_s26 = smov 0   ;;  %s3793_s27 = smov 0  }
   0x3 LB: > { %s3808_s28 = sadd.s32 4294967295, %s3740_s27   ;;  %s3430_s29 = sadd.s32 4294967294, %s3740_s27   ;;  %s3740_s27 = sphi %s3793_s27, %s9347_s27   ;;  %s3736_s26 = sphi %s3791_s26, %s9346_s26   ;;  %s3732_s25 = sphi %s3789_s25, %s9345_s25   ;;  %s3728_s24 = sphi %s3787_s24, %s9344_s24  }
   0x4   : > { %s3812_s30 = sadd.s32 1, %s3740_s27   ;;  %s179_s8 = sadd.s32 1, %s3736_s26 }
   0x5   : > { %s176_s9 = ssub.s32 %s3740_s27, %s3812_s30  ;;  %p189_p0 = scmp.ne.s32.totalorder %s3736_s26, %s3732_s25 }
   0x6   : > { %p177_p1 = scmp.eq.s32.totalorder %s176_s9, 0  ;;  %p190_p2 = scmp.eq.s32.totalorder %s3808_s28, 1 }
   0x7   : > { %p195_p3 = scmp.ne.s32.totalorder %s3732_s25, %s3728_s24  ;;  %p196_p4 = scmp.eq.s32.totalorder %s3430_s29, 1 }
   0x8   : > { %s3823_s10 = scalar_select %p177_p1, %s3736_s26, %s179_s8  }
   0x9   : > { %p3825_p5 = por %p190_p2, %p189_p0  ;;  %p3829_p6 = por %p196_p4, %p195_p3 }
   0xa   : > { %p3433_p7 = scmp.ge.s32.totalorder %s3740_s27, 1  ;;  %p240_p8 = scmp.lt.s32.totalorder %s3740_s27, 3 }
   0xc   : > { %p241_p9 = pnand %p3433_p7, %p240_p8 }
   0xe   : > { %244 = sbr.rel (%p241_p9) target bundleno = 973 (0x3cd), region = 48 }
  0x13   : > { %v3640_v0 = vld [vmem:[%s8107_s1 + $0x74] ss:$8 sps:$4 sm:$0xff]   ;;  %v3642_v1 = vld [vmem:[%s8107_s1 + $0x70] ss:$8 sps:$4 sm:$0xff]   ;;  %v3742_v2 = vmov 0   ;;  %p272_p10 = scmp.lt.s32.totalorder %s3808_s28, 1 }
  0x14   : > { %466 = vmatprep.mubr.bf16.mxu0 %v3742_v2  ;;  %434 = vmatprep.subr.bf16.mxu0 %v3640_v0  ;;  %v3643_v3 = vld [vmem:[%s8107_s1 + $0x64] ss:$8 sps:$4 sm:$0xff]   ;;  %v3645_v4 = vld [vmem:[%s8107_s1 + $0x60] ss:$8 sps:$4 sm:$0xff]   ;;  %v3646_v5 = vld [vmem:[%s8107_s1 + $0x54] ss:$8 sps:$4 sm:$0xff]  }
  0x15   : > { %435 = vmatpush1.bf16.msra.mxu0 %v3642_v1  ;;  %v3648_v6 = vld [vmem:[%s8107_s1 + $0x50] ss:$8 sps:$4 sm:$0xff]   ;;  %v3649_v7 = vld [vmem:[%s8107_s1 + $0x44] ss:$8 sps:$4 sm:$0xff]   ;;  %v3651_v8 = vld [vmem:[%s8107_s1 + $0x40] ss:$8 sps:$4 sm:$0xff]   ;;  %v344_v1 = vlaneseq }
  0x16   : > { %436 = vmatprep.subr.bf16.mxu0 %v3643_v3  ;;  %v3652_v9 = vld [vmem:[%s8107_s1 + $0x34] ss:$8 sps:$4 sm:$0xff]   ;;  %v3654_v10 = vld [vmem:[%s8107_s1 + $0x30] ss:$8 sps:$4 sm:$0xff]   ;;  %s273_s19 = scalar_select %p272_p10, %s3808_s28, 1 }
  0x17   : > { %v3655_v11 = vld [vmem:[%s8107_s1 + $0x24] ss:$8 sps:$4 sm:$0xff]   ;;  %v3657_v12 = vld [vmem:[%s8107_s1 + $0x20] ss:$8 sps:$4 sm:$0xff]   ;;  %v3658_v13 = vld [vmem:[%s8107_s1 + $0x14] ss:$8 sps:$4 sm:$0xff]  }
  0x18   : > { %s3483_s29 = sshll.u32 %s273_s19, 8  ;;  %v3660_v14 = vld [vmem:[%s8107_s1 + $0x10] ss:$8 sps:$4 sm:$0xff]   ;;  %v3661_v15 = vld [vmem:[%s8107_s1 + $0x4] ss:$8 sps:$4 sm:$0xff]   ;;  %v3938_v3 = vshrl.u32 %v344_v1, 7 }
  0x19   : > { %437 = vmatpush1.bf16.msra.mxu0 %v3645_v4  ;;  %s3886_s20 = scalar_lea.vmem %s8106_s0, %s3483_s29  ;;  %v3663_v16 = vld [vmem:[%s8107_s1] ss:$8 sps:$4 sm:$0xff]   ;;  %s269_s19 = sand.u32 1, %s3732_s25  }
  0x1a   : > { %438 = vmatprep.subr.bf16.mxu0 %v3646_v5  ;;  %v278_v17 = vld [vmem:[%s3886_s20] sm:$0xff]  ;;  %v279_v18 = vld [vmem:[%s3886_s20 + $0x8] sm:$0xff]  ;;  %v280_v20 = vld [vmem:[%s3886_s20 + $0x10] sm:$0xff]  ;;  %v3944_v5 = vsub.s32 0, %v3938_v3  ;;  %vm8259_vm0 = vcmp.lt.s32.totalorder %v3938_v3, 1  ;;  %vm8245_vm1 = vcmp.lt.s32.totalorder %v3938_v3, 7 }
  0x1b   : > { %v310_v19 = vpack.c.bf16 %v279_v18, %v278_v17  ;;  %v281_v21 = vld [vmem:[%s3886_s20 + $0x18] sm:$0xff]  ;;  %v282_v23 = vld [vmem:[%s3886_s20 + $0x20] sm:$0xff]  ;;  %v283_v24 = vld [vmem:[%s3886_s20 + $0x28] sm:$0xff]  ;;  %v4100_v1 = vadd.s32 192, %v3938_v3  ;;  %s3434_s21 = sshll.u32 %s269_s19, 8  ;;  %s3484_s8 = sshll.u32 %s3808_s28, 12 }
  0x1c   : > { %v311_v22 = vpack.c.bf16 %v281_v21, %v280_v20  ;;  %v312_v25 = vpack.c.bf16 %v283_v24, %v282_v23  ;;  %v284_v26 = vld [vmem:[%s3886_s20 + $0x30] sm:$0xff]  ;;  %v285_v27 = vld [vmem:[%s3886_s20 + $0x38] sm:$0xff]  ;;  %v286_v29 = vld [vmem:[%s3886_s20 + $0x40] sm:$0xff]  ;;  %8376 = vst [vmem:[#allocation6_spill] sm:$0xff] %v3944_v5  ;;  %s7992_s29 = scalar_lea.vmem [#allocation3], %s3434_s21  ;;  %s8058_s15 = scalar_lea.hbm %s8113_s7, %s3484_s8 }
  0x1d   : > { %439 = vmatpush1.bf16.msra.mxu0 %v3648_v6  ;;  %v313_v28 = vpack.c.bf16 %v285_v27, %v284_v26  ;;  %v287_v30 = vld [vmem:[%s3886_s20 + $0x48] sm:$0xff]  ;;  %v288_v32 = vld [vmem:[%s3886_s20 + $0x50] sm:$0xff]  ;;  %v289_v33 = vld [vmem:[%s3886_s20 + $0x58] sm:$0xff]  ;;  %v3743_v6 = vmov 0.0   ;;  %s3368_s9 = sshll.u32 %s7992_s29, 4  ;;  %s8066_s16 = scalar_lea.sflag [#allocation4], %s269_s19  ;;  %s8060_s9 = int_to_ptr.vmem [resolvable:$true] %s3368_s9 }
  0x1e   : > { %440 = vmatprep.subr.bf16.mxu0 %v3649_v7  ;;  %v314_v31 = vpack.c.bf16 %v287_v30, %v286_v29  ;;  %v315_v34 = vpack.c.bf16 %v289_v33, %v288_v32  ;;  %v290_v35 = vld [vmem:[%s3886_s20 + $0x60] sm:$0xff]  ;;  %v291_v36 = vld [vmem:[%s3886_s20 + $0x68] sm:$0xff]  ;;  %v292_v38 = vld [vmem:[%s3886_s20 + $0x70] sm:$0xff]  ;;  %v3946_v7 = vrot.slane %v3743_v6, 7  ;;  %v3986_v24 = vrot.slane %v3743_v6, 1  ;;  %s3680_s28 = scalar_lea.vmem %s8060_s9, 4096 }
  0x1f   : > { %v316_v37 = vpack.c.bf16 %v291_v36, %v290_v35  ;;  %v293_v39 = vld [vmem:[%s3886_s20 + $0x78] sm:$0xff]  ;;  %v294_v41 = vld [vmem:[%s3886_s20 + $0x80] sm:$0xff]  ;;  %v295_v42 = vld [vmem:[%s3886_s20 + $0x88] sm:$0xff]  ;;  %v4019_v35 = vadd.s32 24, %v3938_v3  ;;  %p3681_p11 = scmp.ne.s32.totalorder %s8060_s9, %s3680_s28  ;;  %s3744_s17 = smov [#allocation3]  }
  0x20   : > { %v317_v40 = vpack.c.bf16 %v293_v39, %v292_v38  ;;  %v318_v43 = vpack.c.bf16 %v295_v42, %v294_v41  ;;  %v296_v44 = vld [vmem:[%s3886_s20 + $0x90] sm:$0xff]  ;;  %v297_v45 = vld [vmem:[%s3886_s20 + $0x98] sm:$0xff]  ;;  %v298_v47 = vld [vmem:[%s3886_s20 + $0xa0] sm:$0xff]  ;;  %8377 = vst [vmem:[#allocation7_spill] sm:$0xff] %v3946_v7  ;;  %s3684_s18 = sshll.u32 %s3744_s17, 4  ;;  %s3685_s18 = int_to_ptr.vmem [resolvable:$false] %s3684_s18 }
  0x21   : > { %441 = vmatpush1.bf16.msra.mxu0 %v3651_v8  ;;  %v319_v46 = vpack.c.bf16 %v297_v45, %v296_v44  ;;  %v299_v48 = vld [vmem:[%s3886_s20 + $0xa8] sm:$0xff]  ;;  %v300_v50 = vld [vmem:[%s3886_s20 + $0xb0] sm:$0xff]  ;;  %v301_v51 = vld [vmem:[%s3886_s20 + $0xb8] sm:$0xff]  ;;  %8380 = vst [vmem:[#allocation10_spill] sm:$0xff] %v3986_v24  ;;  %v8383_v44 = vmov 0  ;;  %v8386_v45 = vmov 0  ;;  %p3682_p12 = pnand %p3681_p11, %p3825_p5  ;;  %p3687_p0 = scmp.lt.s32.totalorder %s8060_s9, %s3685_s18 }
  0x22   : > { %442 = vmatprep.subr.bf16.mxu0 %v3652_v9  ;;  %v320_v49 = vpack.c.bf16 %v299_v48, %v298_v47  ;;  %v321_v52 = vpack.c.bf16 %v301_v51, %v300_v50  ;;  %v302_v53 = vld [vmem:[%s3886_s20 + $0xc0] sm:$0xff]  ;;  %v303_v54 = vld [vmem:[%s3886_s20 + $0xc8] sm:$0xff]  ;;  %v304_v56 = vld [vmem:[%s3886_s20 + $0xd0] sm:$0xff]  ;;  %v4063_v50 = vadd.s32 40, %v3938_v3  ;;  %v4066_v51 = vadd.s32 64, %v3938_v3 }
  0x23   : > { %v322_v55 = vpack.c.bf16 %v303_v54, %v302_v53  ;;  %v305_v57 = vld [vmem:[%s3886_s20 + $0xd8] sm:$0xff]  ;;  %v306_v59 = vld [vmem:[%s3886_s20 + $0xe0] sm:$0xff]  ;;  %v307_v60 = vld [vmem:[%s3886_s20 + $0xe8] sm:$0xff]  ;;  %p3683_p13 = pneg %p3682_p12 }
  0x24   : > { %v323_v58 = vpack.c.bf16 %v305_v57, %v304_v56  ;;  %v324_v61 = vpack.c.bf16 %v307_v60, %v306_v59  ;;  %v308_v62 = vld [vmem:[%s3886_s20 + $0xf0] sm:$0xff]  ;;  %v309_v63 = vld [vmem:[%s3886_s20 + $0xf8] sm:$0xff]  ;;  %v1422_v4 = vld [vmem:[%s8109_s3] ss:$8 sm:$0x3]  ;;  %v4077_v56 = vadd.s32 96, %v3938_v3 }
  0x25   : > { %443 = vmatpush1.bf16.msra.mxu0 %v3654_v10  ;;  %v325_v0 = vpack.c.bf16 %v309_v63, %v308_v62  ;;  %v3949_v8 = vrot.slane %v1422_v4, %v3944_v5  ;;  %v3453_v9 = vld [vmem:[%s8109_s3 + $0x1] ss:$8 sm:$0x3]  ;;  %v3454_v17 = vld [vmem:[%s8109_s3 + $0x2] ss:$8 sm:$0x3] }
  0x26   : > { %444 = vmatprep.subr.bf16.mxu0 %v3655_v11  ;;  %v3456_v18 = vld [vmem:[%s8109_s3 + $0x4] ss:$8 sm:$0x3]  ;;  %v3995_v27 = vrot.slane %v3454_v17, %v3944_v5  ;;  %v3455_v30 = vld [vmem:[%s8109_s3 + $0x3] ss:$8 sm:$0x3] }
  0x27   : > { %v1436_v11 = vmul.f32 %v3949_v8, %v3946_v7  ;;  %v3664_v47 = vld [vmem:[%s8111_s5 + $0x78] sm:$0xff]   ;;  %v4080_v57 = vadd.s32 112, %v3938_v3  ;;  %v4087_v60 = vadd.s32 144, %v3938_v3  ;;  %v4093_v62 = vadd.s32 176, %v3938_v3  ;;  %v3666_v6 = vld [vmem:[%s8111_s5 + $0x70] sm:$0xff]   ;;  %s3686_s20 = scalar_lea.vmem %s3685_s18, 8192 }
  0x28   : > { %8381 = vst [vmem:[#allocation11_spill] sm:$0xff] %v3995_v27  ;;  %v3665_v53 = vld [vmem:[%s8111_s5 + $0x38] sm:$0xff]   ;;  %3485 = vmatprep.subr.bf16.mxu1 %v3664_v47  ;;  %p3688_p1 = scmp.lt.s32.totalorder %s3686_s20, %s3680_s28 }
  0x29   : > { %445 = vmatpush1.bf16.msra.mxu0 %v3657_v12  ;;  %v705_v12 = vadd.s32 8, %v3938_v3  ;;  %3486 = vmatpush3.bf16.msra.mxu1 %v3665_v53 }
  0x2a   : > { %446 = vmatprep.subr.bf16.mxu0 %v3658_v13  ;;  %v706_v13 = vadd.s32 16, %v3938_v3  ;;  %3487 = vmatprep.subr.bf16.mxu1 %v3666_v6  ;;  %p3689_p2 = por %p3688_p1, %p3687_p0 }
  0x2c   : > { %v738_v23 = vand.u32 15, %v706_v13  ;;  %v4112_v13 = vadd.s32 224, %v3938_v3  ;;  %p3690_p3 = pnand %p3689_p2, %p3683_p13 }
  0x2d   : > { %447 = vmatpush1.bf16.msra.mxu0 %v3660_v14  ;;  %v342_v14 = vld [vmem:[%s8108_s2] sm:$0x3] }
  0x2e   : > { %448 = vmatprep.subr.bf16.mxu0 %v3661_v15  ;;  %v3968_v15 = vrot.slane %v3453_v9, %v3944_v5  ;;  %v3992_v26 = vrot.slane %v342_v14, %v3944_v5  ;;  %vm4044_vm2 = vcmp.ge.s32.totalorder %v738_v23, 1 }
  0x2f   : > { %v8384_v44 = vsel %vm4044_vm2, 4294967295, %v8383_v44 }
  0x30   : > { %v3984_v21 = vmul.f32 0.0, %v3968_v15  ;;  %8385 = vst [vmem:[#allocation13_spill] sm:$0xff] %v8384_v44 }
  0x31   : > { %449 = vmatpush1.bf16.msra.mxu0 %v3663_v16  ;;  %v3971_v16 = vsub.s32 1, %v3938_v3 }
  0x32   : > { %8379 = vst [vmem:[#allocation9_spill] sm:$0xff] %v3984_v21 }
  0x33   : > { %8378 = vst [vmem:[#allocation8_spill] sm:$0xff] %v3971_v16  ;;  %v4001_v29 = vrot.slane %v342_v14, %v3971_v16  ;;  %v4013_v33 = vrot.slane %v3453_v9, %v3971_v16  ;;  %v4022_v36 = vrot.slane %v3454_v17, %v3971_v16  ;;  %v4115_v14 = vadd.s32 240, %v3938_v3  ;;  %v3667_v17 = vld [vmem:[%s8111_s5 + $0x30] sm:$0xff]  }
  0x34   : > { %467 = vmatmul.mubr.bf16.vlgmr.msra.gmra.mxu0 %v310_v19  ;;  %v3980_v19 = vrot.slane %v1422_v4, %v3971_v16  ;;  %v4103_v4 = vadd.s32 208, %v3938_v3  ;;  %3488 = vmatpush3.bf16.msra.mxu1 %v3667_v17 }
  0x35   : > { %476 = vmatprep.mubr.bf16.mxu0 %v3742_v2  ;;  %v4096_v63 = vmul.f32 0.0, %v4013_v33 }
  0x36   : > { %v1437_v39 = vmul.f32 %v3980_v19, %v3946_v7 }
  0x37   : > { %8390 = vst [vmem:[#allocation16_spill] sm:$0xff] %v4096_v63 }
  0x3c   : > { %477 = vmatmul.mubr.bf16.gmra.mxu0 %v311_v22  ;;  %v737_v22 = vand.u32 15, %v705_v12 }
  0x3d   : > { %486 = vmatprep.mubr.bf16.mxu0 %v3742_v2 }
  0x3e   : > { %vm4048_vm3 = vcmp.lt.s32.totalorder %v737_v22, 15 }
  0x3f   : > { %v8387_v45 = vsel %vm4048_vm3, 4294967295, %v8386_v45 }
  0x40   : > { %8388 = vst [vmem:[#allocation14_spill] sm:$0xff] %v8387_v45 }
  0x44   : > { %487 = vmatmul.mubr.bf16.gmra.mxu0 %v312_v25  ;;  %v3989_v25 = vadd.s32 32, %v3938_v3 }
  0x45   : > { %496 = vmatprep.mubr.bf16.mxu0 %v3742_v2 }
  0x46   : > { %v740_v41 = vand.u32 15, %v3989_v25 }
  0x48   : > { %vm4170_vm4 = vcmp.ge.s32.totalorder %v740_v41, 1 }
  0x4c   : > { %497 = vmatmul.mubr.bf16.gmra.mxu0 %v313_v28  ;;  %v3998_v28 = vrot.slane %v3456_v18, %v3944_v5 }
  0x4d   : > { %506 = vmatprep.mubr.bf16.mxu0 %v3742_v2 }
  0x54   : > { %507 = vmatmul.mubr.bf16.gmra.mxu0 %v314_v31  ;;  %v3459_v31 = vld [vmem:[%s8109_s3 + $0x7] ss:$8 sm:$0x3] }
  0x55   : > { %516 = vmatprep.mubr.bf16.mxu0 %v3742_v2  ;;  %v4039_v42 = vrot.slane %v3459_v31, %v3944_v5  ;;  %v4059_v48 = vrot.slane %v3459_v31, %v3971_v16 }
  0x57   : > { %8389 = vst [vmem:[#allocation15_spill] sm:$0xff] %v4059_v48 }
  0x5c   : > { %517 = vmatmul.mubr.bf16.gmra.mxu0 %v315_v34  ;;  %v4016_v34 = vadd.s32 248, %v3938_v3 }
  0x5d   : > { %526 = vmatprep.mubr.bf16.mxu0 %v3742_v2 }
  0x64   : > { %527 = vmatmul.mubr.bf16.gmra.mxu0 %v316_v37  ;;  %v4025_v37 = vrot.slane %v3456_v18, %v3971_v16 }
  0x65   : > { %536 = vmatprep.mubr.bf16.mxu0 %v3742_v2 }
  0x6c   : > { %537 = vmatmul.mubr.bf16.gmra.mxu0 %v317_v40  ;;  %v4035_v40 = vrot.slane %v3455_v30, %v3944_v5 }
  0x6d   : > { %546 = vmatprep.mubr.bf16.mxu0 %v3742_v2 }
  0x74   : > { %547 = vmatmul.mubr.bf16.gmra.mxu0 %v318_v43  ;;  %v4042_v43 = vrot.slane %v3455_v30, %v3971_v16 }
  0x75   : > { %556 = vmatprep.mubr.bf16.mxu0 %v3742_v2 }
  0x76   : > { %8382 = vst [vmem:[#allocation12_spill] sm:$0xff] %v4042_v43 }
  0x7c   : > { %557 = vmatmul.mubr.bf16.gmra.mxu0 %v319_v46  ;;  %v4053_v46 = vadd.s32 48, %v3938_v3 }
  0x7d   : > { %566 = vmatprep.mubr.bf16.mxu0 %v3742_v2 }
  0x84   : > { %567 = vmatmul.mubr.bf16.gmra.mxu0 %v320_v49 }
  0x85   : > { %576 = vmatprep.mubr.bf16.mxu0 %v3742_v2 }
  0x8c   : > { %577 = vmatmul.mubr.bf16.gmra.mxu0 %v321_v52  ;;  %v4069_v52 = vadd.s32 80, %v3938_v3 }
  0x8d   : > { %586 = vmatprep.mubr.bf16.mxu0 %v3742_v2 }
  0x94   : > { %587 = vmatmul.mubr.bf16.gmra.mxu0 %v322_v55 }
  0x95   : > { %596 = vmatprep.mubr.bf16.mxu0 %v3742_v2 }
  0x9c   : > { %597 = vmatmul.mubr.bf16.gmra.mxu0 %v323_v58  ;;  %v4083_v58 = vadd.s32 128, %v3938_v3 }
  0x9d   : > { %606 = vmatprep.mubr.bf16.mxu0 %v3742_v2 }
  0xa4   : > { %607 = vmatmul.mubr.bf16.gmra.mxu0 %v324_v61  ;;  %v4090_v61 = vadd.s32 160, %v3938_v3 }
  0xa5   : > { %616 = vmatprep.mubr.bf16.mxu0 %v3742_v2  ;;  %v832_v2 = vld [vmem:[%s8110_s4] sm:$0x3] }
  0xa6   : > { %v3958_v10 = vrot.slane %v832_v2, %v3944_v5  ;;  %v4010_v32 = vrot.slane %v832_v2, %v3971_v16  ;;  %v3669_v16 = vld [vmem:[%s8111_s5 + $0x28] sm:$0xff]  }
  0xa8   : > { %v1500_v20 = vadd.f32 %v1436_v11, %v3958_v10  ;;  %v1501_v59 = vadd.f32 %v1437_v39, %v4010_v32 }
  0xaa   : > { %v4028_v38 = vadd.f32 %v3984_v21, %v1500_v20  ;;  %v4128_v53 = vadd.f32 %v4096_v63, %v1501_v59  ;;  %v3668_v21 = vld [vmem:[%s8111_s5 + $0x68] sm:$0xff]  }
  0xab   : > { %3489 = vmatprep.subr.bf16.mxu1 %v3668_v21 }
  0xac   : > { %617 = vmatmul.mubr.bf16.gmra.mxu0 %v325_v0  ;;  %3490 = vmatpush3.bf16.msra.mxu1 %v3669_v16 }
  0xf4   : > { %v468_v9 = vpop.f32.mrf.mxu0 }
  0xf5   : > { %v469_v18 = vadd.f32 %v468_v9, %v3992_v26 }
  0xf6   : > { %v470_v30 = vpop.f32.mrf.mxu0 }
  0xf7   : > { %v4130_v49 = vrot.slane %v469_v18, 7  ;;  %v4132_v9 = vrot.slane %v469_v18, 1  ;;  %v1579_v6 = vmul.f32 %v3968_v15, %v469_v18  ;;  %v471_v31 = vadd.f32 %v470_v30, %v4001_v29 }
  0xf8   : > { %v472_v2 = vpop.f32.mrf.mxu0  ;;  %v4149_v23 = vmul.f32 %v3998_v28, %v469_v18 }
  0xf9   : > { %8391 = vst [vmem:[#allocation17_spill] sm:$0xff] %v4130_v49  ;;  %8392 = vst [vmem:[#allocation18_spill] sm:$0xff] %v4132_v9  ;;  %v1031_v59 = vsel %vm8259_vm0, %v3946_v7, %v4130_v49  ;;  %v1288_v54 = vsel %vm8245_vm1, %v3986_v24, %v4132_v9  ;;  %v4152_v30 = vadd.f32 %v472_v2, %v3992_v26  ;;  %v4158_v47 = vrot.slane %v471_v31, 7 }
  0xfa   : > { %8393 = vst [vmem:[#allocation19_spill] sm:$0xff] %v4149_v23  ;;  %v1105_v39 = vsel %vm4044_vm2, %v1031_v59, 0.0  ;;  %v1360_v17 = vsel %vm4048_vm3, %v1288_v54, 0.0  ;;  %v4160_v55 = vrot.slane %v471_v31, 1  ;;  %v474_v22 = vpop.f32.mrf.mxu0  ;;  %v1580_v18 = vmul.f32 %v4013_v33, %v471_v31 }
  0xfb   : > { %8394 = vst [vmem:[#allocation20_spill] sm:$0xff] %v4152_v30  ;;  %8395 = vst [vmem:[#allocation21_spill] sm:$0xff] %v4158_v47  ;;  %v1438_v20 = vmul.f32 %v3949_v8, %v1105_v39  ;;  %v1718_v12 = vmul.f32 %v3995_v27, %v1360_v17  ;;  %v4166_v2 = vmul.f32 %v4025_v37, %v471_v31  ;;  %v914_v17 = vrot.slane %v4152_v30, 7 }
  0xfc   : > { %v1032_v54 = vsel %vm8259_vm0, %v3946_v7, %v4158_v47  ;;  %v1289_v39 = vsel %vm8245_vm1, %v3986_v24, %v4160_v55  ;;  %v478_v11 = vpop.f32.mrf.mxu0  ;;  %v1581_v23 = vmul.f32 %v3968_v15, %v4152_v30 }
  0xfd   : > { %8396 = vst [vmem:[#allocation22_spill] sm:$0xff] %v4166_v2  ;;  %v1502_v25 = vadd.f32 %v1438_v20, %v3958_v10  ;;  %v1106_v41 = vsel %vm4044_vm2, %v1032_v54, 0.0  ;;  %v1361_v0 = vsel %vm4048_vm3, %v1289_v39, 0.0  ;;  %v1029_v20 = vsel %vm8259_vm0, %v4130_v49, %v914_v17 }
  0xfe   : > { %v1439_v2 = vmul.f32 %v3980_v19, %v1106_v41  ;;  %v4196_v31 = vmul.f32 %v4022_v36, %v1361_v0  ;;  %v8399_v54 = vrot.slane %v4152_v30, 1  ;;  %v480_v63 = vpop.f32.mrf.mxu0  ;;  %v1440_v0 = vmul.f32 %v3949_v8, %v1029_v20 }
  0xff   : > { %v1643_v41 = vadd.f32 %v1579_v6, %v1502_v25  ;;  %v1782_v45 = vadd.f32 %v1718_v12, %v4028_v38  ;;  %v2011_v43 = vmul.f32 %v4035_v40, %v1029_v20  ;;  %v4229_v21 = vadd.f32 %v480_v63, %v4001_v29  ;;  %v3670_v38 = vld [vmem:[%s8111_s5 + $0x60] sm:$0xff]  }
 0x100   : > { %v4206_v39 = vsel %vm8245_vm1, %v4132_v9, %v8399_v54  ;;  %v1503_v49 = vadd.f32 %v1439_v2, %v4010_v32  ;;  %v2152_v54 = vmul.f32 %v3998_v28, %v4152_v30  ;;  %v4220_v9 = vadd.f32 %v474_v22, %v4001_v29  ;;  %v482_v48 = vpop.f32.mrf.mxu0  ;;  %3491 = vmatprep.subr.bf16.mxu1 %v3670_v38 }
 0x101   : > { %8400 = vst [vmem:[#allocation23_spill] sm:$0xff] %v4206_v39  ;;  %v1720_v5 = vmul.f32 %v3995_v27, %v4206_v39  ;;  %v1504_v6 = vadd.f32 %v1440_v0, %v3958_v10  ;;  %v4226_v39 = vadd.f32 %v478_v11, %v3992_v26  ;;  %v2075_v22 = vadd.f32 %v2011_v43, %v1782_v45 }
 0x102   : > { %v4234_v12 = vadd.f32 %v1580_v18, %v1503_v49  ;;  %v915_v2 = vrot.slane %v4220_v9, 7  ;;  %v484_v20 = vpop.f32.mrf.mxu0  ;;  %v1582_v63 = vmul.f32 %v4013_v33, %v4220_v9  ;;  %v8406_v45 = vand.u32 15, %v4053_v46 }
 0x103   : > { %v4223_v25 = vadd.f32 %v1720_v5, %v1643_v41  ;;  %8402 = vst [vmem:[#allocation25_spill] sm:$0xff] %v4226_v39  ;;  %v3671_v5 = vld [vmem:[%s8111_s5 + $0x20] sm:$0xff]   ;;  %v4241_v11 = vadd.f32 %v1581_v23, %v1504_v6  ;;  %v4247_v41 = vmul.f32 %v4025_v37, %v4220_v9  ;;  %v4250_v43 = vrot.slane %v4226_v39, 7 }
 0x104   : > { %vm4254_vm5 = vcmp.ge.s32.totalorder %v8406_v45, 1  ;;  %v8407_v49 = vmov 0  ;;  %v4258_v18 = vadd.f32 %v2152_v54, %v2075_v22  ;;  %v4263_v23 = vsel %vm8259_vm0, %v4158_v47, %v915_v2  ;;  %v488_v16 = vpop.f32.mrf.mxu0  ;;  %3492 = vmatpush3.bf16.msra.mxu1 %v3671_v5  ;;  %v3672_v45 = vld [vmem:[%s8111_s5 + $0x58] sm:$0xff]  }
 0x105   : > { %8401 = vst [vmem:[#allocation24_spill] sm:$0xff] %v4223_v25  ;;  %8403 = vst [vmem:[#allocation26_spill] sm:$0xff] %v4241_v11  ;;  %v8408_v49 = vsel %vm4254_vm5, 4294967295, %v8407_v49  ;;  %v4266_v0 = vrot.slane %v4226_v39, 1  ;;  %v1583_v6 = vmul.f32 %v3968_v15, %v4226_v39  ;;  %v1441_v46 = vmul.f32 %v3980_v19, %v4263_v23  ;;  %v3673_v5 = vld [vmem:[%s8111_s5 + $0x18] sm:$0xff]   ;;  %3493 = vmatprep.subr.bf16.mxu1 %v3672_v45 }
 0x106   : > { %8404 = vst [vmem:[#allocation27_spill] sm:$0xff] %v4247_v41  ;;  %8405 = vst [vmem:[#allocation28_spill] sm:$0xff] %v4250_v43  ;;  %v4275_v54 = vsel %vm8259_vm0, %v914_v17, %v4250_v43  ;;  %v4279_v38 = vmul.f32 %v3998_v28, %v4226_v39  ;;  %v4282_v22 = vrot.slane %v4229_v21, 7  ;;  %v3674_v17 = vld [vmem:[%s8111_s5 + $0x50] sm:$0xff]   ;;  %v4301_v11 = vmul.f32 %v4013_v33, %v4229_v21 }
 0x107   : > { %8409 = vst [vmem:[#allocation29_spill] sm:$0xff] %v8408_v49  ;;  %8410 = vst [vmem:[#allocation30_spill] sm:$0xff] %v4258_v18  ;;  %v1109_v25 = vsel %vm4170_vm4, %v4275_v54, 0.0  ;;  %v4305_v39 = vmul.f32 %v4025_v37, %v4229_v21  ;;  %v490_v18 = vpop.f32.mrf.mxu0  ;;  %v1505_v30 = vadd.f32 %v1441_v46, %v4010_v32  ;;  %v4321_v41 = vadd.f32 %v488_v16, %v3992_v26 }
 0x108   : > { %8411 = vst [vmem:[#allocation31_spill] sm:$0xff] %v4263_v23  ;;  %8412 = vst [vmem:[#allocation32_spill] sm:$0xff] %v4266_v0  ;;  %v1442_v0 = vmul.f32 %v3949_v8, %v1109_v25  ;;  %v4312_v43 = vsel %vm8259_vm0, %v915_v2, %v4282_v22  ;;  %3494 = vmatpush3.bf16.msra.mxu1 %v3673_v5  ;;  %v3675_v25 = vld [vmem:[%s8111_s5 + $0x10] sm:$0xff]   ;;  %v8423_v45 = vmov 0 }
 0x109   : > { %8413 = vst [vmem:[#allocation33_spill] sm:$0xff] %v4275_v54  ;;  %8414 = vst [vmem:[#allocation34_spill] sm:$0xff] %v4279_v38  ;;  %v4315_v38 = vadd.f32 %v482_v48, %v3992_v26  ;;  %v4318_v54 = vadd.f32 %v484_v20, %v4001_v29  ;;  %v492_v46 = vpop.f32.mrf.mxu0  ;;  %v4332_v2 = vadd.f32 %v1582_v63, %v1505_v30  ;;  %3495 = vmatprep.subr.bf16.mxu1 %v3674_v17 }
 0x10a   : > { %8415 = vst [vmem:[#allocation35_spill] sm:$0xff] %v4282_v22  ;;  %8416 = vst [vmem:[#allocation36_spill] sm:$0xff] %v4305_v39  ;;  %v4324_v39 = vadd.f32 %v490_v18, %v4001_v29  ;;  %v1506_v20 = vadd.f32 %v1442_v0, %v3958_v10  ;;  %v3676_v18 = vld [vmem:[%s8111_s5 + $0x48] sm:$0xff]   ;;  %v8422_v17 = vand.u32 15, %v4066_v51  ;;  %v1587_v44 = vmul.f32 %v3968_v15, %v4321_v41 }
 0x10b   : > { %8417 = vst [vmem:[#allocation37_spill] sm:$0xff] %v4315_v38  ;;  %8418 = vst [vmem:[#allocation38_spill] sm:$0xff] %v4321_v41  ;;  %v4342_v5 = vmul.f32 %v3968_v15, %v4315_v38  ;;  %v4346_v48 = vmul.f32 %v3998_v28, %v4315_v38  ;;  %v919_v30 = vrot.slane %v4318_v54, 7  ;;  %v4351_v63 = vmul.f32 %v4013_v33, %v4318_v54  ;;  %v494_v0 = vpop.f32.mrf.mxu0 }
 0x10c   : > { %8419 = vst [vmem:[#allocation39_spill] sm:$0xff] %v4332_v2  ;;  %vm4355_vm6 = vcmp.ge.s32.totalorder %v8422_v17, 1  ;;  %v4359_v16 = vadd.f32 %v1583_v6, %v1506_v20  ;;  %v4371_v51 = vmul.f32 %v3998_v28, %v4321_v41  ;;  %v1588_v6 = vmul.f32 %v4013_v33, %v4324_v39  ;;  %3496 = vmatpush3.bf16.msra.mxu1 %v3675_v25  ;;  %v3679_v2 = vld [vmem:[%s8111_s5] sm:$0xff]  }
 0x10d   : > { %8420 = vst [vmem:[#allocation40_spill] sm:$0xff] %v4342_v5  ;;  %8421 = vst [vmem:[#allocation41_spill] sm:$0xff] %v4346_v48  ;;  %v8424_v45 = vsel %vm4355_vm6, 4294967295, %v8423_v45  ;;  %v4363_v5 = vmul.f32 %v4025_v37, %v4318_v54  ;;  %v498_v20 = vpop.f32.mrf.mxu0  ;;  %v3677_v48 = vld [vmem:[%s8111_s5 + $0x8] sm:$0xff]   ;;  %v8429_v23 = vrot.slane %v4321_v41, 7  ;;  %v4389_v17 = vmul.f32 %v4025_v37, %v4324_v39  ;;  %3497 = vmatprep.subr.bf16.mxu1 %v3676_v18  ;;  %v3678_v41 = vld [vmem:[%s8111_s5 + $0x40] sm:$0xff]  }
 0x10e   : > { %8425 = vst [vmem:[#allocation42_spill] sm:$0xff] %v8424_v45  ;;  %8426 = vst [vmem:[#allocation43_spill] sm:$0xff] %v4359_v16  ;;  %v4395_v25 = vadd.f32 %v494_v0, %v4001_v29  ;;  %v4415_v18 = vsel %vm8259_vm0, %v4282_v22, %v919_v30 }
 0x10f   : > { %8427 = vst [vmem:[#allocation44_spill] sm:$0xff] %v4363_v5  ;;  %8428 = vst [vmem:[#allocation45_spill] sm:$0xff] %v4371_v51  ;;  %v8430_v5 = vrot.slane %v4315_v38, 7  ;;  %v4392_v51 = vadd.f32 %v492_v46, %v3992_v26  ;;  %v4410_v46 = vadd.f32 %v498_v20, %v3992_v26  ;;  %v500_v0 = vpop.f32.mrf.mxu0 }
 0x110   : > { %8432 = vst [vmem:[#allocation47_spill] sm:$0xff] %v4389_v17  ;;  %3498 = vmatpush3.bf16.msra.mxu1 %v3677_v48  ;;  %v4440_v49 = vmul.f32 %v4013_v33, %v4395_v25  ;;  %v4458_v27 = vadd.f32 %v500_v0, %v4001_v29 }
 0x111   : > { %v4385_v16 = vsel %vm8259_vm0, %v8430_v5, %v8429_v23  ;;  %8433 = vst [vmem:[#allocation48_spill] sm:$0xff] %v4392_v51  ;;  %v8434_v5 = vrot.slane %v4324_v39, 7  ;;  %8436 = vst [vmem:[#allocation50_spill] sm:$0xff] %v4410_v46  ;;  %v4426_v20 = vmul.f32 %v3968_v15, %v4392_v51  ;;  %v502_v22 = vpop.f32.mrf.mxu0  ;;  %3499 = vmatprep.subr.bf16.mxu1 %v3678_v41 }
 0x112   : > { %8431 = vst [vmem:[#allocation46_spill] sm:$0xff] %v4385_v16  ;;  %v1113_v23 = vsel %vm4254_vm5, %v4385_v16, 0.0  ;;  %8439 = vst [vmem:[#allocation53_spill] sm:$0xff] %v4440_v49  ;;  %v4455_v49 = vmul.f32 %v3998_v28, %v4410_v46  ;;  %v4461_v41 = vadd.f32 %v502_v22, %v3992_v26 }
 0x113   : > { %v4407_v17 = vsel %vm8259_vm0, %v919_v30, %v8434_v5  ;;  %v1446_v38 = vmul.f32 %v3949_v8, %v1113_v23  ;;  %8437 = vst [vmem:[#allocation51_spill] sm:$0xff] %v4426_v20  ;;  %v4430_v30 = vmul.f32 %v3998_v28, %v4392_v51  ;;  %v4444_v20 = vmul.f32 %v4025_v37, %v4395_v25 }
 0x114   : > { %8435 = vst [vmem:[#allocation49_spill] sm:$0xff] %v4407_v17  ;;  %v1114_v16 = vsel %vm4254_vm5, %v4407_v17, 0.0  ;;  %v504_v17 = vpop.f32.mrf.mxu0  ;;  %8442 = vst [vmem:[#allocation56_spill] sm:$0xff] %v4455_v49  ;;  %3500 = vmatpush3.bf16.msra.mxu1 %v3679_v2 }
 0x115   : > { %v1447_v47 = vmul.f32 %v3980_v19, %v1114_v16  ;;  %8438 = vst [vmem:[#allocation52_spill] sm:$0xff] %v4430_v30  ;;  %v1510_v5 = vadd.f32 %v1446_v38, %v3958_v10  ;;  %8440 = vst [vmem:[#allocation54_spill] sm:$0xff] %v4444_v20  ;;  %v1591_v38 = vmul.f32 %v3968_v15, %v4410_v46  ;;  %v8445_v30 = vmov 0 }
 0x116   : > { %8443 = vst [vmem:[#allocation57_spill] sm:$0xff] %v4461_v41  ;;  %v4480_v0 = vadd.f32 %v504_v17, %v4001_v29  ;;  %v508_v22 = vpop.f32.mrf.mxu0  ;;  %v4495_v17 = vmul.f32 %v4025_v37, %v4458_v27 }
 0x117   : > { %v1511_v23 = vadd.f32 %v1447_v47, %v4010_v32  ;;  %v4451_v16 = vadd.f32 %v1587_v44, %v1510_v5  ;;  %v8444_v47 = vand.u32 15, %v4069_v52  ;;  %v8449_v44 = vrot.slane %v4410_v46, 7 }
 0x118   : > { %v8450_v5 = vrot.slane %v4392_v51, 7  ;;  %8452 = vst [vmem:[#allocation61_spill] sm:$0xff] %v4480_v0  ;;  %v4483_v52 = vrot.slane %v4229_v21, 1  ;;  %8454 = vst [vmem:[#allocation63_spill] sm:$0xff] %v4495_v17  ;;  %v4513_v17 = vmul.f32 %v3998_v28, %v4461_v41  ;;  %v4531_v2 = vadd.f32 %v508_v22, %v3992_v26 }
 0x119   : > { %8441 = vst [vmem:[#allocation55_spill] sm:$0xff] %v4451_v16  ;;  %vm4465_vm7 = vcmp.ge.s32.totalorder %v8444_v47, 1  ;;  %v4469_v48 = vadd.f32 %v1588_v6, %v1511_v23  ;;  %v8156_v23 = vrot.slane %v4458_v27, 7  ;;  %v510_v16 = vpop.f32.mrf.mxu0 }
 0x11a   : > { %v8446_v30 = vsel %vm4465_vm7, 4294967295, %v8445_v30  ;;  %v4477_v49 = vsel %vm8259_vm0, %v8450_v5, %v8449_v44  ;;  %8453 = vst [vmem:[#allocation62_spill] sm:$0xff] %v4483_v52  ;;  %v1592_v44 = vmul.f32 %v4013_v33, %v4458_v27  ;;  %8458 = vst [vmem:[#allocation66_spill] sm:$0xff] %v4513_v17  ;;  %v4528_v17 = vmul.f32 %v4025_v37, %v4480_v0 }
 0x11b   : > { %8447 = vst [vmem:[#allocation58_spill] sm:$0xff] %v8446_v30  ;;  %8448 = vst [vmem:[#allocation59_spill] sm:$0xff] %v4469_v48  ;;  %v1117_v6 = vsel %vm4355_vm6, %v4477_v49, 0.0  ;;  %v8483_v30 = vrot.slane %v4318_v54, 1 }
 0x11c   : > { %8451 = vst [vmem:[#allocation60_spill] sm:$0xff] %v4477_v49  ;;  %v1450_v5 = vmul.f32 %v3949_v8, %v1117_v6  ;;  %v8455_v49 = vrot.slane %v4395_v25, 7  ;;  %v4509_v6 = vmul.f32 %v3968_v15, %v4461_v41  ;;  %8460 = vst [vmem:[#allocation68_spill] sm:$0xff] %v4528_v17 }
 0x11d   : > { %8461 = vst [vmem:[#allocation69_spill] sm:$0xff] %v4531_v2 }
 0x11e   : > { %v4505_v47 = vsel %vm8259_vm0, %v8455_v49, %v8156_v23  ;;  %8457 = vst [vmem:[#allocation65_spill] sm:$0xff] %v4509_v6  ;;  %v1514_v20 = vadd.f32 %v1450_v5, %v3958_v10  ;;  %v4523_v49 = vmul.f32 %v4013_v33, %v4480_v0  ;;  %v512_v23 = vpop.f32.mrf.mxu0  ;;  %v4534_v5 = vadd.f32 %v510_v16, %v4001_v29 }
 0x11f   : > { %8456 = vst [vmem:[#allocation64_spill] sm:$0xff] %v4505_v47  ;;  %v1118_v46 = vsel %vm4355_vm6, %v4505_v47, 0.0  ;;  %v4539_v51 = vadd.f32 %v512_v23, %v3992_v26  ;;  %v8163_v16 = vrot.slane %v4531_v2, 7 }
 0x120   : > { %8459 = vst [vmem:[#allocation67_spill] sm:$0xff] %v4523_v49  ;;  %v1451_v6 = vmul.f32 %v3980_v19, %v1118_v46  ;;  %8462 = vst [vmem:[#allocation70_spill] sm:$0xff] %v4534_v5  ;;  %v4536_v45 = vadd.f32 %v1591_v38, %v1514_v20  ;;  %v514_v47 = vpop.f32.mrf.mxu0  ;;  %v8465_v49 = vand.u32 15, %v4077_v56  ;;  %v8466_v46 = vmov 0 }
 0x121   : > { %8464 = vst [vmem:[#allocation72_spill] sm:$0xff] %v4539_v51  ;;  %v1595_v38 = vmul.f32 %v3968_v15, %v4531_v2  ;;  %v4556_v56 = vmul.f32 %v3998_v28, %v4531_v2  ;;  %v1596_v17 = vmul.f32 %v4013_v33, %v4534_v5  ;;  %v8471_v20 = vrot.slane %v4461_v41, 7 }
 0x122   : > { %8463 = vst [vmem:[#allocation71_spill] sm:$0xff] %v4536_v45  ;;  %vm4543_vm8 = vcmp.ge.s32.totalorder %v8465_v49, 1  ;;  %v1515_v48 = vadd.f32 %v1451_v6, %v4010_v32  ;;  %v518_v22 = vpop.f32.mrf.mxu0  ;;  %v4599_v41 = vmul.f32 %v3998_v28, %v4539_v51 }
 0x123   : > { %v8467_v46 = vsel %vm4543_vm8, 4294967295, %v8466_v46  ;;  %8469 = vst [vmem:[#allocation74_spill] sm:$0xff] %v4556_v56  ;;  %v4570_v45 = vsel %vm8259_vm0, %v8471_v20, %v8163_v16  ;;  %v4574_v56 = vmul.f32 %v4025_v37, %v4534_v5  ;;  %v4591_v16 = vmul.f32 %v3968_v15, %v4539_v51 }
 0x124   : > { %8468 = vst [vmem:[#allocation73_spill] sm:$0xff] %v8467_v46  ;;  %v4562_v6 = vadd.f32 %v1592_v44, %v1515_v48  ;;  %8472 = vst [vmem:[#allocation76_spill] sm:$0xff] %v4570_v45  ;;  %v1121_v23 = vsel %vm4465_vm7, %v4570_v45, 0.0  ;;  %v8474_v48 = vrot.slane %v4534_v5, 7  ;;  %v8475_v44 = vrot.slane %v4480_v0, 7 }
 0x125   : > { %8473 = vst [vmem:[#allocation77_spill] sm:$0xff] %v4574_v56  ;;  %8477 = vst [vmem:[#allocation79_spill] sm:$0xff] %v4591_v16  ;;  %v520_v56 = vpop.f32.mrf.mxu0  ;;  %v1454_v49 = vmul.f32 %v3949_v8, %v1121_v23  ;;  %v4606_v20 = vadd.f32 %v518_v22, %v3992_v26  ;;  %v8486_v5 = vmov 0 }
 0x126   : > { %8470 = vst [vmem:[#allocation75_spill] sm:$0xff] %v4562_v6  ;;  %v4586_v2 = vsel %vm8259_vm0, %v8475_v44, %v8474_v48  ;;  %8478 = vst [vmem:[#allocation80_spill] sm:$0xff] %v4599_v41  ;;  %v4602_v48 = vadd.f32 %v514_v47, %v4001_v29  ;;  %v4609_v16 = vadd.f32 %v520_v56, %v4001_v29  ;;  %v8482_v6 = vrot.slane %v4324_v39, 1 }
 0x127   : > { %8476 = vst [vmem:[#allocation78_spill] sm:$0xff] %v4586_v2  ;;  %v1122_v45 = vsel %vm4465_vm7, %v4586_v2, 0.0  ;;  %8480 = vst [vmem:[#allocation82_spill] sm:$0xff] %v4606_v20  ;;  %v522_v23 = vpop.f32.mrf.mxu0  ;;  %v1518_v47 = vadd.f32 %v1454_v49, %v3958_v10  ;;  %v8485_v56 = vand.u32 15, %v4080_v57  ;;  %v8176_v49 = vrot.slane %v4606_v20, 7 }
 0x128   : > { %8479 = vst [vmem:[#allocation81_spill] sm:$0xff] %v4602_v48  ;;  %v1455_v44 = vmul.f32 %v3980_v19, %v1122_v45  ;;  %8481 = vst [vmem:[#allocation83_spill] sm:$0xff] %v4609_v16  ;;  %v4617_v2 = vsel %vm8245_vm1, %v8483_v30, %v8482_v6  ;;  %v4624_v22 = vmul.f32 %v4013_v33, %v4602_v48 }
 0x129   : > { %vm4628_vm9 = vcmp.ge.s32.totalorder %v8485_v56, 1  ;;  %v4635_v30 = vmul.f32 %v4025_v37, %v4602_v48  ;;  %v524_v45 = vpop.f32.mrf.mxu0  ;;  %v4639_v41 = vadd.f32 %v1595_v38, %v1518_v47  ;;  %v1599_v57 = vmul.f32 %v3968_v15, %v4606_v20 }
 0x12a   : > { %8484 = vst [vmem:[#allocation84_spill] sm:$0xff] %v4624_v22  ;;  %v8487_v5 = vsel %vm4628_vm9, 4294967295, %v8486_v5  ;;  %v1519_v0 = vadd.f32 %v1455_v44, %v4010_v32  ;;  %v4645_v56 = vmul.f32 %v3998_v28, %v4606_v20  ;;  %v1600_v47 = vmul.f32 %v4013_v33, %v4609_v16 }
 0x12b   : > { %8488 = vst [vmem:[#allocation85_spill] sm:$0xff] %v8487_v5  ;;  %8489 = vst [vmem:[#allocation86_spill] sm:$0xff] %v4635_v30  ;;  %v8493_v30 = vrot.slane %v4539_v51, 7  ;;  %v4684_v20 = vadd.f32 %v524_v45, %v4001_v29 }
 0x12c   : > { %8490 = vst [vmem:[#allocation87_spill] sm:$0xff] %v4639_v41  ;;  %8491 = vst [vmem:[#allocation88_spill] sm:$0xff] %v4645_v56  ;;  %v4648_v22 = vadd.f32 %v1596_v17, %v1519_v0  ;;  %v528_v41 = vpop.f32.mrf.mxu0  ;;  %v8495_v0 = vrot.slane %v4609_v16, 7  ;;  %v8496_v17 = vrot.slane %v4602_v48, 7  ;;  %v8741_v48 = vld [vmem:[#allocation18_spill] sm:$0xff] }
 0x12d   : > { %v4656_v6 = vsel %vm8259_vm0, %v8493_v30, %v8176_v49  ;;  %v4674_v30 = vmul.f32 %v4025_v37, %v4609_v16  ;;  %v4677_v49 = vadd.f32 %v522_v23, %v3992_v26  ;;  %8500 = vst [vmem:[#allocation94_spill] sm:$0xff] %v4684_v20  ;;  %v4687_v51 = vadd.f32 %v528_v41, %v3992_v26 }
 0x12e   : > { %8492 = vst [vmem:[#allocation89_spill] sm:$0xff] %v4648_v22  ;;  %8494 = vst [vmem:[#allocation90_spill] sm:$0xff] %v4656_v6  ;;  %v1125_v44 = vsel %vm4543_vm8, %v4656_v6, 0.0  ;;  %v4670_v56 = vsel %vm8259_vm0, %v8496_v17, %v8495_v0  ;;  %v530_v0 = vpop.f32.mrf.mxu0  ;;  %v4706_v23 = vmul.f32 %v4013_v33, %v4684_v20 }
 0x12f   : > { %8497 = vst [vmem:[#allocation91_spill] sm:$0xff] %v4670_v56  ;;  %8498 = vst [vmem:[#allocation92_spill] sm:$0xff] %v4674_v30  ;;  %v1458_v38 = vmul.f32 %v3949_v8, %v1125_v44  ;;  %v1126_v6 = vsel %vm4543_vm8, %v4670_v56, 0.0  ;;  %v4694_v44 = vmul.f32 %v3968_v15, %v4677_v49  ;;  %v4699_v45 = vmul.f32 %v3998_v28, %v4677_v49 }
 0x130   : > { %8499 = vst [vmem:[#allocation93_spill] sm:$0xff] %v4677_v49  ;;  %8501 = vst [vmem:[#allocation95_spill] sm:$0xff] %v4687_v51  ;;  %v1459_v17 = vmul.f32 %v3980_v19, %v1126_v6  ;;  %v532_v22 = vpop.f32.mrf.mxu0  ;;  %v4710_v30 = vmul.f32 %v4025_v37, %v4684_v20  ;;  %v8509_v56 = vand.u32 15, %v4063_v50  ;;  %v8515_v50 = vrot.slane %v4687_v51, 7 }
 0x131   : > { %8502 = vst [vmem:[#allocation96_spill] sm:$0xff] %v4694_v44  ;;  %v1522_v46 = vadd.f32 %v1458_v38, %v3958_v10  ;;  %8503 = vst [vmem:[#allocation97_spill] sm:$0xff] %v4699_v45  ;;  %v8506_v44 = vand.u32 15, %v4019_v35  ;;  %v4732_v35 = vmul.f32 %v3998_v28, %v4687_v51 }
 0x132   : > { %v1523_v6 = vadd.f32 %v1459_v17, %v4010_v32  ;;  %8504 = vst [vmem:[#allocation98_spill] sm:$0xff] %v4706_v23  ;;  %8505 = vst [vmem:[#allocation99_spill] sm:$0xff] %v4710_v30  ;;  %vm4721_vm11 = vcmp.lt.s32.totalorder %v8509_v56, 15  ;;  %v1603_v30 = vmul.f32 %v3968_v15, %v4687_v51  ;;  %v8516_v56 = vrot.slane %v4677_v49, 7  ;;  %v8859_v17 = vld [vmem:[#allocation45_spill] sm:$0xff] }
 0x133   : > { %vm4715_vm10 = vcmp.lt.s32.totalorder %v8506_v44, 15  ;;  %v4725_v41 = vadd.f32 %v1599_v57, %v1522_v46  ;;  %8513 = vst [vmem:[#allocation101_spill] sm:$0xff] %v4732_v35  ;;  %v534_v44 = vpop.f32.mrf.mxu0  ;;  %v4745_v57 = vadd.f32 %v530_v0, %v4001_v29  ;;  %v4748_v23 = vadd.f32 %v532_v22, %v3992_v26 }
 0x134   : > { %v4734_v38 = vadd.f32 %v1600_v47, %v1523_v6  ;;  %v4742_v46 = vsel %vm8259_vm0, %v8516_v56, %v8515_v50  ;;  %v8521_v35 = vmov 0  ;;  %v4760_v6 = vadd.f32 %v534_v44, %v4001_v29 }
 0x135   : > { %8512 = vst [vmem:[#allocation100_spill] sm:$0xff] %v4725_v41  ;;  %8517 = vst [vmem:[#allocation103_spill] sm:$0xff] %v4742_v46  ;;  %v8520_v41 = vand.u32 15, %v4083_v58  ;;  %v1129_v47 = vsel %vm4628_vm9, %v4742_v46, 0.0  ;;  %v538_v50 = vpop.f32.mrf.mxu0  ;;  %v8525_v0 = vrot.slane %v4318_v54, 1  ;;  %v8526_v58 = vrot.slane %v4220_v9, 1 }
 0x136   : > { %8514 = vst [vmem:[#allocation102_spill] sm:$0xff] %v4734_v38  ;;  %8518 = vst [vmem:[#allocation104_spill] sm:$0xff] %v4745_v57  ;;  %v1462_v56 = vmul.f32 %v3949_v8, %v1129_v47  ;;  %v1604_v51 = vmul.f32 %v4013_v33, %v4745_v57  ;;  %v8529_v46 = vrot.slane %v4745_v57, 7  ;;  %v4802_v49 = vmul.f32 %v3998_v28, %v4748_v23 }
 0x137   : > { %8519 = vst [vmem:[#allocation105_spill] sm:$0xff] %v4748_v23  ;;  %vm4752_vm12 = vcmp.ge.s32.totalorder %v8520_v41, 1  ;;  %8524 = vst [vmem:[#allocation107_spill] sm:$0xff] %v4760_v6  ;;  %v4767_v22 = vsel %vm8245_vm1, %v4483_v52, %v8525_v0  ;;  %v4774_v41 = vsel %vm8245_vm1, %v8526_v58, %v4483_v52  ;;  %v4783_v0 = vmul.f32 %v4025_v37, %v4745_v57  ;;  %v540_v47 = vpop.f32.mrf.mxu0 }
 0x138   : > { %v8522_v35 = vsel %vm4752_vm12, 4294967295, %v8521_v35  ;;  %v4789_v58 = vmul.f32 %v3968_v15, %v4748_v23  ;;  %v1526_v44 = vadd.f32 %v1462_v56, %v3958_v10  ;;  %v8530_v52 = vrot.slane %v4684_v20, 7  ;;  %8532 = vst [vmem:[#allocation111_spill] sm:$0xff] %v4802_v49 }
 0x139   : > { %8523 = vst [vmem:[#allocation106_spill] sm:$0xff] %v8522_v35  ;;  %8527 = vst [vmem:[#allocation108_spill] sm:$0xff] %v4783_v0  ;;  %v4811_v0 = vmul.f32 %v4013_v33, %v4760_v6  ;;  %v4821_v38 = vadd.f32 %v538_v50, %v3992_v26  ;;  %v4824_v5 = vadd.f32 %v540_v47, %v4001_v29  ;;  %v8540_v20 = vmov 0 }
 0x13a   : > { %8528 = vst [vmem:[#allocation109_spill] sm:$0xff] %v4789_v58  ;;  %v4798_v16 = vsel %vm8259_vm0, %v8530_v52, %v8529_v46  ;;  %v4815_v52 = vmul.f32 %v4025_v37, %v4760_v6  ;;  %v542_v46 = vpop.f32.mrf.mxu0  ;;  %v4817_v57 = vadd.f32 %v1603_v30, %v1526_v44  ;;  %v8543_v30 = vrot.slane %v4220_v9, 1 }
 0x13b   : > { %8531 = vst [vmem:[#allocation110_spill] sm:$0xff] %v4798_v16  ;;  %v1130_v58 = vsel %vm4628_vm9, %v4798_v16, 0.0  ;;  %8533 = vst [vmem:[#allocation112_spill] sm:$0xff] %v4811_v0  ;;  %v4827_v56 = vadd.f32 %v542_v46, %v3992_v26  ;;  %v8539_v0 = vand.u32 15, %v4087_v60  ;;  %v1607_v9 = vmul.f32 %v3968_v15, %v4821_v38 }
 0x13c   : > { %8534 = vst [vmem:[#allocation113_spill] sm:$0xff] %v4815_v52  ;;  %8535 = vst [vmem:[#allocation114_spill] sm:$0xff] %v4817_v57  ;;  %v1463_v49 = vmul.f32 %v3980_v19, %v1130_v58  ;;  %v544_v16 = vpop.f32.mrf.mxu0  ;;  %v4840_v50 = vsel %vm8245_vm1, %v4160_v55, %v8543_v30  ;;  %v4855_v46 = vmul.f32 %v3998_v28, %v4821_v38  ;;  %v8546_v47 = vrot.slane %v4748_v23, 7 }
 0x13d   : > { %8536 = vst [vmem:[#allocation115_spill] sm:$0xff] %v4821_v38  ;;  %8537 = vst [vmem:[#allocation116_spill] sm:$0xff] %v4824_v5  ;;  %vm4831_vm13 = vcmp.ge.s32.totalorder %v8539_v0, 1  ;;  %v8206_v0 = vrot.slane %v4821_v38, 7  ;;  %v1608_v58 = vmul.f32 %v4013_v33, %v4824_v5  ;;  %v4898_v23 = vmul.f32 %v3998_v28, %v4827_v56 }
 0x13e   : > { %8538 = vst [vmem:[#allocation117_spill] sm:$0xff] %v4827_v56  ;;  %v8541_v20 = vsel %vm4831_vm13, 4294967295, %v8540_v20  ;;  %v1527_v60 = vadd.f32 %v1463_v49, %v4010_v32  ;;  %8544 = vst [vmem:[#allocation119_spill] sm:$0xff] %v4855_v46  ;;  %v548_v52 = vpop.f32.mrf.mxu0  ;;  %v4873_v46 = vmul.f32 %v4025_v37, %v4824_v5  ;;  %v8557_v35 = vsel %vm4170_vm4, %v4312_v43, 0.0 }
 0x13f   : > { %8542 = vst [vmem:[#allocation118_spill] sm:$0xff] %v8541_v20  ;;  %v4869_v57 = vsel %vm8259_vm0, %v8546_v47, %v8206_v0  ;;  %v4890_v0 = vmul.f32 %v3968_v15, %v4827_v56  ;;  %8553 = vst [vmem:[#allocation125_spill] sm:$0xff] %v4898_v23  ;;  %v4905_v47 = vadd.f32 %v548_v52, %v3992_v26  ;;  %v8559_v52 = vand.u32 15, %v4090_v61 }
 0x140   : > { %v4861_v49 = vadd.f32 %v1604_v51, %v1527_v60  ;;  %8547 = vst [vmem:[#allocation121_spill] sm:$0xff] %v4869_v57  ;;  %8548 = vst [vmem:[#allocation122_spill] sm:$0xff] %v4873_v46  ;;  %v1133_v30 = vsel %vm4752_vm12, %v4869_v57, 0.0  ;;  %v8549_v51 = vrot.slane %v4824_v5, 7  ;;  %v8550_v60 = vrot.slane %v4760_v6, 7  ;;  %v550_v46 = vpop.f32.mrf.mxu0 }
 0x141   : > { %8552 = vst [vmem:[#allocation124_spill] sm:$0xff] %v4890_v0  ;;  %v1466_v44 = vmul.f32 %v3949_v8, %v1133_v30  ;;  %8555 = vst [vmem:[#allocation127_spill] sm:$0xff] %v4905_v47  ;;  %v4908_v0 = vadd.f32 %v550_v46, %v4001_v29  ;;  %vm4924_vm14 = vcmp.ge.s32.totalorder %v8559_v52, 1  ;;  %v8560_v46 = vmov 0 }
 0x142   : > { %8545 = vst [vmem:[#allocation120_spill] sm:$0xff] %v4861_v49  ;;  %v4885_v38 = vsel %vm8259_vm0, %v8550_v60, %v8549_v51  ;;  %v4901_v51 = vadd.f32 %v544_v16, %v4001_v29  ;;  %v552_v30 = vpop.f32.mrf.mxu0  ;;  %v8561_v46 = vsel %vm4924_vm14, 4294967295, %v8560_v46  ;;  %v1611_v61 = vmul.f32 %v3968_v15, %v4905_v47 }
 0x143   : > { %8551 = vst [vmem:[#allocation123_spill] sm:$0xff] %v4885_v38  ;;  %v1134_v57 = vsel %vm4752_vm12, %v4885_v38, 0.0  ;;  %8556 = vst [vmem:[#allocation128_spill] sm:$0xff] %v4908_v0  ;;  %v1443_v38 = vmul.f32 %v3980_v19, %v8557_v35  ;;  %v1530_v23 = vadd.f32 %v1466_v44, %v3958_v10  ;;  %v8219_v44 = vrot.slane %v4905_v47, 7 }
 0x144   : > { %8554 = vst [vmem:[#allocation126_spill] sm:$0xff] %v4901_v51  ;;  %v1467_v60 = vmul.f32 %v3980_v19, %v1134_v57  ;;  %v4920_v57 = vmul.f32 %v4013_v33, %v4901_v51  ;;  %8562 = vst [vmem:[#allocation130_spill] sm:$0xff] %v8561_v46  ;;  %v4931_v35 = vmul.f32 %v4025_v37, %v4901_v51  ;;  %v554_v16 = vpop.f32.mrf.mxu0 }
 0x145   : > { %v4935_v6 = vadd.f32 %v1607_v9, %v1530_v23  ;;  %v4941_v52 = vmul.f32 %v3998_v28, %v4905_v47  ;;  %v1612_v9 = vmul.f32 %v4013_v33, %v4908_v0  ;;  %v4980_v47 = vadd.f32 %v554_v16, %v4001_v29 }
 0x146   : > { %8558 = vst [vmem:[#allocation129_spill] sm:$0xff] %v4920_v57  ;;  %v1531_v5 = vadd.f32 %v1467_v60, %v4010_v32  ;;  %8563 = vst [vmem:[#allocation131_spill] sm:$0xff] %v4931_v35  ;;  %v8567_v35 = vrot.slane %v4827_v56, 7 }
 0x147   : > { %8564 = vst [vmem:[#allocation132_spill] sm:$0xff] %v4935_v6  ;;  %8565 = vst [vmem:[#allocation133_spill] sm:$0xff] %v4941_v52  ;;  %v558_v6 = vpop.f32.mrf.mxu0 }
 0x148   : > { %v4944_v57 = vadd.f32 %v1608_v58, %v1531_v5  ;;  %v4952_v49 = vsel %vm8259_vm0, %v8567_v35, %v8219_v44  ;;  %v8569_v5 = vrot.slane %v4908_v0, 7  ;;  %v8570_v58 = vrot.slane %v4901_v51, 7  ;;  %8574 = vst [vmem:[#allocation139_spill] sm:$0xff] %v4980_v47  ;;  %v8739_v51 = vld [vmem:[#allocation17_spill] sm:$0xff] }
 0x149   : > { %8568 = vst [vmem:[#allocation135_spill] sm:$0xff] %v4952_v49  ;;  %v1137_v60 = vsel %vm4831_vm13, %v4952_v49, 0.0  ;;  %v4970_v35 = vmul.f32 %v4025_v37, %v4908_v0  ;;  %v4973_v44 = vadd.f32 %v552_v30, %v3992_v26  ;;  %v4983_v56 = vadd.f32 %v558_v6, %v3992_v26 }
 0x14a   : > { %8566 = vst [vmem:[#allocation134_spill] sm:$0xff] %v4944_v57  ;;  %v4966_v52 = vsel %vm8259_vm0, %v8570_v58, %v8569_v5  ;;  %v1470_v23 = vmul.f32 %v3949_v8, %v1137_v60  ;;  %v560_v5 = vpop.f32.mrf.mxu0  ;;  %v5002_v30 = vmul.f32 %v4013_v33, %v4980_v47 }
 0x14b   : > { %8571 = vst [vmem:[#allocation136_spill] sm:$0xff] %v4966_v52  ;;  %8572 = vst [vmem:[#allocation137_spill] sm:$0xff] %v4970_v35  ;;  %v1138_v49 = vsel %vm4831_vm13, %v4966_v52, 0.0  ;;  %v4990_v60 = vmul.f32 %v3968_v15, %v4973_v44  ;;  %v4995_v16 = vmul.f32 %v3998_v28, %v4973_v44  ;;  %v5006_v35 = vmul.f32 %v4025_v37, %v4980_v47 }
 0x14c   : > { %8573 = vst [vmem:[#allocation138_spill] sm:$0xff] %v4973_v44  ;;  %8575 = vst [vmem:[#allocation140_spill] sm:$0xff] %v4983_v56  ;;  %v1471_v58 = vmul.f32 %v3980_v19, %v1138_v49  ;;  %v1534_v20 = vadd.f32 %v1470_v23, %v3958_v10  ;;  %v562_v57 = vpop.f32.mrf.mxu0  ;;  %v8232_v23 = vrot.slane %v4983_v56, 7  ;;  %v1615_v52 = vmul.f32 %v3968_v15, %v4983_v56 }
 0x14d   : > { %8576 = vst [vmem:[#allocation141_spill] sm:$0xff] %v4990_v60  ;;  %8577 = vst [vmem:[#allocation142_spill] sm:$0xff] %v4995_v16  ;;  %v5032_v16 = vadd.f32 %v562_v57, %v3992_v26  ;;  %v1507_v57 = vadd.f32 %v1443_v38, %v4010_v32  ;;  %vm8713_vm13 = vcmp.lt.s32.totalorder %v3938_v3, 7 }
 0x14e   : > { %v1535_v49 = vadd.f32 %v1471_v58, %v4010_v32  ;;  %8578 = vst [vmem:[#allocation143_spill] sm:$0xff] %v5002_v30  ;;  %8579 = vst [vmem:[#allocation144_spill] sm:$0xff] %v5006_v35  ;;  %v5009_v60 = vadd.f32 %v1611_v61, %v1534_v20  ;;  %v5016_v58 = vmul.f32 %v3998_v28, %v4983_v56  ;;  %v564_v6 = vpop.f32.mrf.mxu0  ;;  %v8583_v30 = vrot.slane %v4973_v44, 7 }
 0x14f   : > { %v5029_v61 = vadd.f32 %v560_v5, %v4001_v29  ;;  %8586 = vst [vmem:[#allocation150_spill] sm:$0xff] %v5032_v16  ;;  %v8587_v35 = vand.u32 15, %v4093_v62  ;;  %v1445_v5 = vmul.f32 %v3980_v19, %v4415_v18  ;;  %v5062_v38 = vmul.f32 %v3968_v15, %v5032_v16 }
 0x150   : > { %8580 = vst [vmem:[#allocation145_spill] sm:$0xff] %v5009_v60  ;;  %8581 = vst [vmem:[#allocation146_spill] sm:$0xff] %v5016_v58  ;;  %v5018_v0 = vadd.f32 %v1612_v9, %v1535_v49  ;;  %v5026_v20 = vsel %vm8259_vm0, %v8583_v30, %v8232_v23  ;;  %v8588_v58 = vmov 0  ;;  %v5044_v49 = vadd.f32 %v564_v6, %v4001_v29  ;;  %v568_v30 = vpop.f32.mrf.mxu0 }
 0x151   : > { %8584 = vst [vmem:[#allocation148_spill] sm:$0xff] %v5026_v20  ;;  %8585 = vst [vmem:[#allocation149_spill] sm:$0xff] %v5029_v61  ;;  %vm5036_vm15 = vcmp.ge.s32.totalorder %v8587_v35, 1  ;;  %v1141_v9 = vsel %vm4924_vm14, %v5026_v20, 0.0  ;;  %v1616_v60 = vmul.f32 %v4013_v33, %v5029_v61  ;;  %v5056_v20 = vmul.f32 %v4025_v37, %v5029_v61 }
 0x152   : > { %8582 = vst [vmem:[#allocation147_spill] sm:$0xff] %v5018_v0  ;;  %v8589_v58 = vsel %vm5036_vm15, 4294967295, %v8588_v58  ;;  %8591 = vst [vmem:[#allocation152_spill] sm:$0xff] %v5044_v49  ;;  %v1474_v23 = vmul.f32 %v3949_v8, %v1141_v9  ;;  %v570_v9 = vpop.f32.mrf.mxu0  ;;  %v8594_v35 = vrot.slane %v5029_v61, 7  ;;  %v8595_v44 = vrot.slane %v4980_v47, 7 }
 0x153   : > { %8590 = vst [vmem:[#allocation151_spill] sm:$0xff] %v8589_v58  ;;  %8592 = vst [vmem:[#allocation153_spill] sm:$0xff] %v5056_v20  ;;  %v5075_v6 = vmul.f32 %v3998_v28, %v5032_v16  ;;  %v5084_v20 = vmul.f32 %v4013_v33, %v5044_v49  ;;  %v5094_v56 = vadd.f32 %v568_v30, %v3992_v26  ;;  %v8605_v47 = vmov 0 }
 0x154   : > { %8593 = vst [vmem:[#allocation154_spill] sm:$0xff] %v5062_v38  ;;  %v1538_v62 = vadd.f32 %v1474_v23, %v3958_v10  ;;  %v5071_v0 = vsel %vm8259_vm0, %v8595_v44, %v8594_v35  ;;  %v5088_v44 = vmul.f32 %v4025_v37, %v5044_v49  ;;  %v572_v35 = vpop.f32.mrf.mxu0  ;;  %v5097_v46 = vadd.f32 %v570_v9, %v4001_v29 }
 0x155   : > { %8596 = vst [vmem:[#allocation155_spill] sm:$0xff] %v5071_v0  ;;  %8597 = vst [vmem:[#allocation156_spill] sm:$0xff] %v5075_v6  ;;  %v1142_v38 = vsel %vm4924_vm14, %v5071_v0, 0.0  ;;  %v5100_v23 = vadd.f32 %v572_v35, %v3992_v26  ;;  %v5114_v30 = vmul.f32 %v4022_v36, %v3986_v24  ;;  %v8250_v9 = vrot.slane %v5094_v56, 7 }
 0x156   : > { %8598 = vst [vmem:[#allocation157_spill] sm:$0xff] %v5084_v20  ;;  %8599 = vst [vmem:[#allocation158_spill] sm:$0xff] %v5088_v44  ;;  %v5090_v61 = vadd.f32 %v1615_v52, %v1538_v62  ;;  %v1475_v6 = vmul.f32 %v3980_v19, %v1142_v38  ;;  %v574_v0 = vpop.f32.mrf.mxu0  ;;  %v8604_v20 = vand.u32 15, %v4100_v1  ;;  %v1509_v52 = vadd.f32 %v1445_v5, %v4010_v32 }
 0x157   : > { %8601 = vst [vmem:[#allocation160_spill] sm:$0xff] %v5094_v56  ;;  %8602 = vst [vmem:[#allocation161_spill] sm:$0xff] %v5097_v46  ;;  %v5110_v62 = vadd.f32 %v4301_v11, %v1507_v57  ;;  %v1619_v1 = vmul.f32 %v3968_v15, %v5094_v56  ;;  %v1620_v57 = vmul.f32 %v4013_v33, %v5097_v46  ;;  %v8610_v35 = vrot.slane %v5032_v16, 7 }
 0x158   : > { %8600 = vst [vmem:[#allocation159_spill] sm:$0xff] %v5090_v61  ;;  %8603 = vst [vmem:[#allocation162_spill] sm:$0xff] %v5100_v23  ;;  %vm5104_vm1 = vcmp.ge.s32.totalorder %v8604_v20, 1  ;;  %v1539_v38 = vadd.f32 %v1475_v6, %v4010_v32  ;;  %v5123_v20 = vmul.f32 %v3998_v28, %v5094_v56  ;;  %v578_v44 = vpop.f32.mrf.mxu0  ;;  %v5166_v16 = vmul.f32 %v3998_v28, %v5100_v23 }
 0x159   : > { %v8606_v47 = vsel %vm5104_vm1, 4294967295, %v8605_v47  ;;  %v5137_v61 = vsel %vm8259_vm0, %v8610_v35, %v8250_v9  ;;  %v5158_v9 = vmul.f32 %v3968_v15, %v5100_v23  ;;  %v5173_v35 = vadd.f32 %v578_v44, %v3992_v26 }
 0x15a   : > { %8607 = vst [vmem:[#allocation163_spill] sm:$0xff] %v8606_v47  ;;  %8608 = vst [vmem:[#allocation164_spill] sm:$0xff] %v5123_v20  ;;  %v5129_v6 = vadd.f32 %v1616_v60, %v1539_v38  ;;  %v5141_v20 = vmul.f32 %v4025_v37, %v5097_v46  ;;  %v1145_v11 = vsel %vm5036_vm15, %v5137_v61, 0.0  ;;  %v8613_v60 = vrot.slane %v5097_v46, 7 }
 0x15b   : > { %8611 = vst [vmem:[#allocation166_spill] sm:$0xff] %v5137_v61  ;;  %v8614_v38 = vrot.slane %v5044_v49, 7  ;;  %8616 = vst [vmem:[#allocation169_spill] sm:$0xff] %v5158_v9  ;;  %v1478_v5 = vmul.f32 %v3949_v8, %v1145_v11  ;;  %v8623_v44 = vmov 0 }
 0x15c   : > { %8609 = vst [vmem:[#allocation165_spill] sm:$0xff] %v5129_v6  ;;  %8612 = vst [vmem:[#allocation167_spill] sm:$0xff] %v5141_v20  ;;  %v580_v20 = vpop.f32.mrf.mxu0  ;;  %v5179_v6 = vadd.f32 %v4351_v63, %v1509_v52  ;;  %v8264_v52 = vrot.slane %v5173_v35, 7 }
 0x15d   : > { %v5153_v56 = vsel %vm8259_vm0, %v8614_v38, %v8613_v60  ;;  %8617 = vst [vmem:[#allocation170_spill] sm:$0xff] %v5166_v16  ;;  %v5169_v60 = vadd.f32 %v574_v0, %v4001_v29  ;;  %8619 = vst [vmem:[#allocation172_spill] sm:$0xff] %v5173_v35  ;;  %v5176_v9 = vadd.f32 %v580_v20, %v4001_v29 }
 0x15e   : > { %8615 = vst [vmem:[#allocation168_spill] sm:$0xff] %v5153_v56  ;;  %v1146_v61 = vsel %vm5036_vm15, %v5153_v56, 0.0  ;;  %v582_v11 = vpop.f32.mrf.mxu0  ;;  %v1542_v58 = vadd.f32 %v1478_v5, %v3958_v10  ;;  %vm8631_vm15 = vcmp.lt.s32.totalorder %v3938_v3, 1 }
 0x15f   : > { %8618 = vst [vmem:[#allocation171_spill] sm:$0xff] %v5169_v60  ;;  %v1479_v38 = vmul.f32 %v3980_v19, %v1146_v61  ;;  %8620 = vst [vmem:[#allocation173_spill] sm:$0xff] %v5176_v9  ;;  %v5186_v0 = vmul.f32 %v4013_v33, %v5169_v60  ;;  %v8622_v61 = vand.u32 15, %v4103_v4  ;;  %v5197_v63 = vmul.f32 %v4025_v37, %v5169_v60 }
 0x160   : > { %v584_v16 = vpop.f32.mrf.mxu0  ;;  %v5201_v56 = vadd.f32 %v1619_v1, %v1542_v58  ;;  %v1623_v4 = vmul.f32 %v3968_v15, %v5173_v35  ;;  %v1624_v1 = vmul.f32 %v4013_v33, %v5176_v9  ;;  %vm8635_vm14 = vmmov %vm8631_vm15 }
 0x161   : > { %8621 = vst [vmem:[#allocation174_spill] sm:$0xff] %v5186_v0  ;;  %vm5190_vm0 = vcmp.ge.s32.totalorder %v8622_v61, 1  ;;  %v1543_v20 = vadd.f32 %v1479_v38, %v4010_v32  ;;  %8626 = vst [vmem:[#allocation176_spill] sm:$0xff] %v5197_v63  ;;  %v5207_v61 = vmul.f32 %v3998_v28, %v5173_v35  ;;  %v8630_v63 = vrot.slane %v5100_v23, 7 }
 0x162   : > { %v8624_v44 = vsel %vm5190_vm0, 4294967295, %v8623_v44  ;;  %8627 = vst [vmem:[#allocation177_spill] sm:$0xff] %v5201_v56  ;;  %v588_v56 = vpop.f32.mrf.mxu0  ;;  %v5246_v35 = vadd.f32 %v584_v16, %v4001_v29 }
 0x163   : > { %8625 = vst [vmem:[#allocation175_spill] sm:$0xff] %v8624_v44  ;;  %8628 = vst [vmem:[#allocation178_spill] sm:$0xff] %v5207_v61  ;;  %v5210_v0 = vadd.f32 %v1620_v57, %v1543_v20  ;;  %v5218_v5 = vsel %vm8631_vm15, %v8630_v63, %v8264_v52  ;;  %v8633_v57 = vrot.slane %v5176_v9, 7  ;;  %v8634_v20 = vrot.slane %v5169_v60, 7 }
 0x164   : > { %8632 = vst [vmem:[#allocation180_spill] sm:$0xff] %v5218_v5  ;;  %v1149_v38 = vsel %vm5104_vm1, %v5218_v5, 0.0  ;;  %v5236_v63 = vmul.f32 %v4025_v37, %v5176_v9  ;;  %v5239_v52 = vadd.f32 %v582_v11, %v3992_v26  ;;  %8639 = vst [vmem:[#allocation184_spill] sm:$0xff] %v5246_v35  ;;  %v5249_v23 = vadd.f32 %v588_v56, %v3992_v26 }
 0x165   : > { %8629 = vst [vmem:[#allocation179_spill] sm:$0xff] %v5210_v0  ;;  %v5232_v61 = vsel %vm8635_vm14, %v8634_v20, %v8633_v57  ;;  %v1482_v58 = vmul.f32 %v3949_v8, %v1149_v38  ;;  %v590_v57 = vpop.f32.mrf.mxu0  ;;  %v5268_v11 = vmul.f32 %v4013_v33, %v5246_v35 }
 0x166   : > { %8636 = vst [vmem:[#allocation181_spill] sm:$0xff] %v5232_v61  ;;  %8637 = vst [vmem:[#allocation182_spill] sm:$0xff] %v5236_v63  ;;  %v1150_v5 = vsel %vm5104_vm1, %v5232_v61, 0.0  ;;  %v5256_v38 = vmul.f32 %v3968_v15, %v5239_v52  ;;  %v5261_v16 = vmul.f32 %v3998_v28, %v5239_v52  ;;  %v5272_v63 = vmul.f32 %v4025_v37, %v5246_v35 }
 0x167   : > { %8638 = vst [vmem:[#allocation183_spill] sm:$0xff] %v5239_v52  ;;  %8640 = vst [vmem:[#allocation185_spill] sm:$0xff] %v5249_v23  ;;  %v1483_v20 = vmul.f32 %v3980_v19, %v1150_v5  ;;  %v1546_v47 = vadd.f32 %v1482_v58, %v3958_v10  ;;  %v592_v0 = vpop.f32.mrf.mxu0  ;;  %v8277_v58 = vrot.slane %v5249_v23, 7  ;;  %v1627_v61 = vmul.f32 %v3968_v15, %v5249_v23 }
 0x168   : > { %8641 = vst [vmem:[#allocation186_spill] sm:$0xff] %v5256_v38  ;;  %8642 = vst [vmem:[#allocation187_spill] sm:$0xff] %v5261_v16  ;;  %v5298_v16 = vadd.f32 %v592_v0, %v3992_v26  ;;  %v8657_v0 = vsel %vm4715_vm10, %v4774_v41, 0.0 }
 0x169   : > { %v1547_v5 = vadd.f32 %v1483_v20, %v4010_v32  ;;  %8643 = vst [vmem:[#allocation188_spill] sm:$0xff] %v5268_v11  ;;  %8644 = vst [vmem:[#allocation189_spill] sm:$0xff] %v5272_v63  ;;  %v5275_v38 = vadd.f32 %v1623_v4, %v1546_v47  ;;  %v5282_v20 = vmul.f32 %v3998_v28, %v5249_v23  ;;  %v594_v56 = vpop.f32.mrf.mxu0  ;;  %v8648_v11 = vrot.slane %v5239_v52, 7 }
 0x16a   : > { %v5295_v4 = vadd.f32 %v590_v57, %v4001_v29  ;;  %8651 = vst [vmem:[#allocation195_spill] sm:$0xff] %v5298_v16  ;;  %v8652_v63 = vand.u32 15, %v4112_v13  ;;  %v1721_v57 = vmul.f32 %v4022_v36, %v4840_v50  ;;  %v5319_v13 = vmul.f32 %v4022_v36, %v8657_v0 }
 0x16b   : > { %8645 = vst [vmem:[#allocation190_spill] sm:$0xff] %v5275_v38  ;;  %8646 = vst [vmem:[#allocation191_spill] sm:$0xff] %v5282_v20  ;;  %v5284_v9 = vadd.f32 %v1624_v1, %v1547_v5  ;;  %v5292_v47 = vsel %vm8635_vm14, %v8648_v11, %v8277_v58  ;;  %v8653_v20 = vmov 0  ;;  %v5310_v5 = vadd.f32 %v594_v56, %v4001_v29  ;;  %v598_v11 = vpop.f32.mrf.mxu0 }
 0x16c   : > { %8649 = vst [vmem:[#allocation193_spill] sm:$0xff] %v5292_v47  ;;  %8650 = vst [vmem:[#allocation194_spill] sm:$0xff] %v5295_v4  ;;  %vm5302_vm15 = vcmp.ge.s32.totalorder %v8652_v63, 1  ;;  %v1153_v1 = vsel %vm5190_vm0, %v5292_v47, 0.0  ;;  %v1628_v56 = vmul.f32 %v4013_v33, %v5295_v4  ;;  %v5328_v38 = vmul.f32 %v4025_v37, %v5295_v4 }
 0x16d   : > { %8647 = vst [vmem:[#allocation192_spill] sm:$0xff] %v5284_v9  ;;  %v8654_v20 = vsel %vm5302_vm15, 4294967295, %v8653_v20  ;;  %8656 = vst [vmem:[#allocation197_spill] sm:$0xff] %v5310_v5  ;;  %v1486_v63 = vmul.f32 %v3949_v8, %v1153_v1  ;;  %v5334_v0 = vmul.f32 %v3968_v15, %v5298_v16  ;;  %v600_v1 = vpop.f32.mrf.mxu0  ;;  %v8660_v47 = vrot.slane %v5295_v4, 7 }
 0x16e   : > { %8655 = vst [vmem:[#allocation196_spill] sm:$0xff] %v8654_v20  ;;  %8658 = vst [vmem:[#allocation198_spill] sm:$0xff] %v5328_v38  ;;  %v8661_v9 = vrot.slane %v5246_v35, 7  ;;  %v5347_v23 = vmul.f32 %v3998_v28, %v5298_v16  ;;  %v5356_v38 = vmul.f32 %v4013_v33, %v5310_v5  ;;  %v5366_v52 = vadd.f32 %v598_v11, %v3992_v26 }
 0x16f   : > { %8659 = vst [vmem:[#allocation199_spill] sm:$0xff] %v5334_v0  ;;  %v1550_v58 = vadd.f32 %v1486_v63, %v3958_v10  ;;  %v5369_v44 = vadd.f32 %v600_v1, %v4001_v29  ;;  %v8671_v35 = vmov 0  ;;  %v8677_v1 = vrot.slane %v5298_v16, 7 }
 0x170   : > { %v5343_v60 = vsel %vm8635_vm14, %v8661_v9, %v8660_v47  ;;  %8663 = vst [vmem:[#allocation201_spill] sm:$0xff] %v5347_v23  ;;  %8664 = vst [vmem:[#allocation202_spill] sm:$0xff] %v5356_v38  ;;  %v5360_v9 = vmul.f32 %v4025_v37, %v5310_v5  ;;  %v602_v47 = vpop.f32.mrf.mxu0  ;;  %v8670_v38 = vand.u32 15, %v4115_v14 }
 0x171   : > { %8662 = vst [vmem:[#allocation200_spill] sm:$0xff] %v5343_v60  ;;  %v1154_v0 = vsel %vm5190_vm0, %v5343_v60, 0.0  ;;  %v5362_v4 = vadd.f32 %v1627_v61, %v1550_v58  ;;  %8667 = vst [vmem:[#allocation205_spill] sm:$0xff] %v5366_v52  ;;  %v5372_v63 = vadd.f32 %v602_v47, %v3992_v26  ;;  %v5382_v61 = vmul.f32 %v4022_v36, %v4767_v22 }
 0x172   : > { %8665 = vst [vmem:[#allocation203_spill] sm:$0xff] %v5360_v9  ;;  %v1487_v23 = vmul.f32 %v3980_v19, %v1154_v0  ;;  %8668 = vst [vmem:[#allocation206_spill] sm:$0xff] %v5369_v44  ;;  %v604_v60 = vpop.f32.mrf.mxu0  ;;  %vm5376_vm14 = vcmp.ge.s32.totalorder %v8670_v38, 1  ;;  %v8674_v58 = vsel %vm4721_vm11, %v4617_v2, 0.0  ;;  %v5393_v0 = vadd.f32 %v4196_v31, %v4128_v53 }
 0x173   : > { %8666 = vst [vmem:[#allocation204_spill] sm:$0xff] %v5362_v4  ;;  %8669 = vst [vmem:[#allocation207_spill] sm:$0xff] %v5372_v63  ;;  %v8672_v35 = vsel %vm5376_vm14, 4294967295, %v8671_v35  ;;  %v5389_v11 = vmul.f32 %v4022_v36, %v8674_v58  ;;  %v8302_v38 = vrot.slane %v5366_v52, 7  ;;  %v1631_v47 = vmul.f32 %v3968_v15, %v5366_v52 }
 0x174   : > { %8673 = vst [vmem:[#allocation208_spill] sm:$0xff] %v8672_v35  ;;  %v1551_v14 = vadd.f32 %v1487_v23, %v4010_v32  ;;  %v5402_v9 = vmul.f32 %v3998_v28, %v5366_v52  ;;  %v1632_v53 = vmul.f32 %v4013_v33, %v5369_v44  ;;  %v608_v31 = vpop.f32.mrf.mxu0  ;;  %vm8678_vm0 = vcmp.lt.s32.totalorder %v3938_v3, 1 }
 0x175   : > { %v5416_v46 = vsel %vm8678_vm0, %v8677_v1, %v8302_v38  ;;  %vm8683_vm1 = vmmov %vm8678_vm0  ;;  %v5437_v38 = vmul.f32 %v3968_v15, %v5372_v63  ;;  %v5445_v16 = vmul.f32 %v3998_v28, %v5372_v63  ;;  %v5452_v1 = vadd.f32 %v608_v31, %v3992_v26 }
 0x176   : > { %8675 = vst [vmem:[#allocation209_spill] sm:$0xff] %v5402_v9  ;;  %v5408_v23 = vadd.f32 %v1628_v56, %v1551_v14  ;;  %8679 = vst [vmem:[#allocation211_spill] sm:$0xff] %v5416_v46  ;;  %v5420_v9 = vmul.f32 %v4025_v37, %v5369_v44  ;;  %v1157_v58 = vsel %vm5302_vm15, %v5416_v46, 0.0  ;;  %v8681_v56 = vrot.slane %v5369_v44, 7 }
 0x177   : > { %v8682_v14 = vrot.slane %v5310_v5, 7  ;;  %8685 = vst [vmem:[#allocation214_spill] sm:$0xff] %v5437_v38  ;;  %v1490_v4 = vmul.f32 %v3949_v8, %v1157_v58  ;;  %8686 = vst [vmem:[#allocation215_spill] sm:$0xff] %v5445_v16  ;;  %v968_v31 = vrot.slane %v5452_v1, 7  ;;  %v1635_v16 = vmul.f32 %v3968_v15, %v5452_v1 }
 0x178   : > { %8676 = vst [vmem:[#allocation210_spill] sm:$0xff] %v5408_v23  ;;  %8680 = vst [vmem:[#allocation212_spill] sm:$0xff] %v5420_v9  ;;  %v610_v9 = vpop.f32.mrf.mxu0  ;;  %v5458_v23 = vadd.f32 %v1721_v57, %v4234_v12 }
 0x179   : > { %v5432_v52 = vsel %vm8683_vm1, %v8682_v14, %v8681_v56  ;;  %v5448_v56 = vadd.f32 %v604_v60, %v4001_v29  ;;  %8688 = vst [vmem:[#allocation217_spill] sm:$0xff] %v5452_v1  ;;  %v5455_v38 = vadd.f32 %v610_v9, %v4001_v29  ;;  %v1554_v20 = vadd.f32 %v1490_v4, %v3958_v10  ;;  %vm8698_vm1 = vmmov %vm8678_vm0 }
 0x17a   : > { %8684 = vst [vmem:[#allocation213_spill] sm:$0xff] %v5432_v52  ;;  %v1158_v46 = vsel %vm5302_vm15, %v5432_v52, 0.0  ;;  %v612_v58 = vpop.f32.mrf.mxu0  ;;  %v5480_v52 = vmul.f32 %v3998_v28, %v5452_v1  ;;  %v8703_v1 = vmov 0  ;;  %vm8712_vm15 = vmmov %vm8698_vm1 }
 0x17b   : > { %8687 = vst [vmem:[#allocation216_spill] sm:$0xff] %v5448_v56  ;;  %v1491_v14 = vmul.f32 %v3980_v19, %v1158_v46  ;;  %8689 = vst [vmem:[#allocation218_spill] sm:$0xff] %v5455_v38  ;;  %v5465_v60 = vmul.f32 %v4013_v33, %v5448_v56  ;;  %v5470_v9 = vmul.f32 %v4025_v37, %v5448_v56 }
 0x17c   : > { %v614_v57 = vpop.f32.mrf.mxu0  ;;  %v5474_v4 = vadd.f32 %v1631_v47, %v1554_v20  ;;  %8693 = vst [vmem:[#allocation222_spill] sm:$0xff] %v5480_v52  ;;  %v1636_v47 = vmul.f32 %v4013_v33, %v5455_v38  ;;  %v8702_v20 = vand.u32 15, %v4016_v34  ;;  %vm8715_vm12 = vmmov %vm8698_vm1 }
 0x17d   : > { %8690 = vst [vmem:[#allocation219_spill] sm:$0xff] %v5465_v60  ;;  %v1555_v46 = vadd.f32 %v1491_v14, %v4010_v32  ;;  %8691 = vst [vmem:[#allocation220_spill] sm:$0xff] %v5470_v9  ;;  %v969_v14 = vrot.slane %v5455_v38, 7  ;;  %v8695_v9 = vrot.slane %v5372_v63, 7  ;;  %v5521_v63 = vadd.f32 %v614_v57, %v4001_v29 }
 0x17e   : > { %8692 = vst [vmem:[#allocation221_spill] sm:$0xff] %v5474_v4  ;;  %v618_v12 = vpop.f32.mrf.mxu0  ;;  %v8697_v4 = vrot.slane %v5448_v56, 7 }
 0x17f   : > { %v5483_v60 = vadd.f32 %v1632_v53, %v1555_v46  ;;  %v5489_v44 = vsel %vm8678_vm0, %v8695_v9, %v968_v31  ;;  %v5505_v46 = vmul.f32 %v4025_v37, %v5455_v38  ;;  %v5508_v9 = vadd.f32 %v612_v58, %v3992_v26  ;;  %8706 = vst [vmem:[#allocation229_spill] sm:$0xff] %v5521_v63 }
 0x180   : > { %8696 = vst [vmem:[#allocation224_spill] sm:$0xff] %v5489_v44  ;;  %v1161_v52 = vsel %vm5376_vm14, %v5489_v44, 0.0  ;;  %v5501_v53 = vsel %vm8698_vm1, %v8697_v4, %v969_v14  ;;  %vm5512_vm0 = vcmp.lt.s32.totalorder %v8702_v20, 15 }
 0x181   : > { %8694 = vst [vmem:[#allocation223_spill] sm:$0xff] %v5483_v60  ;;  %8699 = vst [vmem:[#allocation225_spill] sm:$0xff] %v5501_v53  ;;  %v8704_v1 = vsel %vm5512_vm0, 4294967295, %v8703_v1  ;;  %v1494_v44 = vmul.f32 %v3949_v8, %v1161_v52  ;;  %v1162_v4 = vsel %vm5376_vm14, %v5501_v53, 0.0  ;;  %v970_v34 = vrot.slane %v5508_v9, 7  ;;  %v620_v60 = vpop.f32.mrf.mxu0 }
 0x182   : > { %8700 = vst [vmem:[#allocation226_spill] sm:$0xff] %v5505_v46  ;;  %8701 = vst [vmem:[#allocation227_spill] sm:$0xff] %v5508_v9  ;;  %v5524_v46 = vadd.f32 %v618_v12, %v3992_v26  ;;  %v1495_v58 = vmul.f32 %v3980_v19, %v1162_v4  ;;  %v5529_v20 = vrot.slane %v5508_v9, 1  ;;  %v1637_v52 = vmul.f32 %v3968_v15, %v5508_v9 }
 0x183   : > { %8705 = vst [vmem:[#allocation228_spill] sm:$0xff] %v8704_v1  ;;  %v1558_v38 = vadd.f32 %v1494_v44, %v3958_v10  ;;  %v5536_v57 = vmul.f32 %v3998_v28, %v5508_v9  ;;  %v971_v12 = vrot.slane %v5521_v63, 7  ;;  %v5540_v53 = vrot.slane %v5521_v63, 1  ;;  %v8763_v1 = vld [vmem:[#allocation8_spill] sm:$0xff] }
 0x184   : > { %8707 = vst [vmem:[#allocation230_spill] sm:$0xff] %v5524_v46  ;;  %8708 = vst [vmem:[#allocation231_spill] sm:$0xff] %v5529_v20  ;;  %v1559_v4 = vadd.f32 %v1495_v58, %v4010_v32  ;;  %v5545_v56 = vsel %vm8698_vm1, %v968_v31, %v970_v34  ;;  %v5550_v15 = vsel %vm8712_vm15, %v970_v34, %v3946_v7 }
 0x185   : > { %8709 = vst [vmem:[#allocation232_spill] sm:$0xff] %v5536_v57  ;;  %8710 = vst [vmem:[#allocation233_spill] sm:$0xff] %v5540_v53  ;;  %v1292_v44 = vsel %vm8713_vm13, %v5529_v20, %v3986_v24  ;;  %v5556_v57 = vadd.f32 %v1635_v16, %v1558_v38  ;;  %v1496_v9 = vmul.f32 %v3949_v8, %v5545_v56 }
 0x186   : > { %8711 = vst [vmem:[#allocation234_spill] sm:$0xff] %v5545_v56  ;;  %v5562_v58 = vsel %vm8715_vm12, %v969_v14, %v971_v12  ;;  %v5567_v31 = vsel %vm8698_vm1, %v971_v12, %v3946_v7  ;;  %v5569_v5 = vadd.f32 %v1636_v47, %v1559_v4  ;;  %v1293_v16 = vsel %vm8713_vm13, %v5540_v53, %v3986_v24  ;;  %v622_v14 = vpop.f32.mrf.mxu0  ;;  %vm8725_vm15 = vmmov %vm8698_vm1 }
 0x187   : > { %8714 = vst [vmem:[#allocation235_spill] sm:$0xff] %v5556_v57  ;;  %8716 = vst [vmem:[#allocation236_spill] sm:$0xff] %v5562_v58  ;;  %v1497_v38 = vmul.f32 %v3980_v19, %v5562_v58  ;;  %v1638_v56 = vmul.f32 %v4013_v33, %v5521_v63  ;;  %v8718_v57 = vand.u32 15, %v3938_v3  ;;  %v1560_v47 = vadd.f32 %v1496_v9, %v3958_v10 }
 0x188   : > { %8717 = vst [vmem:[#allocation237_spill] sm:$0xff] %v5569_v5  ;;  %v5588_v4 = vmul.f32 %v4025_v37, %v5521_v63  ;;  %v1848_v5 = vrot.slane %v5524_v46, 7  ;;  %v5595_v33 = vmul.f32 %v3998_v28, %v5524_v46  ;;  %v5602_v9 = vadd.f32 %v620_v60, %v4001_v29  ;;  %vm8737_vm13 = vmmov %vm8698_vm1 }
 0x189   : > { %vm5581_vm12 = vcmp.ge.s32.totalorder %v8718_v57, 1  ;;  %v1561_v53 = vadd.f32 %v1497_v38, %v4010_v32  ;;  %v5599_v57 = vmul.f32 %v4039_v42, %v5524_v46  ;;  %v1701_v49 = vadd.f32 %v1637_v52, %v1560_v47  ;;  %v624_v46 = vpop.f32.mrf.mxu0 }
 0x18a   : > { %8721 = vst [vmem:[#allocation238_spill] sm:$0xff] %v5588_v4  ;;  %8722 = vst [vmem:[#allocation239_spill] sm:$0xff] %v5595_v33  ;;  %v5606_v4 = vsel %vm8725_vm15, %v970_v34, %v1848_v5  ;;  %v623_v58 = vadd.f32 %v622_v14, %v3992_v26  ;;  %v1420_v38 = vsel %vm5512_vm0, %v1292_v44, 0.0  ;;  %v5621_v34 = vmul.f32 %v4025_v37, %v5602_v9  ;;  %v8729_v26 = vld [vmem:[#allocation15_spill] sm:$0xff] }
 0x18b   : > { %8723 = vst [vmem:[#allocation240_spill] sm:$0xff] %v5599_v57  ;;  %8724 = vst [vmem:[#allocation241_spill] sm:$0xff] %v5602_v9  ;;  %v1702_v63 = vadd.f32 %v1638_v56, %v1561_v53  ;;  %v1918_v33 = vsel %vm5376_vm14, %v5606_v4, 0.0  ;;  %v1849_v57 = vrot.slane %v5602_v9, 7  ;;  %v5625_v44 = vmul.f32 %v8729_v26, %v5602_v9  ;;  %v8731_v56 = vld [vmem:[#allocation11_spill] sm:$0xff] }
 0x18c   : > { %8726 = vst [vmem:[#allocation242_spill] sm:$0xff] %v5606_v4  ;;  %v5617_v52 = vmul.f32 %v4035_v40, %v1918_v33  ;;  %8728 = vst [vmem:[#allocation244_spill] sm:$0xff] %v5621_v34  ;;  %v1778_v53 = vmul.f32 %v8731_v56, %v1420_v38  ;;  %v1850_v47 = vrot.slane %v623_v58, 7  ;;  %v5632_v60 = vrot.slane %v623_v58, 1  ;;  %v8735_v38 = vld [vmem:[#allocation12_spill] sm:$0xff] }
 0x18d   : > { %8730 = vst [vmem:[#allocation15_spill] sm:$0xff] %v5625_v44  ;;  %v5630_v14 = vsel %vm8698_vm1, %v971_v12, %v1849_v57  ;;  %v2212_v33 = vmul.f32 %v3998_v28, %v623_v58  ;;  %v5639_v4 = vmul.f32 %v4039_v42, %v623_v58  ;;  %v625_v44 = vadd.f32 %v624_v46, %v4001_v29  ;;  %vm8740_vm15 = vmmov %vm8698_vm1 }
 0x18e   : > { %8727 = vst [vmem:[#allocation243_spill] sm:$0xff] %v5617_v52  ;;  %8732 = vst [vmem:[#allocation11_spill] sm:$0xff] %v5630_v14  ;;  %v1919_v52 = vsel %vm5376_vm14, %v5630_v14, 0.0  ;;  %v1842_v34 = vadd.f32 %v1778_v53, %v1701_v49  ;;  %v5647_v12 = vsel %vm8737_vm13, %v1848_v5, %v1850_v47  ;;  %v1856_v28 = vsel %vm8740_vm15, %v1850_v47, %v8739_v51 }
 0x18f   : > { %8733 = vst [vmem:[#allocation245_spill] sm:$0xff] %v5632_v60  ;;  %8734 = vst [vmem:[#allocation246_spill] sm:$0xff] %v5639_v4  ;;  %v5643_v9 = vmul.f32 %v8735_v38, %v1919_v52  ;;  %vm8742_vm1 = vcmp.lt.s32.totalorder %v3938_v3, 7  ;;  %v1858_v29 = vsel %vm5581_vm12, %v1856_v28, 0.0  ;;  %v2071_v5 = vmul.f32 %v4035_v40, %v5647_v12 }
 0x190   : > { %8738 = vst [vmem:[#allocation247_spill] sm:$0xff] %v5647_v12  ;;  %v5656_v49 = vsel %vm8742_vm1, %v5632_v60, %v8741_v48  ;;  %v5668_v51 = vsel %vm8737_vm13, %v1850_v47, %v3946_v7  ;;  %v5671_v58 = vmul.f32 %v4035_v40, %v1858_v29  ;;  %v1421_v48 = vsel %vm5512_vm0, %v1293_v16, 0.0  ;;  %vm8747_vm15 = vmmov %vm8737_vm13  ;;  %v8749_v29 = vld [vmem:[#allocation21_spill] sm:$0xff] }
 0x191   : > { %8736 = vst [vmem:[#allocation12_spill] sm:$0xff] %v5643_v9  ;;  %8743 = vst [vmem:[#allocation17_spill] sm:$0xff] %v5656_v49  ;;  %v1851_v52 = vrot.slane %v625_v44, 7  ;;  %v5675_v53 = vrot.slane %v625_v44, 1  ;;  %v2135_v28 = vadd.f32 %v2071_v5, %v1842_v34  ;;  %v1779_v46 = vmul.f32 %v4022_v36, %v1421_v48  ;;  %v8758_v5 = vld [vmem:[#allocation49_spill] sm:$0xff] }
 0x192   : > { %8744 = vst [vmem:[#allocation18_spill] sm:$0xff] %v5668_v51  ;;  %v2213_v49 = vmul.f32 %v4025_v37, %v625_v44  ;;  %v5680_v4 = vmul.f32 %v8729_v26, %v625_v44  ;;  %vm8750_vm1 = vmmov %vm8737_vm13  ;;  %vm8751_vm13 = vcmp.lt.s32.totalorder %v3938_v3, 7 }
 0x193   : > { %8745 = vst [vmem:[#allocation248_spill] sm:$0xff] %v5675_v53  ;;  %v5684_v47 = vsel %vm8747_vm15, %v1849_v57, %v1851_v52  ;;  %v1857_v51 = vsel %vm8750_vm1, %v1851_v52, %v8749_v29  ;;  %v5693_v16 = vsel %vm8751_vm13, %v5675_v53, %v4160_v55  ;;  %vm8753_vm14 = vmmov %vm8750_vm1  ;;  %v5700_v34 = vadd.f32 %v2212_v33, %v2135_v28  ;;  %v8756_v29 = vld [vmem:[#allocation39_spill] sm:$0xff] }
 0x194   : > { %8746 = vst [vmem:[#allocation249_spill] sm:$0xff] %v5680_v4  ;;  %8748 = vst [vmem:[#allocation250_spill] sm:$0xff] %v5684_v47  ;;  %v5698_v37 = vsel %vm8753_vm14, %v1851_v52, %v3946_v7  ;;  %v1843_v44 = vadd.f32 %v1779_v46, %v1702_v63  ;;  %v1859_v57 = vsel %vm5581_vm12, %v1857_v51, 0.0  ;;  %v2072_v48 = vmul.f32 %v8735_v38, %v5684_v47 }
 0x195   : > { %8752 = vst [vmem:[#allocation21_spill] sm:$0xff] %v5693_v16  ;;  %8754 = vst [vmem:[#allocation251_spill] sm:$0xff] %v5698_v37  ;;  %v1102_v55 = vsel %vm5581_vm12, %v5567_v31, 0.0  ;;  %v1787_v52 = vadd.f32 %v5319_v13, %v8756_v29  ;;  %v1789_v63 = vadd.f32 %v5382_v61, %v5110_v62  ;;  %v5719_v46 = vadd.f32 %v5389_v11, %v5179_v6  ;;  %v3457_v13 = vld [vmem:[%s8109_s3 + $0x5] ss:$8 sm:$0x3] }
 0x196   : > { %8755 = vst [vmem:[#allocation252_spill] sm:$0xff] %v5700_v34  ;;  %v1435_v33 = vmul.f32 %v3980_v19, %v1102_v55  ;;  %v1863_v28 = vsel %vm4044_vm2, %v4312_v43, 0.0  ;;  %v1867_v31 = vsel %vm4170_vm4, %v8758_v5, 0.0  ;;  %v2136_v29 = vadd.f32 %v2072_v48, %v1843_v44  ;;  %v8760_v55 = vld [vmem:[#allocation31_spill] sm:$0xff]  ;;  %v8762_v37 = vld [vmem:[#allocation6_spill] sm:$0xff]  ;;  %vm8768_vm14 = vmmov %vm8750_vm1 }
 0x197   : > { %v1935_v61 = vsel %vm4048_vm3, %v4774_v41, 0.0  ;;  %v1939_v6 = vsel %vm4715_vm10, %v4617_v2, 0.0  ;;  %v2010_v11 = vmul.f32 %v8735_v38, %v1859_v57  ;;  %v2012_v34 = vmul.f32 %v8735_v38, %v8760_v55  ;;  %v8764_v57 = vld [vmem:[#allocation16_spill] sm:$0xff]  ;;  %vm8773_vm15 = vmmov %vm8750_vm1 }
 0x198   : > { %v1499_v43 = vadd.f32 %v1435_v33, %v4010_v32  ;;  %v2014_v35 = vmul.f32 %v8735_v38, %v1863_v28  ;;  %v2016_v44 = vmul.f32 %v8735_v38, %v4415_v18  ;;  %v5743_v48 = vadd.f32 %v2213_v49, %v2136_v29  ;;  %v3458_v49 = vld [vmem:[%s8109_s3 + $0x6] ss:$8 sm:$0x3]  ;;  %vm8777_vm1 = vmmov %vm8751_vm13 }
 0x199   : > { %v2018_v41 = vmul.f32 %v8735_v38, %v1867_v31  ;;  %v5747_v16 = vrot.slane %v3457_v13, %v8762_v37  ;;  %v5750_v9 = vrot.slane %v3457_v13, %v8763_v1  ;;  %v2076_v4 = vadd.f32 %v2012_v34, %v5393_v0  ;;  %v8765_v34 = vld [vmem:[#allocation27_spill] sm:$0xff]  ;;  %vm8780_vm13 = vmmov %vm8777_vm1 }
 0x19a   : > { %8761 = vst [vmem:[#allocation39_spill] sm:$0xff] %v5743_v48  ;;  %v1640_v33 = vadd.f32 %v8764_v57, %v1499_v43  ;;  %v2078_v55 = vadd.f32 %v2014_v35, %v5458_v23  ;;  %v5755_v28 = vadd.f32 %v2016_v44, %v1787_v52  ;;  %v8766_v23 = vld [vmem:[#allocation36_spill] sm:$0xff]  ;;  %v8767_v57 = vld [vmem:[#allocation35_spill] sm:$0xff] }
 0x19b   : > { %v5760_v29 = vadd.f32 %v2018_v41, %v1789_v63  ;;  %v2292_v31 = vmul.f32 %v5750_v9, %v4840_v50  ;;  %v2294_v13 = vmul.f32 %v5750_v9, %v1935_v61  ;;  %v2296_v43 = vmul.f32 %v5750_v9, %v4767_v22 }
 0x19c   : > { %v1781_v0 = vadd.f32 %v5114_v30, %v1640_v33  ;;  %v2217_v35 = vadd.f32 %v8765_v34, %v2076_v4  ;;  %v2219_v52 = vadd.f32 %v8766_v23, %v2078_v55  ;;  %v5771_v44 = vmul.f32 %v5750_v9, %v1939_v6  ;;  %v3460_v4 = vld [vmem:[%s8109_s3 + $0x10] ss:$8 sm:$0x3] }
 0x19d   : > { %v2432_v63 = vsel %vm8768_vm14, %v3946_v7, %v8767_v57  ;;  %v2510_v50 = vsel %vm4048_vm3, %v4617_v2, 0.0  ;;  %v5781_v61 = vrot.slane %v3458_v49, %v8762_v37  ;;  %v5784_v30 = vrot.slane %v3458_v49, %v8763_v1  ;;  %v8769_v57 = vld [vmem:[#allocation22_spill] sm:$0xff]  ;;  %vm8783_vm14 = vmmov %vm8777_vm1 }
 0x19e   : > { %v2074_v6 = vadd.f32 %v2010_v11, %v1781_v0  ;;  %v2358_v41 = vadd.f32 %v2294_v13, %v2217_v35  ;;  %v5789_v33 = vadd.f32 %v2296_v43, %v2219_v52  ;;  %v2434_v55 = vsel %vm5581_vm12, %v2432_v63, 0.0  ;;  %v8770_v43 = vld [vmem:[#allocation37_spill] sm:$0xff]  ;;  %v8772_v35 = vld [vmem:[#allocation28_spill] sm:$0xff] }
 0x19f   : > { %v2585_v34 = vmul.f32 %v5784_v30, %v2434_v55  ;;  %v2587_v2 = vmul.f32 %v5784_v30, %v4415_v18  ;;  %v2726_v49 = vmul.f32 %v8729_v26, %v4229_v21  ;;  %v2728_v23 = vmul.f32 %v8729_v26, %v4318_v54  ;;  %v8774_v54 = vld [vmem:[#allocation38_spill] sm:$0xff] }
 0x1a0   : > { %v2215_v48 = vadd.f32 %v8769_v57, %v2074_v6  ;;  %v5802_v11 = vrot.slane %v3460_v4, %v8762_v37  ;;  %v5805_v13 = vrot.slane %v3460_v4, %v8763_v1  ;;  %v8771_v0 = vrot.slane %v8770_v43, 7  ;;  %v8779_v4 = vld [vmem:[#allocation32_spill] sm:$0xff] }
 0x1a1   : > { %v2651_v52 = vadd.f32 %v2587_v2, %v2358_v41  ;;  %v1101_v21 = vsel %vm5581_vm12, %v5550_v15, 0.0  ;;  %v8775_v63 = vrot.slane %v8774_v54, 1  ;;  %v8776_v6 = vrot.slane %v8770_v43, 1  ;;  %v8781_v2 = vld [vmem:[#allocation20_spill] sm:$0xff] }
 0x1a2   : > { %v1025_v18 = vsel %vm8773_vm15, %v8772_v35, %v8771_v0  ;;  %v2356_v57 = vadd.f32 %v2292_v31, %v2215_v48  ;;  %v2867_v41 = vmul.f32 %v5805_v13, %v4767_v22  ;;  %v2869_v15 = vmul.f32 %v5805_v13, %v2510_v50 }
 0x1a3   : > { %v5821_v37 = vsel %vm8777_vm1, %v8776_v6, %v8775_v63  ;;  %v8778_v1 = vmov %v8776_v6  ;;  %v8782_v0 = vrot.slane %v8781_v2, 1  ;;  %v2792_v63 = vadd.f32 %v2728_v23, %v2651_v52 }
 0x1a4   : > { %v1282_v55 = vsel %vm8780_vm13, %v8779_v4, %v8778_v1  ;;  %v1368_v1 = vsel %vm4721_vm11, %v5821_v37, 0.0  ;;  %v1434_v48 = vmul.f32 %v3949_v8, %v1101_v21  ;;  %v2649_v31 = vadd.f32 %v2585_v34, %v2356_v57 }
 0x1a5   : > { %v1284_v12 = vsel %vm8783_vm14, %v8782_v0, %v8779_v4  ;;  %v1444_v22 = vmul.f32 %v3949_v8, %v1025_v18  ;;  %v1716_v50 = vmul.f32 %v8731_v56, %v3986_v24  ;;  %v2933_v0 = vadd.f32 %v2869_v15, %v2792_v63  ;;  %v8785_v63 = vld [vmem:[#allocation43_spill] sm:$0xff]  ;;  %v8788_v24 = vld [vmem:[#allocation25_spill] sm:$0xff] }
 0x1a6   : > { %v1364_v6 = vsel %vm4715_vm10, %v1284_v12, 0.0  ;;  %v1498_v23 = vadd.f32 %v1434_v48, %v3958_v10  ;;  %v1724_v52 = vmul.f32 %v8731_v56, %v1282_v55  ;;  %v5851_v4 = vmul.f32 %v8731_v56, %v1368_v1  ;;  %v8786_v1 = vld [vmem:[#allocation23_spill] sm:$0xff] }
 0x1a7   : > { %v5846_v2 = vmul.f32 %v8731_v56, %v1364_v6  ;;  %v2790_v60 = vadd.f32 %v2726_v49, %v2649_v31  ;;  %v5854_v21 = vadd.f32 %v1444_v22, %v3958_v10  ;;  %v1934_v34 = vsel %vm4048_vm3, %v1284_v12, 0.0  ;;  %v8784_v6 = vld [vmem:[#allocation9_spill] sm:$0xff] }
 0x1a8   : > { %v1639_v15 = vadd.f32 %v8784_v6, %v1498_v23  ;;  %v5863_v48 = vadd.f32 %v1724_v52, %v8785_v63  ;;  %v5866_v47 = vmul.f32 %v4035_v40, %v1025_v18  ;;  %v2291_v49 = vmul.f32 %v5747_v16, %v8786_v1 }
 0x1a9   : > { %v2931_v31 = vadd.f32 %v2867_v41, %v2790_v60  ;;  %v2293_v22 = vmul.f32 %v5747_v16, %v1934_v34  ;;  %v5872_v12 = vmul.f32 %v5747_v16, %v1282_v55  ;;  %v2431_v23 = vsel %vm8773_vm15, %v3946_v7, %v8772_v35  ;;  %v8787_v34 = vld [vmem:[#allocation30_spill] sm:$0xff] }
 0x1aa   : > { %v1780_v6 = vadd.f32 %v1716_v50, %v1639_v15  ;;  %v2433_v52 = vsel %vm5581_vm12, %v2431_v23, 0.0  ;;  %v2509_v63 = vsel %vm4048_vm3, %v5821_v37, 0.0  ;;  %v2586_v60 = vmul.f32 %v5781_v61, %v1025_v18  ;;  %vm8791_vm3 = vmmov %vm8773_vm15  ;;  %v8807_v7 = vld [vmem:[#allocation50_spill] sm:$0xff] }
 0x1ab   : > { %v2995_v41 = vpack.c.bf16 %v2933_v0, %v2931_v31  ;;  %v2357_v1 = vadd.f32 %v2293_v22, %v8787_v34  ;;  %v2584_v57 = vmul.f32 %v5781_v61, %v2433_v52  ;;  %v2725_v14 = vmul.f32 %v4039_v42, %v8788_v24  ;;  %vm8794_vm12 = vmmov %vm8777_vm1 }
 0x1ac   : > { %v2073_v35 = vadd.f32 %v5671_v58, %v1780_v6  ;;  %v2727_v20 = vmul.f32 %v4039_v42, %v8770_v43  ;;  %v2866_v50 = vmul.f32 %v5802_v11, %v1282_v55  ;;  %v2868_v62 = vmul.f32 %v5802_v11, %v2509_v63  ;;  %v8795_v55 = vld [vmem:[#allocation19_spill] sm:$0xff]  ;;  %vm8806_vm14 = vmmov %vm8791_vm3 }
 0x1ad   : > { %3193 = vmatprep.mubr.bf16.mxu1 %v2995_v41  ;;  %v2650_v15 = vadd.f32 %v2586_v60, %v2357_v1  ;;  %v711_v18 = vadd.s32 56, %v3938_v3  ;;  %v8789_v0 = vrot.slane %v4395_v25, 7  ;;  %v8790_v31 = vrot.slane %v4324_v39, 7  ;;  %vm8810_vm15 = vmmov %vm8777_vm1 }
 0x1ae   : > { %v8792_v58 = vrot.slane %v4458_v27, 1  ;;  %v8793_v22 = vrot.slane %v4395_v25, 1  ;;  %v2214_v23 = vadd.f32 %v8795_v55, %v2073_v35  ;;  %v8797_v52 = vrot.slane %v4324_v39, 1 }
 0x1af   : > { %v1022_v24 = vsel %vm8791_vm3, %v8790_v31, %v8789_v0  ;;  %v2791_v34 = vadd.f32 %v2727_v20, %v2650_v15  ;;  %v743_v1 = vand.u32 15, %v711_v18  ;;  %v8801_v20 = vld [vmem:[#allocation59_spill] sm:$0xff]  ;;  %vm8813_vm3 = vmmov %vm8777_vm1 }
 0x1b0   : > { %v5906_v43 = vsel %vm8794_vm12, %v8793_v22, %v8792_v58  ;;  %v8796_v6 = vmov %v8793_v22  ;;  %v1449_v60 = vmul.f32 %v3980_v19, %v1022_v24  ;;  %v5921_v31 = vmul.f32 %v8735_v38, %v1022_v24  ;;  %v8798_v22 = vld [vmem:[#allocation44_spill] sm:$0xff]  ;;  %vm8834_vm12 = vmmov %vm8777_vm1 }
 0x1b1   : > { %v1279_v63 = vsel %vm8777_vm1, %v8797_v52, %v8796_v6  ;;  %v2355_v35 = vadd.f32 %v2291_v49, %v2214_v23  ;;  %v2221_v55 = vadd.f32 %v8798_v22, %v5755_v28  ;;  %v2932_v52 = vadd.f32 %v2868_v62, %v2791_v34 }
 0x1b2   : > { %v1729_v0 = vmul.f32 %v4022_v36, %v1279_v63  ;;  %v5924_v58 = vadd.f32 %v1449_v60, %v4010_v32  ;;  %v5929_v6 = vmul.f32 %v5750_v9, %v1279_v63  ;;  %vm5931_vm13 = vcmp.lt.s32.totalorder %v743_v1, 15 }
 0x1b3   : > { %v2438_v49 = vsel %vm4044_vm2, %v8758_v5, 0.0  ;;  %v2648_v18 = vadd.f32 %v2584_v57, %v2355_v35  ;;  %v1373_v28 = vsel %vm5931_vm13, %v5906_v43, 0.0  ;;  %v2362_v23 = vadd.f32 %v5771_v44, %v2221_v55 }
 0x1b4   : > { %v5936_v15 = vadd.f32 %v1729_v0, %v8801_v20  ;;  %v2514_v62 = vsel %vm4715_vm10, %v5906_v43, 0.0  ;;  %v5949_v60 = vmul.f32 %v4022_v36, %v1373_v28  ;;  %v2589_v34 = vmul.f32 %v5784_v30, %v2438_v49  ;;  %v8803_v20 = vld [vmem:[#allocation48_spill] sm:$0xff] }
 0x1b5   : > { %v2591_v1 = vmul.f32 %v5784_v30, %v1022_v24  ;;  %v2730_v5 = vmul.f32 %v8729_v26, %v4324_v39  ;;  %v2789_v57 = vadd.f32 %v2725_v14, %v2648_v18  ;;  %v2732_v0 = vmul.f32 %v8729_v26, %v4395_v25 }
 0x1b6   : > { %8802 = vst [vmem:[#allocation13_spill] sm:$0xff] %v5936_v15  ;;  %v2871_v44 = vmul.f32 %v5805_v13, %v1279_v63  ;;  %v2873_v35 = vmul.f32 %v5805_v13, %v2514_v62  ;;  %v2653_v22 = vadd.f32 %v2589_v34, %v5789_v33  ;;  %v8804_v28 = vrot.slane %v8803_v20, 7 }
 0x1b7   : > { %v2655_v55 = vadd.f32 %v2591_v1, %v2362_v23  ;;  %v8805_v49 = vrot.slane %v8774_v54, 7  ;;  %v8808_v39 = vrot.slane %v8807_v7, 1  ;;  %v8809_v14 = vrot.slane %v8803_v20, 1 }
 0x1b8   : > { %v2930_v63 = vadd.f32 %v2866_v50, %v2789_v57  ;;  %v8812_v33 = vrot.slane %v8774_v54, 1  ;;  %v2794_v1 = vadd.f32 %v2730_v5, %v2653_v22  ;;  %v8815_v5 = vld [vmem:[#allocation55_spill] sm:$0xff]  ;;  %v8817_v22 = vld [vmem:[#allocation33_spill] sm:$0xff]  ;;  %v2731_v51 = vmul.f32 %v4039_v42, %v8803_v20 }
 0x1b9   : > { %v1021_v24 = vsel %vm8806_vm14, %v8805_v49, %v8804_v28  ;;  %v5972_v25 = vsel %vm8810_vm15, %v8809_v14, %v8808_v39  ;;  %v8811_v18 = vmov %v8809_v14  ;;  %v2796_v28 = vadd.f32 %v2732_v0, %v2655_v55  ;;  %v8814_v14 = vld [vmem:[#allocation26_spill] sm:$0xff]  ;;  %vm8849_vm15 = vmmov %vm8813_vm3 }
 0x1ba   : > { %v1278_v23 = vsel %vm8813_vm3, %v8812_v33, %v8811_v18  ;;  %v1372_v62 = vsel %vm5931_vm13, %v5972_v25, 0.0  ;;  %v1448_v34 = vmul.f32 %v3949_v8, %v1021_v24  ;;  %v2994_v50 = vpack.c.bf16 %v2932_v52, %v2930_v63 }
 0x1bb   : > { %v1728_v49 = vmul.f32 %v8731_v56, %v1278_v23  ;;  %v5986_v39 = vmul.f32 %v8731_v56, %v1372_v62  ;;  %v1786_v18 = vadd.f32 %v5846_v2, %v8814_v14  ;;  %v2935_v53 = vadd.f32 %v2871_v44, %v2794_v1  ;;  %v8820_v1 = vld [vmem:[#allocation24_spill] sm:$0xff]  ;;  %v8822_v14 = vld [vmem:[#allocation41_spill] sm:$0xff] }
 0x1bc   : > { %v5989_v57 = vadd.f32 %v1448_v34, %v3958_v10  ;;  %v2937_v15 = vadd.f32 %v2873_v35, %v2796_v28  ;;  %v8818_v55 = vsel %vm4044_vm2, %v8817_v22, 0.0  ;;  %3194 = vmatmul.mubr.bf16.vlgmr.msra.gmra.mxu1 %v2994_v50  ;;  %v6005_v63 = vmul.f32 %v4035_v40, %v1021_v24 }
 0x1bd   : > { %v5997_v0 = vadd.f32 %v1728_v49, %v8815_v5  ;;  %v2013_v52 = vmul.f32 %v4035_v40, %v8818_v55  ;;  %v2079_v2 = vadd.f32 %v5866_v47, %v1786_v18  ;;  %v8819_v44 = vsel %vm4715_vm10, %v5821_v37, 0.0  ;;  %v8821_v49 = vld [vmem:[#allocation46_spill] sm:$0xff] }
 0x1be   : > { %v2297_v35 = vmul.f32 %v5747_v16, %v8819_v44  ;;  %v6014_v62 = vmul.f32 %v5747_v16, %v1278_v23  ;;  %v2997_v34 = vpack.c.bf16 %v2937_v15, %v2935_v53  ;;  %v2437_v50 = vsel %vm4044_vm2, %v8821_v49, 0.0  ;;  %v8823_v53 = vld [vmem:[#allocation34_spill] sm:$0xff]  ;;  %v8824_v44 = vld [vmem:[#allocation61_spill] sm:$0xff]  ;;  %vm8827_vm2 = vmmov %vm8806_vm14 }
 0x1bf   : > { %8816 = vst [vmem:[#allocation49_spill] sm:$0xff] %v5997_v0  ;;  %v2077_v28 = vadd.f32 %v2013_v52, %v8820_v1  ;;  %v2513_v47 = vsel %vm4715_vm10, %v5972_v25, 0.0  ;;  %v2220_v18 = vadd.f32 %v8822_v14, %v2079_v2  ;;  %v2588_v37 = vmul.f32 %v5781_v61, %v2437_v50  ;;  %vm8831_vm10 = vmmov %vm8777_vm1 }
 0x1c0   : > { %v2590_v5 = vmul.f32 %v5781_v61, %v1021_v24  ;;  %v2729_v22 = vmul.f32 %v4039_v42, %v8774_v54  ;;  %3201 = vmatprep.mubr.bf16.mxu1 %v2997_v34  ;;  %v2870_v55 = vmul.f32 %v5802_v11, %v1278_v23  ;;  %v2872_v45 = vmul.f32 %v5802_v11, %v2513_v47  ;;  %v8828_v34 = vld [vmem:[#allocation70_spill] sm:$0xff]  ;;  %vm8845_vm14 = vmmov %vm8827_vm2 }
 0x1c1   : > { %v2218_v15 = vadd.f32 %v8823_v53, %v2077_v28  ;;  %v2361_v52 = vadd.f32 %v2297_v35, %v2220_v18  ;;  %v713_v2 = vadd.s32 72, %v3938_v3  ;;  %v8825_v1 = vrot.slane %v8824_v44, 7 }
 0x1c2   : > { %v8826_v24 = vrot.slane %v4458_v27, 7  ;;  %v8829_v50 = vrot.slane %v8828_v34, 1  ;;  %v8830_v28 = vrot.slane %v8824_v44, 1  ;;  %v8833_v47 = vrot.slane %v4458_v27, 1 }
 0x1c3   : > { %v2359_v23 = vadd.f32 %v5872_v12, %v2218_v15 }
 0x1c4   : > { %v1018_v54 = vsel %vm8827_vm2, %v8826_v24, %v8825_v1  ;;  %v6046_v20 = vsel %vm8831_vm10, %v8830_v28, %v8829_v50  ;;  %v8832_v35 = vmov %v8830_v28  ;;  %v2654_v1 = vadd.f32 %v2590_v5, %v2361_v52  ;;  %v8838_v5 = vld [vmem:[#allocation75_spill] sm:$0xff] }
 0x1c5   : > { %v1275_v14 = vsel %vm8834_vm12, %v8833_v47, %v8832_v35  ;;  %v1453_v18 = vmul.f32 %v3980_v19, %v1018_v54  ;;  %v745_v24 = vand.u32 15, %v713_v2  ;;  %v6061_v28 = vmul.f32 %v8735_v38, %v1018_v54  ;;  %v8835_v47 = vld [vmem:[#allocation47_spill] sm:$0xff] }
 0x1c6   : > { %v1733_v50 = vmul.f32 %v4022_v36, %v1275_v14  ;;  %v2652_v12 = vadd.f32 %v2588_v37, %v2359_v23  ;;  %v2084_v35 = vadd.f32 %v5921_v31, %v5719_v46  ;;  %v2223_v33 = vadd.f32 %v8835_v47, %v5760_v29  ;;  %v8840_v29 = vld [vmem:[#allocation54_spill] sm:$0xff] }
 0x1c7   : > { %v6064_v15 = vadd.f32 %v1453_v18, %v4010_v32  ;;  %v2795_v0 = vadd.f32 %v2731_v51, %v2654_v1  ;;  %vm6070_vm1 = vcmp.lt.s32.totalorder %v745_v24, 15  ;;  %v8839_v37 = vsel %vm4721_vm11, %v5906_v43, 0.0 }
 0x1c8   : > { %v6075_v52 = vadd.f32 %v1733_v50, %v8838_v5  ;;  %v2302_v2 = vmul.f32 %v5750_v9, %v8839_v37  ;;  %v2793_v23 = vadd.f32 %v2729_v22, %v2652_v12  ;;  %v1377_v46 = vsel %vm6070_vm1, %v6046_v20, 0.0  ;;  %v8841_v50 = vld [vmem:[#allocation64_spill] sm:$0xff] }
 0x1c9   : > { %v2225_v31 = vadd.f32 %v8840_v29, %v2084_v35  ;;  %v6087_v51 = vmul.f32 %v5750_v9, %v1275_v14  ;;  %v2936_v18 = vadd.f32 %v2872_v45, %v2795_v0  ;;  %v6090_v1 = vmul.f32 %v4022_v36, %v1377_v46 }
 0x1ca   : > { %v2364_v24 = vadd.f32 %v5929_v6, %v2223_v33  ;;  %v2442_v43 = vsel %vm4170_vm4, %v8841_v50, 0.0  ;;  %v2934_v22 = vadd.f32 %v2870_v55, %v2793_v23  ;;  %v2518_v47 = vsel %vm4721_vm11, %v6046_v20, 0.0 }
 0x1cb   : > { %v2366_v12 = vadd.f32 %v2302_v2, %v2225_v31  ;;  %v2593_v35 = vmul.f32 %v5784_v30, %v2442_v43  ;;  %v2595_v5 = vmul.f32 %v5784_v30, %v1018_v54  ;;  %v2734_v0 = vmul.f32 %v8729_v26, %v4458_v27  ;;  %v8842_v2 = vld [vmem:[#allocation57_spill] sm:$0xff] }
 0x1cc   : > { %v2736_v6 = vmul.f32 %v8729_v26, %v8824_v44  ;;  %v2875_v33 = vmul.f32 %v5805_v13, %v1275_v14  ;;  %v2996_v45 = vpack.c.bf16 %v2936_v18, %v2934_v22  ;;  %v2877_v55 = vmul.f32 %v5805_v13, %v2518_v47  ;;  %v8846_v31 = vld [vmem:[#allocation69_spill] sm:$0xff] }
 0x1cd   : > { %v2657_v37 = vadd.f32 %v2593_v35, %v2364_v24  ;;  %v8843_v23 = vrot.slane %v8842_v2, 7  ;;  %v8844_v46 = vrot.slane %v8807_v7, 7  ;;  %v2659_v54 = vadd.f32 %v2595_v5, %v2366_v12  ;;  %v8852_v35 = vld [vmem:[#allocation40_spill] sm:$0xff] }
 0x1ce   : > { %v8847_v43 = vrot.slane %v8846_v31, 1  ;;  %v8848_v27 = vrot.slane %v8842_v2, 1  ;;  %v8851_v18 = vrot.slane %v8807_v7, 1  ;;  %3202 = vmatmul.mubr.bf16.gmra.mxu1 %v2996_v45  ;;  %v1649_v5 = vadd.f32 %v8852_v35, %v5854_v21 }
 0x1cf   : > { %v1017_v29 = vsel %vm8845_vm14, %v8844_v46, %v8843_v23  ;;  %v2798_v47 = vadd.f32 %v2734_v0, %v2657_v37  ;;  %v2800_v46 = vadd.f32 %v2736_v6, %v2659_v54  ;;  %v1866_v0 = vsel %vm4170_vm4, %v8821_v49, 0.0 }
 0x1d0   : > { %v6119_v44 = vsel %vm8849_vm15, %v8848_v27, %v8847_v43  ;;  %v8850_v14 = vmov %v8848_v27  ;;  %v1452_v22 = vmul.f32 %v3949_v8, %v1017_v29  ;;  %v1790_v37 = vadd.f32 %v5851_v4, %v1649_v5 }
 0x1d1   : > { %v1274_v24 = vsel %vm8813_vm3, %v8851_v18, %v8850_v14  ;;  %v1376_v12 = vsel %vm6070_vm1, %v6119_v44, 0.0  ;;  %v2939_v45 = vadd.f32 %v2875_v33, %v2798_v47  ;;  %v8854_v14 = vld [vmem:[#allocation71_spill] sm:$0xff]  ;;  %v2941_v6 = vadd.f32 %v2877_v55, %v2800_v46 }
 0x1d2   : > { %v1732_v23 = vmul.f32 %v8731_v56, %v1274_v24  ;;  %v6135_v43 = vadd.f32 %v1452_v22, %v3958_v10  ;;  %v6138_v27 = vmul.f32 %v8731_v56, %v1376_v12  ;;  %v2017_v54 = vmul.f32 %v4035_v40, %v1866_v0  ;;  %v8857_v12 = vld [vmem:[#allocation60_spill] sm:$0xff] }
 0x1d3   : > { %v6152_v22 = vmul.f32 %v4035_v40, %v1017_v29  ;;  %v8856_v49 = vsel %vm4721_vm11, %v5972_v25, 0.0  ;;  %v2083_v4 = vadd.f32 %v6005_v63, %v1790_v37  ;;  %v6161_v47 = vmul.f32 %v5747_v16, %v1274_v24  ;;  %v8858_v0 = vld [vmem:[#allocation52_spill] sm:$0xff] }
 0x1d4   : > { %8853 = vst [vmem:[#allocation14_spill] sm:$0xff] %v6138_v27  ;;  %v6145_v18 = vadd.f32 %v1732_v23, %v8854_v14  ;;  %v2301_v33 = vmul.f32 %v5747_v16, %v8856_v49  ;;  %v2441_v55 = vsel %vm4170_vm4, %v8857_v12, 0.0  ;;  %v2517_v35 = vsel %vm4721_vm11, %v6119_v44, 0.0  ;;  %vm8863_vm4 = vmmov %vm8827_vm2 }
 0x1d5   : > { %v2999_v5 = vpack.c.bf16 %v2941_v6, %v2939_v45  ;;  %v2081_v23 = vadd.f32 %v2017_v54, %v5863_v48  ;;  %v2592_v25 = vmul.f32 %v5781_v61, %v2441_v55  ;;  %v2594_v46 = vmul.f32 %v5781_v61, %v1017_v29  ;;  %v8860_v6 = vld [vmem:[#allocation81_spill] sm:$0xff]  ;;  %v8864_v55 = vld [vmem:[#allocation83_spill] sm:$0xff]  ;;  %vm8867_vm11 = vmmov %vm8813_vm3 }
 0x1d6   : > { %8855 = vst [vmem:[#allocation31_spill] sm:$0xff] %v6145_v18  ;;  %v2224_v63 = vadd.f32 %v8858_v0, %v2083_v4  ;;  %v2733_v37 = vmul.f32 %v4039_v42, %v8807_v7  ;;  %v2735_v59 = vmul.f32 %v4039_v42, %v8842_v2  ;;  %v2874_v14 = vmul.f32 %v5802_v11, %v1274_v24  ;;  %vm8870_vm2 = vmmov %vm8813_vm3 }
 0x1d7   : > { %3209 = vmatprep.mubr.bf16.mxu1 %v2999_v5  ;;  %v2222_v49 = vadd.f32 %v8859_v17, %v2081_v23  ;;  %v2876_v45 = vmul.f32 %v5802_v11, %v2517_v35  ;;  %v715_v48 = vadd.s32 88, %v3938_v3  ;;  %v8861_v54 = vrot.slane %v8860_v6, 7  ;;  %vm8885_vm12 = vmmov %vm8863_vm4 }
 0x1d8   : > { %v8862_v29 = vrot.slane %v8828_v34, 7  ;;  %v2365_v7 = vadd.f32 %v2301_v33, %v2224_v63  ;;  %v8865_v0 = vrot.slane %v8864_v55, 1  ;;  %v8866_v2 = vrot.slane %v8860_v6, 1  ;;  %v8871_v63 = vld [vmem:[#allocation53_spill] sm:$0xff]  ;;  %vm8889_vm14 = vmmov %vm8870_vm2 }
 0x1d9   : > { %v8869_v5 = vrot.slane %v8828_v34, 1  ;;  %v747_v33 = vand.u32 15, %v715_v48  ;;  %v1871_v27 = vsel %vm4254_vm5, %v8841_v50, 0.0  ;;  %vm8892_vm15 = vmmov %vm8870_vm2 }
 0x1da   : > { %v1014_v4 = vsel %vm8863_vm4, %v8862_v29, %v8861_v54  ;;  %v6193_v24 = vsel %vm8867_vm11, %v8866_v2, %v8865_v0  ;;  %v8868_v35 = vmov %v8866_v2  ;;  %v2363_v54 = vadd.f32 %v6014_v62, %v2222_v49  ;;  %v8875_v49 = vld [vmem:[#allocation89_spill] sm:$0xff]  ;;  %vm8910_vm3 = vmmov %vm8870_vm2 }
 0x1db   : > { %v1271_v23 = vsel %vm8870_vm2, %v8869_v5, %v8868_v35  ;;  %v1457_v17 = vmul.f32 %v3980_v19, %v1014_v4  ;;  %v1654_v29 = vadd.f32 %v8871_v63, %v5924_v58  ;;  %v2658_v18 = vadd.f32 %v2594_v46, %v2365_v7  ;;  %v8882_v35 = vld [vmem:[#allocation72_spill] sm:$0xff] }
 0x1dc   : > { %v1737_v21 = vmul.f32 %v4022_v36, %v1271_v23  ;;  %v2656_v5 = vadd.f32 %v2592_v25, %v2363_v54  ;;  %vm6215_vm10 = vcmp.lt.s32.totalorder %v747_v33, 15  ;;  %v2022_v50 = vmul.f32 %v8735_v38, %v1871_v27 }
 0x1dd   : > { %v6207_v0 = vadd.f32 %v1457_v17, %v4010_v32  ;;  %v1795_v58 = vadd.f32 %v5949_v60, %v1654_v29  ;;  %v2799_v48 = vadd.f32 %v2735_v59, %v2658_v18  ;;  %v1381_v7 = vsel %vm6215_vm10, %v6193_v24, 0.0  ;;  %v8878_v59 = vld [vmem:[#allocation13_spill] sm:$0xff]  ;;  %v8879_v29 = vld [vmem:[#allocation78_spill] sm:$0xff] }
 0x1de   : > { %v6221_v46 = vadd.f32 %v1737_v21, %v8875_v49  ;;  %v6228_v17 = vmul.f32 %v8735_v38, %v1014_v4  ;;  %v2797_v25 = vadd.f32 %v2733_v37, %v2656_v5  ;;  %v6231_v54 = vmul.f32 %v4022_v36, %v1381_v7  ;;  %v8880_v49 = vld [vmem:[#allocation68_spill] sm:$0xff] }
 0x1df   : > { %v2088_v33 = vadd.f32 %v6061_v28, %v1795_v58  ;;  %v8877_v60 = vsel %vm5931_vm13, %v6046_v20, 0.0  ;;  %v2940_v21 = vadd.f32 %v2876_v45, %v2799_v48  ;;  %v2086_v63 = vadd.f32 %v2022_v50, %v8878_v59  ;;  %v8881_v58 = vld [vmem:[#allocation63_spill] sm:$0xff] }
 0x1e0   : > { %8876 = vst [vmem:[#allocation6_spill] sm:$0xff] %v6221_v46  ;;  %v2306_v18 = vmul.f32 %v5750_v9, %v8877_v60  ;;  %v6241_v27 = vmul.f32 %v5750_v9, %v1271_v23  ;;  %v2446_v37 = vsel %vm4254_vm5, %v8879_v29, 0.0  ;;  %v2938_v5 = vadd.f32 %v2874_v14, %v2797_v25 }
 0x1e1   : > { %v2229_v7 = vadd.f32 %v8880_v49, %v2088_v33  ;;  %v2522_v28 = vsel %vm5931_vm13, %v6193_v24, 0.0  ;;  %v2597_v20 = vmul.f32 %v5784_v30, %v2446_v37  ;;  %v2227_v45 = vadd.f32 %v8881_v58, %v2086_v63  ;;  %v8886_v58 = vld [vmem:[#allocation82_spill] sm:$0xff] }
 0x1e2   : > { %v2599_v48 = vmul.f32 %v5784_v30, %v1014_v4  ;;  %v2738_v50 = vmul.f32 %v8729_v26, %v8828_v34  ;;  %v2740_v60 = vmul.f32 %v8729_v26, %v8860_v6  ;;  %v2998_v59 = vpack.c.bf16 %v2940_v21, %v2938_v5 }
 0x1e3   : > { %v2370_v14 = vadd.f32 %v2306_v18, %v2229_v7  ;;  %v2879_v25 = vmul.f32 %v5805_v13, %v1271_v23  ;;  %v2881_v33 = vmul.f32 %v5805_v13, %v2522_v28  ;;  %v2368_v49 = vadd.f32 %v6087_v51, %v2227_v45  ;;  %v8893_v28 = vld [vmem:[#allocation51_spill] sm:$0xff] }
 0x1e4   : > { %v8883_v37 = vrot.slane %v8882_v35, 7  ;;  %v8884_v63 = vrot.slane %v8846_v31, 7  ;;  %v8887_v34 = vrot.slane %v8886_v58, 1  ;;  %v8888_v46 = vrot.slane %v8882_v35, 1  ;;  %3210 = vmatmul.mubr.bf16.gmra.mxu1 %v2998_v59 }
 0x1e5   : > { %v8891_v18 = vrot.slane %v8846_v31, 1  ;;  %v2663_v21 = vadd.f32 %v2599_v48, %v2370_v14  ;;  %v1653_v45 = vadd.f32 %v8893_v28, %v5989_v57  ;;  %v1870_v59 = vsel %vm4254_vm5, %v8857_v12, 0.0  ;;  %v8896_v28 = vld [vmem:[#allocation49_spill] sm:$0xff] }
 0x1e6   : > { %v1013_v4 = vsel %vm8885_vm12, %v8884_v63, %v8883_v37  ;;  %v6272_v6 = vsel %vm8889_vm14, %v8888_v46, %v8887_v34  ;;  %v8890_v23 = vmov %v8888_v46  ;;  %v2661_v46 = vadd.f32 %v2597_v20, %v2368_v49  ;;  %v8894_v49 = vld [vmem:[#allocation87_spill] sm:$0xff]  ;;  %vm8931_vm12 = vmmov %vm8870_vm2 }
 0x1e7   : > { %v1270_v51 = vsel %vm8892_vm15, %v8891_v18, %v8890_v23  ;;  %v1380_v5 = vsel %vm6215_vm10, %v6272_v6, 0.0  ;;  %v1456_v7 = vmul.f32 %v3949_v8, %v1013_v4  ;;  %v2804_v48 = vadd.f32 %v2740_v60, %v2663_v21 }
 0x1e8   : > { %v1736_v37 = vmul.f32 %v8731_v56, %v1270_v51  ;;  %v6288_v63 = vmul.f32 %v8731_v56, %v1380_v5  ;;  %v1794_v34 = vadd.f32 %v5986_v39, %v1653_v45  ;;  %v2802_v20 = vadd.f32 %v2738_v50, %v2661_v46  ;;  %v8897_v46 = vld [vmem:[#allocation76_spill] sm:$0xff] }
 0x1e9   : > { %v6294_v14 = vadd.f32 %v1456_v7, %v3958_v10  ;;  %v2021_v18 = vmul.f32 %v4035_v40, %v1870_v59  ;;  %v6305_v5 = vmul.f32 %v4035_v40, %v1013_v4  ;;  %v2945_v12 = vadd.f32 %v2881_v33, %v2804_v48  ;;  %v8898_v33 = vld [vmem:[#allocation66_spill] sm:$0xff] }
 0x1ea   : > { %v6301_v23 = vadd.f32 %v1736_v37, %v8894_v49  ;;  %v2087_v60 = vadd.f32 %v6152_v22, %v1794_v34  ;;  %v8895_v39 = vsel %vm5931_vm13, %v6119_v44, 0.0  ;;  %v6314_v7 = vmul.f32 %v5747_v16, %v1270_v51 }
 0x1eb   : > { %v2305_v21 = vmul.f32 %v5747_v16, %v8895_v39  ;;  %v2943_v50 = vadd.f32 %v2879_v25, %v2802_v20  ;;  %v2085_v45 = vadd.f32 %v2021_v18, %v8896_v28  ;;  %v2445_v37 = vsel %vm4254_vm5, %v8897_v46, 0.0  ;;  %v8899_v20 = vld [vmem:[#allocation56_spill] sm:$0xff]  ;;  %v8900_v28 = vld [vmem:[#allocation94_spill] sm:$0xff]  ;;  %vm8903_vm5 = vmmov %vm8863_vm4 }
 0x1ec   : > { %v2521_v22 = vsel %vm5931_vm13, %v6272_v6, 0.0  ;;  %v2228_v59 = vadd.f32 %v8898_v33, %v2087_v60  ;;  %v2596_v44 = vmul.f32 %v5781_v61, %v2445_v37  ;;  %v2598_v48 = vmul.f32 %v5781_v61, %v1013_v4  ;;  %vm8907_vm13 = vmmov %vm8870_vm2 }
 0x1ed   : > { %v2737_v34 = vmul.f32 %v4039_v42, %v8846_v31  ;;  %v3001_v25 = vpack.c.bf16 %v2945_v12, %v2943_v50  ;;  %v2226_v49 = vadd.f32 %v8899_v20, %v2085_v45  ;;  %v2739_v2 = vmul.f32 %v4039_v42, %v8882_v35  ;;  %v8904_v50 = vld [vmem:[#allocation104_spill] sm:$0xff]  ;;  %vm8925_vm11 = vmmov %vm8903_vm5 }
 0x1ee   : > { %v2878_v18 = vmul.f32 %v5802_v11, %v1270_v51  ;;  %v2369_v39 = vadd.f32 %v2305_v21, %v2228_v59  ;;  %v2880_v41 = vmul.f32 %v5802_v11, %v2521_v22  ;;  %v717_v60 = vadd.s32 104, %v3938_v3 }
 0x1ef   : > { %v8901_v37 = vrot.slane %v8900_v28, 7  ;;  %v8902_v4 = vrot.slane %v8864_v55, 7  ;;  %3217 = vmatprep.mubr.bf16.mxu1 %v3001_v25  ;;  %v2367_v12 = vadd.f32 %v6161_v47, %v2226_v49  ;;  %v8905_v45 = vrot.slane %v8904_v50, 1  ;;  %v8911_v47 = vld [vmem:[#allocation67_spill] sm:$0xff] }
 0x1f0   : > { %v8906_v35 = vrot.slane %v8900_v28, 1  ;;  %v8909_v22 = vrot.slane %v8864_v55, 1  ;;  %v2662_v25 = vadd.f32 %v2598_v48, %v2369_v39  ;;  %v749_v20 = vand.u32 15, %v717_v60  ;;  %v8915_v39 = vld [vmem:[#allocation102_spill] sm:$0xff] }
 0x1f1   : > { %v1010_v31 = vsel %vm8903_vm5, %v8902_v4, %v8901_v37  ;;  %v1658_v49 = vadd.f32 %v8911_v47, %v6064_v15  ;;  %v2660_v4 = vadd.f32 %v2596_v44, %v2367_v12  ;;  %v1875_v57 = vsel %vm4355_vm6, %v8879_v29, 0.0 }
 0x1f2   : > { %v6347_v51 = vsel %vm8907_vm13, %v8906_v35, %v8905_v45  ;;  %v8908_v21 = vmov %v8906_v35  ;;  %v1461_v59 = vmul.f32 %v3980_v19, %v1010_v31  ;;  %vm6368_vm4 = vcmp.lt.s32.totalorder %v749_v20, 15 }
 0x1f3   : > { %v1267_v33 = vsel %vm8910_vm3, %v8909_v22, %v8908_v21  ;;  %v2803_v22 = vadd.f32 %v2739_v2, %v2662_v25  ;;  %v1799_v15 = vadd.f32 %v6090_v1, %v1658_v49  ;;  %v2801_v60 = vadd.f32 %v2737_v34, %v2660_v4  ;;  %v8920_v4 = vld [vmem:[#allocation86_spill] sm:$0xff] }
 0x1f4   : > { %v1741_v37 = vmul.f32 %v4022_v36, %v1267_v33  ;;  %v6360_v45 = vadd.f32 %v1461_v59, %v4010_v32  ;;  %v1385_v12 = vsel %vm6368_vm4, %v6347_v51, 0.0  ;;  %v2026_v29 = vmul.f32 %v8735_v38, %v1875_v57 }
 0x1f5   : > { %v6381_v59 = vmul.f32 %v8735_v38, %v1010_v31  ;;  %v2944_v2 = vadd.f32 %v2880_v41, %v2803_v22  ;;  %v6384_v25 = vmul.f32 %v4022_v36, %v1385_v12  ;;  %v2092_v20 = vadd.f32 %v6228_v17, %v1799_v15 }
 0x1f6   : > { %v6374_v44 = vadd.f32 %v1741_v37, %v8915_v39  ;;  %v8918_v1 = vsel %vm6070_vm1, %v6193_v24, 0.0  ;;  %v2942_v47 = vadd.f32 %v2878_v18, %v2801_v60  ;;  %v2090_v49 = vadd.f32 %v2026_v29, %v6075_v52  ;;  %v8919_v37 = vld [vmem:[#allocation91_spill] sm:$0xff]  ;;  %v8921_v39 = vld [vmem:[#allocation77_spill] sm:$0xff] }
 0x1f7   : > { %8917 = vst [vmem:[#allocation16_spill] sm:$0xff] %v6384_v25  ;;  %v2310_v34 = vmul.f32 %v5750_v9, %v8918_v1  ;;  %v6394_v57 = vmul.f32 %v5750_v9, %v1267_v33  ;;  %v2450_v41 = vsel %vm4355_vm6, %v8919_v37, 0.0  ;;  %v2233_v22 = vadd.f32 %v8920_v4, %v2092_v20  ;;  %v8922_v4 = vld [vmem:[#allocation93_spill] sm:$0xff] }
 0x1f8   : > { %8916 = vst [vmem:[#allocation8_spill] sm:$0xff] %v6374_v44  ;;  %v2526_v17 = vsel %vm6070_vm1, %v6347_v51, 0.0  ;;  %v2601_v24 = vmul.f32 %v5784_v30, %v2450_v41  ;;  %v2603_v15 = vmul.f32 %v5784_v30, %v1010_v31  ;;  %v3000_v18 = vpack.c.bf16 %v2944_v2, %v2942_v47  ;;  %v8926_v47 = vld [vmem:[#allocation95_spill] sm:$0xff]  ;;  %v8934_v44 = vld [vmem:[#allocation100_spill] sm:$0xff] }
 0x1f9   : > { %v2231_v52 = vadd.f32 %v8921_v39, %v2090_v49  ;;  %v2742_v60 = vmul.f32 %v8729_v26, %v8864_v55  ;;  %v2744_v12 = vmul.f32 %v8729_v26, %v8900_v28  ;;  %v2374_v29 = vadd.f32 %v2310_v34, %v2233_v22 }
 0x1fa   : > { %v2883_v20 = vmul.f32 %v5805_v13, %v1267_v33  ;;  %v2885_v1 = vmul.f32 %v5805_v13, %v2526_v17  ;;  %v8923_v21 = vrot.slane %v8922_v4, 7  ;;  %v8924_v41 = vrot.slane %v8886_v58, 7  ;;  %3218 = vmatmul.mubr.bf16.gmra.mxu1 %v3000_v18  ;;  %v8932_v18 = vld [vmem:[#allocation65_spill] sm:$0xff] }
 0x1fb   : > { %v2372_v2 = vadd.f32 %v6241_v27, %v2231_v52  ;;  %v8927_v55 = vrot.slane %v8926_v47, 1  ;;  %v8928_v49 = vrot.slane %v8922_v4, 1  ;;  %v8930_v34 = vrot.slane %v8886_v58, 1 }
 0x1fc   : > { %v1009_v31 = vsel %vm8925_vm11, %v8924_v41, %v8923_v21  ;;  %v2667_v17 = vadd.f32 %v2603_v15, %v2374_v29  ;;  %v1657_v39 = vadd.f32 %v8932_v18, %v6135_v43  ;;  %v1874_v15 = vsel %vm4355_vm6, %v8897_v46, 0.0  ;;  %v8937_v18 = vld [vmem:[#allocation90_spill] sm:$0xff] }
 0x1fd   : > { %v6425_v28 = vsel %vm8870_vm2, %v8928_v49, %v8927_v55  ;;  %v8929_v33 = vmov %v8928_v49  ;;  %v1460_v21 = vmul.f32 %v3949_v8, %v1009_v31  ;;  %v2665_v41 = vadd.f32 %v2601_v24, %v2372_v2 }
 0x1fe   : > { %v1266_v22 = vsel %vm8931_vm12, %v8930_v34, %v8929_v33  ;;  %v1384_v27 = vsel %vm6368_vm4, %v6425_v28, 0.0  ;;  %v2808_v29 = vadd.f32 %v2744_v12, %v2667_v17  ;;  %v8933_v33 = vld [vmem:[#allocation14_spill] sm:$0xff]  ;;  %v2025_v2 = vmul.f32 %v4035_v40, %v1874_v15  ;;  %vm9005_vm12 = vmmov %vm8903_vm5 }
 0x1ff   : > { %v1740_v52 = vmul.f32 %v8731_v56, %v1266_v22  ;;  %v6441_v55 = vadd.f32 %v1460_v21, %v3958_v10  ;;  %v6444_v49 = vmul.f32 %v8731_v56, %v1384_v27  ;;  %v1798_v34 = vadd.f32 %v8933_v33, %v1657_v39  ;;  %v8939_v33 = vld [vmem:[#allocation80_spill] sm:$0xff] }
 0x200   : > { %v2806_v24 = vadd.f32 %v2742_v60, %v2665_v41  ;;  %v6458_v21 = vmul.f32 %v4035_v40, %v1009_v31  ;;  %v8936_v46 = vsel %vm6070_vm1, %v6272_v6, 0.0  ;;  %v2949_v17 = vadd.f32 %v2885_v1, %v2808_v29 }
 0x201   : > { %v6451_v25 = vadd.f32 %v1740_v52, %v8934_v44  ;;  %v2309_v12 = vmul.f32 %v5747_v16, %v8936_v46  ;;  %v2091_v44 = vadd.f32 %v6305_v5, %v1798_v34  ;;  %v6467_v27 = vmul.f32 %v5747_v16, %v1266_v22  ;;  %v8938_v52 = vld [vmem:[#allocation31_spill] sm:$0xff] }
 0x202   : > { %v2449_v60 = vsel %vm4355_vm6, %v8937_v18, 0.0  ;;  %v2947_v39 = vadd.f32 %v2883_v20, %v2806_v24  ;;  %v2089_v41 = vadd.f32 %v2025_v2, %v8938_v52  ;;  %v2525_v15 = vsel %vm6070_vm1, %v6425_v28, 0.0  ;;  %v8940_v20 = vld [vmem:[#allocation74_spill] sm:$0xff]  ;;  %v8941_v52 = vld [vmem:[#allocation107_spill] sm:$0xff]  ;;  %vm8944_vm6 = vmmov %vm8903_vm5 }
 0x203   : > { %8935 = vst [vmem:[#allocation27_spill] sm:$0xff] %v6451_v25  ;;  %v2600_v6 = vmul.f32 %v5781_v61, %v2449_v60  ;;  %v2232_v1 = vadd.f32 %v8939_v33, %v2091_v44  ;;  %v2602_v5 = vmul.f32 %v5781_v61, %v1009_v31  ;;  %v2741_v29 = vmul.f32 %v4039_v42, %v8886_v58  ;;  %v8945_v33 = vld [vmem:[#allocation116_spill] sm:$0xff]  ;;  %vm8948_vm1 = vmmov %vm8870_vm2 }
 0x204   : > { %v2743_v35 = vmul.f32 %v4039_v42, %v8922_v4  ;;  %v3003_v34 = vpack.c.bf16 %v2949_v17, %v2947_v39  ;;  %v2230_v24 = vadd.f32 %v8940_v20, %v2089_v41  ;;  %v2882_v2 = vmul.f32 %v5802_v11, %v1266_v22  ;;  %vm8951_vm14 = vmmov %vm8948_vm1 }
 0x205   : > { %v2884_v53 = vmul.f32 %v5802_v11, %v2525_v15  ;;  %v2373_v46 = vadd.f32 %v2309_v12, %v2232_v1  ;;  %v719_v60 = vadd.s32 120, %v3938_v3  ;;  %v8942_v44 = vrot.slane %v8941_v52, 7  ;;  %v8952_v1 = vld [vmem:[#allocation84_spill] sm:$0xff]  ;;  %vm8968_vm13 = vmmov %vm8948_vm1 }
 0x206   : > { %v8943_v31 = vrot.slane %v8904_v50, 7  ;;  %v8946_v43 = vrot.slane %v8945_v33, 1  ;;  %v8947_v4 = vrot.slane %v8941_v52, 1  ;;  %3225 = vmatprep.mubr.bf16.mxu1 %v3003_v34  ;;  %v2371_v22 = vadd.f32 %v6314_v7, %v2230_v24  ;;  %vm8971_vm3 = vmmov %vm8948_vm1 }
 0x207   : > { %v8950_v39 = vrot.slane %v8904_v50, 1  ;;  %v1662_v20 = vadd.f32 %v8952_v1, %v6207_v0  ;;  %v1879_v7 = vsel %vm4465_vm7, %v8919_v37, 0.0  ;;  %v8957_v1 = vld [vmem:[#allocation6_spill] sm:$0xff]  ;;  %vm8989_vm11 = vmmov %vm8948_vm1 }
 0x208   : > { %v1006_v58 = vsel %vm8944_vm6, %v8943_v31, %v8942_v44  ;;  %v6499_v17 = vsel %vm8948_vm1, %v8947_v4, %v8946_v43  ;;  %v8949_v12 = vmov %v8947_v4  ;;  %v2666_v44 = vadd.f32 %v2602_v5, %v2373_v46  ;;  %v8956_v5 = vld [vmem:[#allocation120_spill] sm:$0xff]  ;;  %vm9009_vm6 = vmmov %vm8948_vm1 }
 0x209   : > { %v1263_v41 = vsel %vm8951_vm14, %v8950_v39, %v8949_v12  ;;  %v1465_v15 = vmul.f32 %v3980_v19, %v1006_v58  ;;  %v751_v31 = vand.u32 15, %v719_v60  ;;  %v2664_v24 = vadd.f32 %v2600_v6, %v2371_v22  ;;  %vm9030_vm14 = vmmov %vm8948_vm1 }
 0x20a   : > { %v1745_v43 = vmul.f32 %v4022_v36, %v1263_v41  ;;  %v1803_v25 = vadd.f32 %v6231_v54, %v1662_v20  ;;  %v2807_v39 = vadd.f32 %v2743_v35, %v2666_v44  ;;  %v2030_v37 = vmul.f32 %v8735_v38, %v1879_v7 }
 0x20b   : > { %v6516_v4 = vadd.f32 %v1465_v15, %v4010_v32  ;;  %vm6522_vm15 = vcmp.lt.s32.totalorder %v751_v31, 15  ;;  %v2805_v6 = vadd.f32 %v2741_v29, %v2664_v24  ;;  %v6534_v54 = vmul.f32 %v8735_v38, %v1006_v58 }
 0x20c   : > { %v6527_v46 = vadd.f32 %v1745_v43, %v8956_v5  ;;  %v1389_v60 = vsel %vm6522_vm15, %v6499_v17, 0.0  ;;  %v2096_v22 = vadd.f32 %v6381_v59, %v1803_v25  ;;  %v2948_v35 = vadd.f32 %v2884_v53, %v2807_v39  ;;  %v8959_v43 = vld [vmem:[#allocation99_spill] sm:$0xff]  ;;  %v8960_v5 = vld [vmem:[#allocation110_spill] sm:$0xff]  ;;  %v8961_v25 = vld [vmem:[#allocation92_spill] sm:$0xff] }
 0x20d   : > { %v6538_v15 = vmul.f32 %v4022_v36, %v1389_v60  ;;  %v2094_v20 = vadd.f32 %v2030_v37, %v8957_v1  ;;  %v8958_v44 = vsel %vm6215_vm10, %v6347_v51, 0.0  ;;  %v2946_v31 = vadd.f32 %v2882_v2, %v2805_v6 }
 0x20e   : > { %v2314_v29 = vmul.f32 %v5750_v9, %v8958_v44  ;;  %v2237_v7 = vadd.f32 %v8959_v43, %v2096_v22  ;;  %v6548_v24 = vmul.f32 %v5750_v9, %v1263_v41  ;;  %v2454_v59 = vsel %vm4465_vm7, %v8960_v5, 0.0  ;;  %v8962_v43 = vld [vmem:[#allocation105_spill] sm:$0xff] }
 0x20f   : > { %v2235_v53 = vadd.f32 %v8961_v25, %v2094_v20  ;;  %v2530_v39 = vsel %vm6215_vm10, %v6499_v17, 0.0  ;;  %v2605_v51 = vmul.f32 %v5784_v30, %v2454_v59  ;;  %v2607_v37 = vmul.f32 %v5784_v30, %v1006_v58 }
 0x210   : > { %v3002_v2 = vpack.c.bf16 %v2948_v35, %v2946_v31  ;;  %v2378_v6 = vadd.f32 %v2314_v29, %v2237_v7  ;;  %v2746_v60 = vmul.f32 %v8729_v26, %v8904_v50  ;;  %v2748_v22 = vmul.f32 %v8729_v26, %v8941_v52  ;;  %v8965_v29 = vld [vmem:[#allocation115_spill] sm:$0xff] }
 0x211   : > { %v2376_v1 = vadd.f32 %v6394_v57, %v2235_v53  ;;  %v2887_v20 = vmul.f32 %v5805_v13, %v1263_v41  ;;  %v2889_v44 = vmul.f32 %v5805_v13, %v2530_v39  ;;  %v8963_v25 = vrot.slane %v8962_v43, 7 }
 0x212   : > { %v8964_v59 = vrot.slane %v8926_v47, 7  ;;  %3226 = vmatmul.mubr.bf16.gmra.mxu1 %v3002_v2  ;;  %v2671_v35 = vadd.f32 %v2607_v37, %v2378_v6  ;;  %v8966_v50 = vrot.slane %v8965_v29, 1  ;;  %v8967_v31 = vrot.slane %v8962_v43, 1  ;;  %v8972_v2 = vld [vmem:[#allocation79_spill] sm:$0xff] }
 0x213   : > { %v8970_v41 = vrot.slane %v8926_v47, 1  ;;  %v2669_v39 = vadd.f32 %v2605_v51, %v2376_v1  ;;  %v1661_v6 = vadd.f32 %v8972_v2, %v6294_v14  ;;  %v1878_v51 = vsel %vm4465_vm7, %v8937_v18, 0.0  ;;  %v8976_v2 = vld [vmem:[#allocation103_spill] sm:$0xff] }
 0x214   : > { %v1005_v58 = vsel %vm8903_vm5, %v8964_v59, %v8963_v25  ;;  %v6578_v57 = vsel %vm8968_vm13, %v8967_v31, %v8966_v50  ;;  %v8969_v52 = vmov %v8967_v31  ;;  %v2812_v59 = vadd.f32 %v2748_v22, %v2671_v35 }
 0x215   : > { %v1262_v7 = vsel %vm8971_vm3, %v8970_v41, %v8969_v52  ;;  %v1464_v53 = vmul.f32 %v3949_v8, %v1005_v58  ;;  %v1388_v37 = vsel %vm6522_vm15, %v6578_v57, 0.0  ;;  %v2810_v1 = vadd.f32 %v2746_v60, %v2669_v39  ;;  %v8973_v41 = vld [vmem:[#allocation114_spill] sm:$0xff]  ;;  %vm9047_vm3 = vmmov %vm8948_vm1 }
 0x216   : > { %v1744_v25 = vmul.f32 %v8731_v56, %v1262_v7  ;;  %v6597_v31 = vmul.f32 %v8731_v56, %v1388_v37  ;;  %v1802_v52 = vadd.f32 %v6288_v63, %v1661_v6  ;;  %v2953_v22 = vadd.f32 %v2889_v44, %v2812_v59 }
 0x217   : > { %v6594_v50 = vadd.f32 %v1464_v53, %v3958_v10  ;;  %v2029_v35 = vmul.f32 %v4035_v40, %v1878_v51  ;;  %v6611_v53 = vmul.f32 %v4035_v40, %v1005_v58  ;;  %v8975_v18 = vsel %vm6215_vm10, %v6425_v28, 0.0  ;;  %v8977_v51 = vld [vmem:[#allocation97_spill] sm:$0xff] }
 0x218   : > { %v6604_v12 = vadd.f32 %v1744_v25, %v8973_v41  ;;  %v2313_v60 = vmul.f32 %v5747_v16, %v8975_v18  ;;  %v2951_v63 = vadd.f32 %v2887_v20, %v2810_v1  ;;  %v2095_v39 = vadd.f32 %v6458_v21, %v1802_v52  ;;  %v8978_v52 = vld [vmem:[#allocation88_spill] sm:$0xff] }
 0x219   : > { %v6620_v37 = vmul.f32 %v5747_v16, %v1262_v7  ;;  %v2453_v44 = vsel %vm4465_vm7, %v8976_v2, 0.0  ;;  %v2093_v6 = vadd.f32 %v2029_v35, %v6301_v23  ;;  %v2529_v25 = vsel %vm6215_vm10, %v6578_v57, 0.0  ;;  %vm8982_vm7 = vmmov %vm8903_vm5 }
 0x21a   : > { %8974 = vst [vmem:[#allocation36_spill] sm:$0xff] %v6604_v12  ;;  %v2604_v28 = vmul.f32 %v5781_v61, %v2453_v44  ;;  %v2606_v59 = vmul.f32 %v5781_v61, %v1005_v58  ;;  %v3005_v20 = vpack.c.bf16 %v2953_v22, %v2951_v63  ;;  %v2236_v21 = vadd.f32 %v8977_v51, %v2095_v39  ;;  %v8979_v58 = vld [vmem:[#allocation126_spill] sm:$0xff]  ;;  %v8983_v39 = vld [vmem:[#allocation128_spill] sm:$0xff]  ;;  %vm8986_vm10 = vmmov %vm8948_vm1 }
 0x21b   : > { %v2745_v1 = vmul.f32 %v4039_v42, %v8926_v47  ;;  %v2747_v34 = vmul.f32 %v4039_v42, %v8962_v43  ;;  %v2234_v41 = vadd.f32 %v8978_v52, %v2093_v6  ;;  %v2886_v23 = vmul.f32 %v5802_v11, %v1262_v7  ;;  %v8990_v52 = vld [vmem:[#allocation98_spill] sm:$0xff]  ;;  %vm9043_vm13 = vmmov %vm8982_vm7 }
 0x21c   : > { %v2888_v62 = vmul.f32 %v5802_v11, %v2529_v25  ;;  %v721_v35 = vadd.s32 136, %v3938_v3  ;;  %3233 = vmatprep.mubr.bf16.mxu1 %v3005_v20  ;;  %v2377_v18 = vadd.f32 %v2313_v60, %v2236_v21  ;;  %v8980_v22 = vrot.slane %v8979_v58, 7 }
 0x21d   : > { %v8981_v63 = vrot.slane %v8945_v33, 7  ;;  %v8984_v44 = vrot.slane %v8983_v39, 1  ;;  %v8985_v43 = vrot.slane %v8979_v58, 1  ;;  %v8988_v25 = vrot.slane %v8945_v33, 1 }
 0x21e   : > { %v2375_v20 = vadd.f32 %v6467_v27, %v2234_v41  ;;  %v753_v51 = vand.u32 15, %v721_v35 }
 0x21f   : > { %v1002_v47 = vsel %vm8982_vm7, %v8981_v63, %v8980_v22  ;;  %v6652_v7 = vsel %vm8986_vm10, %v8985_v43, %v8984_v44  ;;  %v8987_v6 = vmov %v8985_v43  ;;  %v1666_v22 = vadd.f32 %v8990_v52, %v6360_v45  ;;  %v8994_v45 = vld [vmem:[#allocation16_spill] sm:$0xff]  ;;  %vm9050_vm7 = vmmov %vm8948_vm1 }
 0x220   : > { %v1259_v60 = vsel %vm8989_vm11, %v8988_v25, %v8987_v6  ;;  %v1469_v21 = vmul.f32 %v3980_v19, %v1002_v47  ;;  %v2670_v63 = vadd.f32 %v2606_v59, %v2377_v18  ;;  %v1883_v43 = vsel %vm4543_vm8, %v8960_v5, 0.0  ;;  %v8995_v5 = vld [vmem:[#allocation134_spill] sm:$0xff]  ;;  %vm9069_vm10 = vmmov %vm8948_vm1 }
 0x221   : > { %v1749_v14 = vmul.f32 %v4022_v36, %v1259_v60  ;;  %v2668_v6 = vadd.f32 %v2604_v28, %v2375_v20  ;;  %vm6671_vm2 = vcmp.lt.s32.totalorder %v753_v51, 15  ;;  %v1807_v59 = vadd.f32 %v8994_v45, %v1666_v22 }
 0x222   : > { %v6676_v41 = vadd.f32 %v1469_v21, %v4010_v32  ;;  %v2811_v35 = vadd.f32 %v2747_v34, %v2670_v63  ;;  %v1393_v18 = vsel %vm6671_vm2, %v6652_v7, 0.0  ;;  %v2034_v52 = vmul.f32 %v8735_v38, %v1883_v43  ;;  %v8997_v34 = vld [vmem:[#allocation8_spill] sm:$0xff] }
 0x223   : > { %v6683_v25 = vadd.f32 %v1749_v14, %v8995_v5  ;;  %v2809_v28 = vadd.f32 %v2745_v1, %v2668_v6  ;;  %v6687_v20 = vmul.f32 %v4022_v36, %v1393_v18  ;;  %v6690_v51 = vmul.f32 %v8735_v38, %v1002_v47  ;;  %v8999_v6 = vld [vmem:[#allocation113_spill] sm:$0xff]  ;;  %v9000_v5 = vld [vmem:[#allocation123_spill] sm:$0xff] }
 0x224   : > { %v2100_v21 = vadd.f32 %v6534_v54, %v1807_v59  ;;  %v2952_v22 = vadd.f32 %v2888_v62, %v2811_v35  ;;  %v2098_v63 = vadd.f32 %v2034_v52, %v8997_v34  ;;  %v8998_v45 = vsel %vm6368_vm4, %v6499_v17, 0.0  ;;  %v9001_v62 = vld [vmem:[#allocation108_spill] sm:$0xff] }
 0x225   : > { %8996 = vst [vmem:[#allocation35_spill] sm:$0xff] %v6683_v25  ;;  %v2318_v14 = vmul.f32 %v5750_v9, %v8998_v45  ;;  %v6700_v43 = vmul.f32 %v5750_v9, %v1259_v60  ;;  %v2950_v1 = vadd.f32 %v2886_v23, %v2809_v28  ;;  %v2458_v12 = vsel %vm4543_vm8, %v9000_v5, 0.0  ;;  %v9002_v25 = vld [vmem:[#allocation117_spill] sm:$0xff] }
 0x226   : > { %v2241_v18 = vadd.f32 %v8999_v6, %v2100_v21  ;;  %v2534_v54 = vsel %vm6368_vm4, %v6652_v7, 0.0  ;;  %v2239_v59 = vadd.f32 %v9001_v62, %v2098_v63  ;;  %v2609_v17 = vmul.f32 %v5784_v30, %v2458_v12  ;;  %v9006_v62 = vld [vmem:[#allocation127_spill] sm:$0xff] }
 0x227   : > { %v2611_v35 = vmul.f32 %v5784_v30, %v1002_v47  ;;  %v2750_v52 = vmul.f32 %v8729_v26, %v8945_v33  ;;  %v3004_v23 = vpack.c.bf16 %v2952_v22, %v2950_v1  ;;  %v2752_v21 = vmul.f32 %v8729_v26, %v8979_v58 }
 0x228   : > { %v2382_v28 = vadd.f32 %v2318_v14, %v2241_v18  ;;  %v2891_v34 = vmul.f32 %v5805_v13, %v1259_v60  ;;  %v2380_v45 = vadd.f32 %v6548_v24, %v2239_v59  ;;  %v2893_v6 = vmul.f32 %v5805_v13, %v2534_v54 }
 0x229   : > { %v9003_v63 = vrot.slane %v9002_v25, 7  ;;  %v9004_v12 = vrot.slane %v8965_v29, 7  ;;  %v9007_v33 = vrot.slane %v9006_v62, 1  ;;  %v9008_v22 = vrot.slane %v9002_v25, 1  ;;  %3234 = vmatmul.mubr.bf16.gmra.mxu1 %v3004_v23 }
 0x22a   : > { %v2675_v60 = vadd.f32 %v2611_v35, %v2382_v28  ;;  %v9011_v14 = vrot.slane %v8965_v29, 1  ;;  %v2673_v59 = vadd.f32 %v2609_v17, %v2380_v45  ;;  %v2751_v44 = vmul.f32 %v4039_v42, %v9002_v25 }
 0x22b   : > { %v1001_v47 = vsel %vm9005_vm12, %v9004_v12, %v9003_v63  ;;  %v6731_v58 = vsel %vm9009_vm6, %v9008_v22, %v9007_v33  ;;  %v9010_v24 = vmov %v9008_v22  ;;  %v9012_v63 = vld [vmem:[#allocation96_spill] sm:$0xff]  ;;  %v1882_v22 = vsel %vm4543_vm8, %v8976_v2, 0.0 }
 0x22c   : > { %v1258_v1 = vsel %vm8948_vm1, %v9011_v14, %v9010_v24  ;;  %v1392_v18 = vsel %vm6671_vm2, %v6731_v58, 0.0  ;;  %v1468_v54 = vmul.f32 %v3949_v8, %v1001_v47  ;;  %v1665_v12 = vadd.f32 %v9012_v63, %v6441_v55  ;;  %v9013_v24 = vld [vmem:[#allocation132_spill] sm:$0xff] }
 0x22d   : > { %v1748_v23 = vmul.f32 %v8731_v56, %v1258_v1  ;;  %v6747_v35 = vmul.f32 %v8731_v56, %v1392_v18  ;;  %v2816_v28 = vadd.f32 %v2752_v21, %v2675_v60  ;;  %v2814_v45 = vadd.f32 %v2750_v52, %v2673_v59 }
 0x22e   : > { %v6750_v33 = vadd.f32 %v1468_v54, %v3958_v10  ;;  %v1806_v55 = vadd.f32 %v6444_v49, %v1665_v12  ;;  %v2033_v18 = vmul.f32 %v4035_v40, %v1882_v22  ;;  %v6764_v60 = vmul.f32 %v4035_v40, %v1001_v47  ;;  %v9016_v49 = vld [vmem:[#allocation27_spill] sm:$0xff] }
 0x22f   : > { %v6760_v14 = vadd.f32 %v1748_v23, %v9013_v24  ;;  %v2957_v21 = vadd.f32 %v2893_v6, %v2816_v28  ;;  %v9015_v2 = vsel %vm6368_vm4, %v6578_v57, 0.0  ;;  %v6772_v63 = vmul.f32 %v5747_v16, %v1258_v1  ;;  %v9017_v23 = vld [vmem:[#allocation121_spill] sm:$0xff] }
 0x230   : > { %v2317_v54 = vmul.f32 %v5747_v16, %v9015_v2  ;;  %v2955_v52 = vadd.f32 %v2891_v34, %v2814_v45  ;;  %v2097_v59 = vadd.f32 %v2033_v18, %v9016_v49  ;;  %v2099_v12 = vadd.f32 %v6611_v53, %v1806_v55  ;;  %v9018_v45 = vld [vmem:[#allocation101_spill] sm:$0xff]  ;;  %v9019_v2 = vld [vmem:[#allocation111_spill] sm:$0xff] }
 0x231   : > { %9014 = vst [vmem:[#allocation22_spill] sm:$0xff] %v6760_v14  ;;  %v2457_v6 = vsel %vm4543_vm8, %v9017_v23, 0.0  ;;  %v2533_v28 = vsel %vm6368_vm4, %v6731_v58, 0.0  ;;  %v2610_v22 = vmul.f32 %v5781_v61, %v1001_v47  ;;  %v2749_v24 = vmul.f32 %v4039_v42, %v8965_v29  ;;  %vm9023_vm8 = vmmov %vm8903_vm5 }
 0x232   : > { %v2608_v57 = vmul.f32 %v5781_v61, %v2457_v6  ;;  %v3007_v34 = vpack.c.bf16 %v2957_v21, %v2955_v52  ;;  %v2238_v18 = vadd.f32 %v9018_v45, %v2097_v59  ;;  %v2240_v53 = vadd.f32 %v9019_v2, %v2099_v12  ;;  %v9020_v6 = vld [vmem:[#allocation139_spill] sm:$0xff]  ;;  %v9024_v59 = vld [vmem:[#allocation149_spill] sm:$0xff]  ;;  %vm9027_vm4 = vmmov %vm8948_vm1 }
 0x233   : > { %v2890_v55 = vmul.f32 %v5802_v11, %v1258_v1  ;;  %v2892_v48 = vmul.f32 %v5802_v11, %v2533_v28  ;;  %v723_v49 = vadd.s32 152, %v3938_v3  ;;  %v9021_v17 = vrot.slane %v9020_v6, 7  ;;  %vm9086_vm6 = vmmov %vm9023_vm8 }
 0x234   : > { %v9022_v47 = vrot.slane %v8983_v39, 7  ;;  %3241 = vmatprep.mubr.bf16.mxu1 %v3007_v34  ;;  %v2379_v21 = vadd.f32 %v6620_v37, %v2238_v18  ;;  %v2381_v52 = vadd.f32 %v2317_v54, %v2240_v53  ;;  %v9025_v12 = vrot.slane %v9024_v59, 1  ;;  %v9031_v37 = vld [vmem:[#allocation112_spill] sm:$0xff] }
 0x235   : > { %v9026_v25 = vrot.slane %v9020_v6, 1  ;;  %v9029_v45 = vrot.slane %v8983_v39, 1  ;;  %v1670_v54 = vadd.f32 %v9031_v37, %v6516_v4 }
 0x236   : > { %v998_v29 = vsel %vm9023_vm8, %v9022_v47, %v9021_v17  ;;  %v755_v17 = vand.u32 15, %v723_v49  ;;  %v2672_v53 = vadd.f32 %v2608_v57, %v2379_v21  ;;  %v2674_v47 = vadd.f32 %v2610_v22, %v2381_v52 }
 0x237   : > { %v6806_v1 = vsel %vm9027_vm4, %v9026_v25, %v9025_v12  ;;  %v9028_v28 = vmov %v9026_v25  ;;  %v1473_v34 = vmul.f32 %v3980_v19, %v998_v29  ;;  %v1887_v25 = vsel %vm4628_vm9, %v9000_v5, 0.0  ;;  %vm9108_vm4 = vmmov %vm8948_vm1 }
 0x238   : > { %v1255_v2 = vsel %vm9030_vm14, %v9029_v45, %v9028_v28  ;;  %vm6824_vm5 = vcmp.lt.s32.totalorder %v755_v17, 15  ;;  %v1811_v4 = vadd.f32 %v6538_v15, %v1670_v54  ;;  %v9035_v45 = vld [vmem:[#allocation147_spill] sm:$0xff]  ;;  %v2813_v22 = vadd.f32 %v2749_v24, %v2672_v53  ;;  %vm9111_vm14 = vmmov %vm8948_vm1 }
 0x239   : > { %v1753_v18 = vmul.f32 %v4022_v36, %v1255_v2  ;;  %v6829_v49 = vadd.f32 %v1473_v34, %v4010_v32  ;;  %v2815_v21 = vadd.f32 %v2751_v44, %v2674_v47  ;;  %v1397_v5 = vsel %vm6824_vm5, %v6806_v1, 0.0  ;;  %v9037_v47 = vld [vmem:[#allocation131_spill] sm:$0xff] }
 0x23a   : > { %v2038_v52 = vmul.f32 %v8735_v38, %v1887_v25  ;;  %v6840_v17 = vmul.f32 %v4022_v36, %v1397_v5  ;;  %v6843_v37 = vmul.f32 %v8735_v38, %v998_v29  ;;  %v2104_v34 = vadd.f32 %v6690_v51, %v1811_v4 }
 0x23b   : > { %v6833_v57 = vadd.f32 %v1753_v18, %v9035_v45  ;;  %v9036_v15 = vsel %vm6522_vm15, %v6652_v7, 0.0  ;;  %v2954_v44 = vadd.f32 %v2890_v55, %v2813_v22  ;;  %v2956_v54 = vadd.f32 %v2892_v48, %v2815_v21  ;;  %v9038_v45 = vld [vmem:[#allocation136_spill] sm:$0xff]  ;;  %v9039_v55 = vld [vmem:[#allocation122_spill] sm:$0xff] }
 0x23c   : > { %v2322_v24 = vmul.f32 %v5750_v9, %v9036_v15  ;;  %v2102_v18 = vadd.f32 %v2038_v52, %v6527_v46  ;;  %v6853_v53 = vmul.f32 %v5750_v9, %v1255_v2  ;;  %v2245_v25 = vadd.f32 %v9037_v47, %v2104_v34 }
 0x23d   : > { %v2462_v5 = vsel %vm4628_vm9, %v9038_v45, 0.0  ;;  %v2538_v51 = vsel %vm6522_vm15, %v6806_v1, 0.0  ;;  %v2615_v7 = vmul.f32 %v5784_v30, %v998_v29  ;;  %v3006_v4 = vpack.c.bf16 %v2956_v54, %v2954_v44  ;;  %v9040_v29 = vld [vmem:[#allocation138_spill] sm:$0xff] }
 0x23e   : > { %v2243_v48 = vadd.f32 %v9039_v55, %v2102_v18  ;;  %v2613_v46 = vmul.f32 %v5784_v30, %v2462_v5  ;;  %v2754_v22 = vmul.f32 %v8729_v26, %v8983_v39  ;;  %v2386_v21 = vadd.f32 %v2322_v24, %v2245_v25  ;;  %v9044_v5 = vld [vmem:[#allocation140_spill] sm:$0xff] }
 0x23f   : > { %v2756_v52 = vmul.f32 %v8729_v26, %v9020_v6  ;;  %v2895_v34 = vmul.f32 %v5805_v13, %v1255_v2  ;;  %v2897_v15 = vmul.f32 %v5805_v13, %v2538_v51  ;;  %3242 = vmatmul.mubr.bf16.gmra.mxu1 %v3006_v4  ;;  %v9041_v44 = vrot.slane %v9040_v29, 7 }
 0x240   : > { %v2384_v47 = vadd.f32 %v6700_v43, %v2243_v48  ;;  %v9042_v54 = vrot.slane %v9006_v62, 7  ;;  %v9045_v39 = vrot.slane %v9044_v5, 1  ;;  %v9046_v24 = vrot.slane %v9040_v29, 1  ;;  %v9051_v48 = vld [vmem:[#allocation109_spill] sm:$0xff] }
 0x241   : > { %v9049_v25 = vrot.slane %v9006_v62, 1  ;;  %v2679_v51 = vadd.f32 %v2615_v7, %v2386_v21  ;;  %v2755_v12 = vmul.f32 %v4039_v42, %v9040_v29 }
 0x242   : > { %v997_v18 = vsel %vm9043_vm13, %v9042_v54, %v9041_v44  ;;  %v6884_v6 = vsel %vm9047_vm3, %v9046_v24, %v9045_v39  ;;  %v9048_v2 = vmov %v9046_v24  ;;  %v1669_v44 = vadd.f32 %v9051_v48, %v6594_v50 }
 0x243   : > { %v1254_v43 = vsel %vm9050_vm7, %v9049_v25, %v9048_v2  ;;  %v1396_v4 = vsel %vm6824_vm5, %v6884_v6, 0.0  ;;  %v1472_v55 = vmul.f32 %v3949_v8, %v997_v18  ;;  %v2677_v54 = vadd.f32 %v2613_v46, %v2384_v47  ;;  %v9052_v47 = vld [vmem:[#allocation145_spill] sm:$0xff] }
 0x244   : > { %v1752_v39 = vmul.f32 %v8731_v56, %v1254_v43  ;;  %v6900_v24 = vmul.f32 %v8731_v56, %v1396_v4  ;;  %v1886_v2 = vsel %vm4628_vm9, %v9017_v23, 0.0  ;;  %v2820_v7 = vadd.f32 %v2756_v52, %v2679_v51 }
 0x245   : > { %v6906_v21 = vadd.f32 %v1472_v55, %v3958_v10  ;;  %v1810_v25 = vadd.f32 %v6597_v31, %v1669_v44  ;;  %v2818_v46 = vadd.f32 %v2754_v22, %v2677_v54  ;;  %v2037_v4 = vmul.f32 %v4035_v40, %v1886_v2  ;;  %v9055_v44 = vld [vmem:[#allocation36_spill] sm:$0xff] }
 0x246   : > { %v6913_v48 = vadd.f32 %v1752_v39, %v9052_v47  ;;  %v6917_v14 = vmul.f32 %v4035_v40, %v997_v18  ;;  %v2961_v23 = vadd.f32 %v2897_v15, %v2820_v7  ;;  %v9054_v31 = vsel %vm6522_vm15, %v6731_v58, 0.0  ;;  %v9056_v39 = vld [vmem:[#allocation135_spill] sm:$0xff]  ;;  %v9057_v15 = vld [vmem:[#allocation125_spill] sm:$0xff] }
 0x247   : > { %v2103_v52 = vadd.f32 %v6764_v60, %v1810_v25  ;;  %v2321_v51 = vmul.f32 %v5747_v16, %v9054_v31  ;;  %v6926_v55 = vmul.f32 %v5747_v16, %v1254_v43  ;;  %v2959_v22 = vadd.f32 %v2895_v34, %v2818_v46  ;;  %v9058_v46 = vld [vmem:[#allocation119_spill] sm:$0xff] }
 0x248   : > { %9053 = vst [vmem:[#allocation37_spill] sm:$0xff] %v6913_v48  ;;  %v2101_v54 = vadd.f32 %v2037_v4, %v9055_v44  ;;  %v2461_v2 = vsel %vm4628_vm9, %v9056_v39, 0.0  ;;  %v2537_v60 = vsel %vm6522_vm15, %v6884_v6, 0.0  ;;  %v2614_v25 = vmul.f32 %v5781_v61, %v997_v18  ;;  %vm9062_vm9 = vmmov %vm9023_vm8 }
 0x249   : > { %v2244_v7 = vadd.f32 %v9057_v15, %v2103_v52  ;;  %v2612_v58 = vmul.f32 %v5781_v61, %v2461_v2  ;;  %v2753_v47 = vmul.f32 %v4039_v42, %v9006_v62  ;;  %v3009_v34 = vpack.c.bf16 %v2961_v23, %v2959_v22  ;;  %v9059_v15 = vld [vmem:[#allocation152_spill] sm:$0xff]  ;;  %v9063_v22 = vld [vmem:[#allocation161_spill] sm:$0xff]  ;;  %vm9066_vm15 = vmmov %vm8948_vm1 }
 0x24a   : > { %v2242_v4 = vadd.f32 %v9058_v46, %v2101_v54  ;;  %v2894_v31 = vmul.f32 %v5802_v11, %v1254_v43  ;;  %v2896_v0 = vmul.f32 %v5802_v11, %v2537_v60  ;;  %v725_v52 = vadd.s32 168, %v3938_v3  ;;  %vm9092_vm8 = vmmov %vm8948_vm1 }
 0x24b   : > { %v2385_v44 = vadd.f32 %v2321_v51, %v2244_v7  ;;  %v9060_v2 = vrot.slane %v9059_v15, 7  ;;  %v9061_v18 = vrot.slane %v9024_v59, 7  ;;  %3249 = vmatprep.mubr.bf16.mxu1 %v3009_v34  ;;  %v9064_v54 = vrot.slane %v9063_v22, 1 }
 0x24c   : > { %v2383_v23 = vadd.f32 %v6772_v63, %v2242_v4  ;;  %v9065_v29 = vrot.slane %v9059_v15, 1  ;;  %v9068_v60 = vrot.slane %v9024_v59, 1  ;;  %v9070_v63 = vld [vmem:[#allocation129_spill] sm:$0xff] }
 0x24d   : > { %v994_v62 = vsel %vm9062_vm9, %v9061_v18, %v9060_v2  ;;  %v2678_v34 = vadd.f32 %v2614_v25, %v2385_v44  ;;  %v757_v2 = vand.u32 15, %v725_v52  ;;  %v1674_v4 = vadd.f32 %v9070_v63, %v6676_v41  ;;  %v9075_v44 = vld [vmem:[#allocation165_spill] sm:$0xff]  ;;  %v9079_v63 = vld [vmem:[#allocation35_spill] sm:$0xff]  ;;  %vm9129_vm9 = vmmov %vm8948_vm1 }
 0x24e   : > { %v6959_v43 = vsel %vm9066_vm15, %v9065_v29, %v9064_v54  ;;  %v9067_v51 = vmov %v9065_v29  ;;  %v1477_v46 = vmul.f32 %v3980_v19, %v994_v62  ;;  %v2676_v50 = vadd.f32 %v2612_v58, %v2383_v23  ;;  %v9071_v29 = vld [vmem:[#allocation106_spill] sm:$0xff]  ;;  %vm9132_vm15 = vmmov %vm8948_vm1 }
 0x24f   : > { %v1251_v7 = vsel %vm9069_vm10, %v9068_v60, %v9067_v51  ;;  %vm9072_vm11 = vnez %v9071_v29  ;;  %v2819_v60 = vadd.f32 %v2755_v12, %v2678_v34  ;;  %vm6980_vm12 = vcmp.lt.s32.totalorder %v757_v2, 15  ;;  %v9083_v51 = vld [vmem:[#allocation150_spill] sm:$0xff]  ;;  %vm9148_vm10 = vmmov %vm8948_vm1 }
 0x250   : > { %v1757_v18 = vmul.f32 %v4022_v36, %v1251_v7  ;;  %v6972_v54 = vadd.f32 %v1477_v46, %v4010_v32  ;;  %v1891_v48 = vsel %vm9072_vm11, %v9038_v45, 0.0  ;;  %v1815_v41 = vadd.f32 %v6687_v20, %v1674_v4 }
 0x251   : > { %v2817_v52 = vadd.f32 %v2753_v47, %v2676_v50  ;;  %v1401_v23 = vsel %vm6980_vm12, %v6959_v43, 0.0  ;;  %v2042_v45 = vmul.f32 %v8735_v38, %v1891_v48  ;;  %v6993_v46 = vmul.f32 %v8735_v38, %v994_v62 }
 0x252   : > { %v6986_v58 = vadd.f32 %v1757_v18, %v9075_v44  ;;  %v2960_v12 = vadd.f32 %v2896_v0, %v2819_v60  ;;  %v6996_v34 = vmul.f32 %v4022_v36, %v1401_v23  ;;  %v2108_v2 = vadd.f32 %v6843_v37, %v1815_v41  ;;  %v9080_v18 = vld [vmem:[#allocation155_spill] sm:$0xff]  ;;  %v9081_v60 = vld [vmem:[#allocation144_spill] sm:$0xff] }
 0x253   : > { %v9078_v20 = vsel %vm6671_vm2, %v6806_v1, 0.0  ;;  %v2958_v47 = vadd.f32 %v2894_v31, %v2817_v52  ;;  %v2106_v4 = vadd.f32 %v2042_v45, %v9079_v63  ;;  %v7006_v48 = vmul.f32 %v5750_v9, %v1251_v7  ;;  %v9082_v52 = vld [vmem:[#allocation137_spill] sm:$0xff] }
 0x254   : > { %9076 = vst [vmem:[#allocation28_spill] sm:$0xff] %v6986_v58  ;;  %9077 = vst [vmem:[#allocation38_spill] sm:$0xff] %v6996_v34  ;;  %v2326_v50 = vmul.f32 %v5750_v9, %v9078_v20  ;;  %v2466_v0 = vsel %vm9072_vm11, %v9080_v18, 0.0  ;;  %v2249_v44 = vadd.f32 %v9081_v60, %v2108_v2  ;;  %v2542_v37 = vsel %vm6671_vm2, %v6959_v43, 0.0 }
 0x255   : > { %v2617_v1 = vmul.f32 %v5784_v30, %v2466_v0  ;;  %v2619_v41 = vmul.f32 %v5784_v30, %v994_v62  ;;  %v3008_v31 = vpack.c.bf16 %v2960_v12, %v2958_v47  ;;  %v2247_v23 = vadd.f32 %v9082_v52, %v2106_v4  ;;  %v9087_v47 = vld [vmem:[#allocation160_spill] sm:$0xff] }
 0x256   : > { %v2758_v45 = vmul.f32 %v8729_v26, %v9024_v59  ;;  %v2760_v20 = vmul.f32 %v8729_v26, %v9059_v15  ;;  %v2390_v63 = vadd.f32 %v2326_v50, %v2249_v44  ;;  %v2899_v2 = vmul.f32 %v5805_v13, %v1251_v7 }
 0x257   : > { %v2901_v60 = vmul.f32 %v5805_v13, %v2542_v37  ;;  %v9084_v58 = vrot.slane %v9083_v51, 7  ;;  %v9085_v0 = vrot.slane %v9044_v5, 7  ;;  %3250 = vmatmul.mubr.bf16.gmra.mxu1 %v3008_v31  ;;  %v2388_v12 = vadd.f32 %v6853_v53, %v2247_v23  ;;  %v9093_v31 = vld [vmem:[#allocation124_spill] sm:$0xff] }
 0x258   : > { %v9088_v59 = vrot.slane %v9087_v47, 1  ;;  %v9089_v4 = vrot.slane %v9083_v51, 1  ;;  %v9091_v50 = vrot.slane %v9044_v5, 1  ;;  %v2683_v37 = vadd.f32 %v2619_v41, %v2390_v63 }
 0x259   : > { %v993_v62 = vsel %vm9086_vm6, %v9085_v0, %v9084_v58  ;;  %v1673_v52 = vadd.f32 %v9093_v31, %v6750_v33  ;;  %v2681_v0 = vadd.f32 %v2617_v1, %v2388_v12  ;;  %v1890_v41 = vsel %vm9072_vm11, %v9056_v39, 0.0  ;;  %v9097_v31 = vld [vmem:[#allocation148_spill] sm:$0xff] }
 0x25a   : > { %v7037_v15 = vsel %vm8948_vm1, %v9089_v4, %v9088_v59  ;;  %v9090_v7 = vmov %v9089_v4  ;;  %v1476_v58 = vmul.f32 %v3949_v8, %v993_v62  ;;  %v2824_v63 = vadd.f32 %v2760_v20, %v2683_v37 }
 0x25b   : > { %v1250_v44 = vsel %vm9092_vm8, %v9091_v50, %v9090_v7  ;;  %v1400_v53 = vsel %vm6980_vm12, %v7037_v15, 0.0  ;;  %v1814_v7 = vadd.f32 %v6747_v35, %v1673_v52  ;;  %v9094_v50 = vld [vmem:[#allocation159_spill] sm:$0xff]  ;;  %v2822_v1 = vadd.f32 %v2758_v45, %v2681_v0 }
 0x25c   : > { %v1756_v23 = vmul.f32 %v8731_v56, %v1250_v44  ;;  %v7053_v59 = vadd.f32 %v1476_v58, %v3958_v10  ;;  %v7056_v4 = vmul.f32 %v8731_v56, %v1400_v53  ;;  %v2041_v12 = vmul.f32 %v4035_v40, %v1890_v41 }
 0x25d   : > { %v7070_v58 = vmul.f32 %v4035_v40, %v993_v62  ;;  %v9096_v39 = vsel %vm6671_vm2, %v6884_v6, 0.0  ;;  %v2965_v35 = vadd.f32 %v2901_v60, %v2824_v63  ;;  %v2107_v37 = vadd.f32 %v6917_v14, %v1814_v7 }
 0x25e   : > { %v7063_v34 = vadd.f32 %v1756_v23, %v9094_v50  ;;  %v2325_v20 = vmul.f32 %v5747_v16, %v9096_v39  ;;  %v7079_v53 = vmul.f32 %v5747_v16, %v1250_v44  ;;  %v2465_v45 = vsel %vm9072_vm11, %v9097_v31, 0.0  ;;  %v9098_v23 = vld [vmem:[#allocation22_spill] sm:$0xff]  ;;  %vm9151_vm11 = vmmov %vm8948_vm1 }
 0x25f   : > { %v2963_v52 = vadd.f32 %v2899_v2, %v2822_v1  ;;  %v2105_v0 = vadd.f32 %v2041_v12, %v9098_v23  ;;  %v2541_v41 = vsel %vm6671_vm2, %v7037_v15, 0.0  ;;  %v2616_v6 = vmul.f32 %v5781_v61, %v2465_v45  ;;  %v9099_v50 = vld [vmem:[#allocation142_spill] sm:$0xff]  ;;  %v9100_v2 = vld [vmem:[#allocation133_spill] sm:$0xff]  ;;  %v9101_v23 = vld [vmem:[#allocation171_spill] sm:$0xff] }
 0x260   : > { %9095 = vst [vmem:[#allocation20_spill] sm:$0xff] %v7063_v34  ;;  %v2248_v60 = vadd.f32 %v9099_v50, %v2107_v37  ;;  %v2618_v14 = vmul.f32 %v5781_v61, %v993_v62  ;;  %v2757_v63 = vmul.f32 %v4039_v42, %v9044_v5  ;;  %v2759_v29 = vmul.f32 %v4039_v42, %v9083_v51  ;;  %vm9104_vm2 = vmmov %vm9086_vm6  ;;  %v9105_v50 = vld [vmem:[#allocation173_spill] sm:$0xff] }
 0x261   : > { %v3011_v7 = vpack.c.bf16 %v2965_v35, %v2963_v52  ;;  %v2246_v1 = vadd.f32 %v9100_v2, %v2105_v0  ;;  %v2898_v12 = vmul.f32 %v5802_v11, %v1250_v44  ;;  %v2900_v27 = vmul.f32 %v5802_v11, %v2541_v41  ;;  %vm9125_vm7 = vmmov %vm9104_vm2 }
 0x262   : > { %v2389_v39 = vadd.f32 %v2325_v20, %v2248_v60  ;;  %v727_v45 = vadd.s32 184, %v3938_v3  ;;  %v9102_v37 = vrot.slane %v9101_v23, 7  ;;  %v9103_v62 = vrot.slane %v9063_v22, 7  ;;  %v9112_v60 = vld [vmem:[#allocation143_spill] sm:$0xff]  ;;  %vm9168_vm8 = vmmov %vm9104_vm2 }
 0x263   : > { %v9106_v33 = vrot.slane %v9105_v50, 1  ;;  %v9107_v51 = vrot.slane %v9101_v23, 1  ;;  %3257 = vmatprep.mubr.bf16.mxu1 %v3011_v7  ;;  %v2387_v44 = vadd.f32 %v6926_v55, %v2246_v1  ;;  %v9110_v52 = vrot.slane %v9063_v22, 1  ;;  %v9113_v7 = vld [vmem:[#allocation118_spill] sm:$0xff] }
 0x264   : > { %v990_v5 = vsel %vm9104_vm2, %v9103_v62, %v9102_v37  ;;  %v1678_v2 = vadd.f32 %v9112_v60, %v6829_v49  ;;  %v2682_v37 = vadd.f32 %v2618_v14, %v2389_v39  ;;  %v759_v62 = vand.u32 15, %v727_v45  ;;  %v9117_v14 = vld [vmem:[#allocation179_spill] sm:$0xff] }
 0x265   : > { %v7111_v35 = vsel %vm9108_vm4, %v9107_v51, %v9106_v33  ;;  %v9109_v20 = vmov %v9107_v51  ;;  %v1481_v41 = vmul.f32 %v3980_v19, %v990_v5  ;;  %vm9114_vm13 = vnez %v9113_v7 }
 0x266   : > { %v1247_v0 = vsel %vm9111_vm14, %v9110_v52, %v9109_v20  ;;  %v1895_v55 = vsel %vm9114_vm13, %v9080_v18, 0.0  ;;  %v2680_v1 = vadd.f32 %v2616_v6, %v2387_v44  ;;  %v1819_v34 = vadd.f32 %v6840_v17, %v1678_v2 }
 0x267   : > { %v1761_v33 = vmul.f32 %v4022_v36, %v1247_v0  ;;  %v7128_v51 = vadd.f32 %v1481_v41, %v4010_v32  ;;  %v2823_v52 = vadd.f32 %v2759_v29, %v2682_v37  ;;  %vm7134_vm3 = vcmp.lt.s32.totalorder %v759_v62, 15  ;;  %v9119_v62 = vld [vmem:[#allocation158_spill] sm:$0xff] }
 0x268   : > { %v2046_v18 = vmul.f32 %v8735_v38, %v1895_v55  ;;  %v2821_v6 = vadd.f32 %v2757_v63, %v2680_v1  ;;  %v1405_v45 = vsel %vm7134_vm3, %v7111_v35, 0.0  ;;  %v7146_v17 = vmul.f32 %v8735_v38, %v990_v5  ;;  %v9120_v1 = vld [vmem:[#allocation168_spill] sm:$0xff] }
 0x269   : > { %v7139_v39 = vadd.f32 %v1761_v33, %v9117_v14  ;;  %v2112_v44 = vadd.f32 %v6993_v46, %v1819_v34  ;;  %v2964_v29 = vadd.f32 %v2900_v27, %v2823_v52  ;;  %v7150_v41 = vmul.f32 %v4022_v36, %v1405_v45  ;;  %v9121_v34 = vld [vmem:[#allocation153_spill] sm:$0xff] }
 0x26a   : > { %v2110_v60 = vadd.f32 %v2046_v18, %v6833_v57  ;;  %v9118_v2 = vsel %vm6824_vm5, %v6959_v43, 0.0  ;;  %v2962_v37 = vadd.f32 %v2898_v12, %v2821_v6  ;;  %v7160_v55 = vmul.f32 %v5750_v9, %v1247_v0 }
 0x26b   : > { %v2330_v63 = vmul.f32 %v5750_v9, %v9118_v2  ;;  %v2253_v33 = vadd.f32 %v9119_v62, %v2112_v44  ;;  %v2470_v46 = vsel %vm9114_vm13, %v9120_v1, 0.0  ;;  %v2546_v57 = vsel %vm6824_vm5, %v7111_v35, 0.0  ;;  %v9122_v2 = vld [vmem:[#allocation162_spill] sm:$0xff] }
 0x26c   : > { %v2251_v27 = vadd.f32 %v9121_v34, %v2110_v60  ;;  %v2621_v43 = vmul.f32 %v5784_v30, %v2470_v46  ;;  %v2623_v52 = vmul.f32 %v5784_v30, %v990_v5  ;;  %v3010_v12 = vpack.c.bf16 %v2964_v29, %v2962_v37 }
 0x26d   : > { %v2394_v14 = vadd.f32 %v2330_v63, %v2253_v33  ;;  %v2762_v18 = vmul.f32 %v8729_v26, %v9063_v22  ;;  %v2764_v6 = vmul.f32 %v8729_v26, %v9101_v23  ;;  %v2903_v44 = vmul.f32 %v5805_v13, %v1247_v0  ;;  %v9126_v63 = vld [vmem:[#allocation172_spill] sm:$0xff] }
 0x26e   : > { %v2392_v45 = vadd.f32 %v7006_v48, %v2251_v27  ;;  %v2905_v60 = vmul.f32 %v5805_v13, %v2546_v57  ;;  %v9123_v62 = vrot.slane %v9122_v2, 7  ;;  %v9124_v46 = vrot.slane %v9087_v47, 7  ;;  %3258 = vmatmul.mubr.bf16.gmra.mxu1 %v3010_v12 }
 0x26f   : > { %v2687_v29 = vadd.f32 %v2623_v52, %v2394_v14  ;;  %v9127_v22 = vrot.slane %v9126_v63, 1  ;;  %v9128_v37 = vrot.slane %v9122_v2, 1  ;;  %v9131_v0 = vrot.slane %v9087_v47, 1  ;;  %v9133_v52 = vld [vmem:[#allocation141_spill] sm:$0xff] }
 0x270   : > { %v989_v5 = vsel %vm9125_vm7, %v9124_v46, %v9123_v62  ;;  %v2685_v27 = vadd.f32 %v2621_v43, %v2392_v45  ;;  %v1677_v12 = vadd.f32 %v9133_v52, %v6906_v21  ;;  %v1894_v43 = vsel %vm9114_vm13, %v9097_v31, 0.0  ;;  %v9137_v52 = vld [vmem:[#allocation166_spill] sm:$0xff] }
 0x271   : > { %v7190_v48 = vsel %vm9129_vm9, %v9128_v37, %v9127_v22  ;;  %v9130_v23 = vmov %v9128_v37  ;;  %v1480_v34 = vmul.f32 %v3949_v8, %v989_v5  ;;  %v2828_v62 = vadd.f32 %v2764_v6, %v2687_v29 }
 0x272   : > { %v1246_v33 = vsel %vm9132_vm15, %v9131_v0, %v9130_v23  ;;  %v1404_v57 = vsel %vm7134_vm3, %v7190_v48, 0.0  ;;  %v2826_v45 = vadd.f32 %v2762_v18, %v2685_v27  ;;  %v1818_v37 = vadd.f32 %v6900_v24, %v1677_v12  ;;  %v9134_v23 = vld [vmem:[#allocation177_spill] sm:$0xff] }
 0x273   : > { %v1760_v14 = vmul.f32 %v8731_v56, %v1246_v33  ;;  %v7206_v46 = vadd.f32 %v1480_v34, %v3958_v10  ;;  %v7209_v22 = vmul.f32 %v8731_v56, %v1404_v57  ;;  %v2969_v6 = vadd.f32 %v2905_v60, %v2828_v62  ;;  %v9138_v12 = vld [vmem:[#allocation37_spill] sm:$0xff] }
 0x274   : > { %v2045_v29 = vmul.f32 %v4035_v40, %v1894_v43  ;;  %v7223_v34 = vmul.f32 %v4035_v40, %v989_v5  ;;  %v9136_v31 = vsel %vm6824_vm5, %v7037_v15, 0.0  ;;  %v2967_v24 = vadd.f32 %v2903_v44, %v2826_v45  ;;  %v9139_v45 = vld [vmem:[#allocation156_spill] sm:$0xff] }
 0x275   : > { %v7216_v0 = vadd.f32 %v1760_v14, %v9134_v23  ;;  %v2329_v18 = vmul.f32 %v5747_v16, %v9136_v31  ;;  %v2111_v27 = vadd.f32 %v7070_v58, %v1818_v37  ;;  %v7232_v57 = vmul.f32 %v5747_v16, %v1246_v33  ;;  %v9140_v23 = vld [vmem:[#allocation146_spill] sm:$0xff] }
 0x276   : > { %v2469_v60 = vsel %vm9114_vm13, %v9137_v52, 0.0  ;;  %v2109_v14 = vadd.f32 %v2045_v29, %v9138_v12  ;;  %v2545_v62 = vsel %vm6824_vm5, %v7190_v48, 0.0  ;;  %v2622_v43 = vmul.f32 %v5781_v61, %v989_v5  ;;  %v9141_v5 = vld [vmem:[#allocation184_spill] sm:$0xff]  ;;  %vm9144_vm5 = vmmov %vm9104_vm2 }
 0x277   : > { %9135 = vst [vmem:[#allocation9_spill] sm:$0xff] %v7216_v0  ;;  %v2620_v15 = vmul.f32 %v5781_v61, %v2469_v60  ;;  %v3013_v44 = vpack.c.bf16 %v2969_v6, %v2967_v24  ;;  %v2252_v58 = vadd.f32 %v9139_v45, %v2111_v27  ;;  %v2761_v37 = vmul.f32 %v4039_v42, %v9087_v47  ;;  %v9145_v27 = vld [vmem:[#allocation194_spill] sm:$0xff]  ;;  %vm9172_vm2 = vmmov %vm9108_vm4 }
 0x278   : > { %v2763_v7 = vmul.f32 %v4039_v42, %v9122_v2  ;;  %v2250_v31 = vadd.f32 %v9140_v23, %v2109_v14  ;;  %v2902_v29 = vmul.f32 %v5802_v11, %v1246_v33  ;;  %v2904_v28 = vmul.f32 %v5802_v11, %v2545_v62  ;;  %vm9175_vm4 = vmmov %vm9172_vm2 }
 0x279   : > { %v729_v12 = vadd.s32 200, %v3938_v3  ;;  %3265 = vmatprep.mubr.bf16.mxu1 %v3013_v44  ;;  %v2393_v60 = vadd.f32 %v2329_v18, %v2252_v58  ;;  %v9142_v6 = vrot.slane %v9141_v5, 7  ;;  %v9143_v24 = vrot.slane %v9105_v50, 7  ;;  %vm9191_vm14 = vmmov %vm9172_vm2 }
 0x27a   : > { %v9146_v45 = vrot.slane %v9145_v27, 1  ;;  %v9147_v2 = vrot.slane %v9141_v5, 1  ;;  %v9150_v62 = vrot.slane %v9105_v50, 1  ;;  %v2391_v44 = vadd.f32 %v7079_v53, %v2250_v31  ;;  %vm9194_vm13 = vmmov %vm9172_vm2 }
 0x27b   : > { %v986_v47 = vsel %vm9144_vm5, %v9143_v24, %v9142_v6  ;;  %v761_v58 = vand.u32 15, %v729_v12  ;;  %v9152_v6 = vld [vmem:[#allocation157_spill] sm:$0xff]  ;;  %v2686_v21 = vadd.f32 %v2622_v43, %v2393_v60  ;;  %vm9208_vm15 = vmmov %vm9144_vm5 }
 0x27c   : > { %v7264_v33 = vsel %vm9148_vm10, %v9147_v2, %v9146_v45  ;;  %v9149_v14 = vmov %v9147_v2  ;;  %v1485_v23 = vmul.f32 %v3980_v19, %v986_v47  ;;  %v1682_v24 = vadd.f32 %v9152_v6, %v6972_v54  ;;  %v9153_v45 = vld [vmem:[#allocation130_spill] sm:$0xff]  ;;  %vm9215_vm10 = vmmov %vm9172_vm2 }
 0x27d   : > { %v1243_v18 = vsel %vm9151_vm11, %v9150_v62, %v9149_v14  ;;  %vm9154_vm6 = vnez %v9153_v45  ;;  %v2684_v14 = vadd.f32 %v2620_v15, %v2391_v44  ;;  %vm7283_vm1 = vcmp.lt.s32.totalorder %v761_v58, 15  ;;  %v9157_v54 = vld [vmem:[#allocation38_spill] sm:$0xff]  ;;  %vm9232_vm11 = vmmov %vm9172_vm2 }
 0x27e   : > { %v1765_v20 = vmul.f32 %v4022_v36, %v1243_v18  ;;  %v1899_v2 = vsel %vm9154_vm6, %v9120_v1, 0.0  ;;  %v7288_v31 = vadd.f32 %v1485_v23, %v4010_v32  ;;  %v1823_v43 = vadd.f32 %v9157_v54, %v1682_v24  ;;  %v9158_v1 = vld [vmem:[#allocation192_spill] sm:$0xff] }
 0x27f   : > { %v2827_v12 = vadd.f32 %v2763_v7, %v2686_v21  ;;  %v1409_v60 = vsel %vm7283_vm1, %v7264_v33, 0.0  ;;  %v2050_v6 = vmul.f32 %v8735_v38, %v1899_v2  ;;  %v2825_v15 = vadd.f32 %v2761_v37, %v2684_v14  ;;  %v9160_v21 = vld [vmem:[#allocation28_spill] sm:$0xff] }
 0x280   : > { %v7295_v62 = vadd.f32 %v1765_v20, %v9158_v1  ;;  %v7299_v44 = vmul.f32 %v4022_v36, %v1409_v60  ;;  %v7302_v58 = vmul.f32 %v8735_v38, %v986_v47  ;;  %v2116_v23 = vadd.f32 %v7146_v17, %v1823_v43  ;;  %v9162_v14 = vld [vmem:[#allocation176_spill] sm:$0xff]  ;;  %v9163_v1 = vld [vmem:[#allocation181_spill] sm:$0xff] }
 0x281   : > { %v2968_v24 = vadd.f32 %v2904_v28, %v2827_v12  ;;  %v2114_v7 = vadd.f32 %v2050_v6, %v9160_v21  ;;  %v9161_v54 = vsel %vm6980_vm12, %v7111_v35, 0.0  ;;  %v7312_v2 = vmul.f32 %v5750_v9, %v1243_v18  ;;  %v9164_v28 = vld [vmem:[#allocation167_spill] sm:$0xff] }
 0x282   : > { %9159 = vst [vmem:[#allocation43_spill] sm:$0xff] %v7295_v62  ;;  %v2334_v20 = vmul.f32 %v5750_v9, %v9161_v54  ;;  %v2966_v37 = vadd.f32 %v2902_v29, %v2825_v15  ;;  %v2257_v60 = vadd.f32 %v9162_v14, %v2116_v23  ;;  %v2474_v0 = vsel %vm9154_vm6, %v9163_v1, 0.0  ;;  %v9165_v62 = vld [vmem:[#allocation183_spill] sm:$0xff] }
 0x283   : > { %v2550_v17 = vsel %vm6980_vm12, %v7264_v33, 0.0  ;;  %v2255_v43 = vadd.f32 %v9164_v28, %v2114_v7  ;;  %v2625_v35 = vmul.f32 %v5784_v30, %v2474_v0  ;;  %v2627_v12 = vmul.f32 %v5784_v30, %v986_v47  ;;  %v9169_v28 = vld [vmem:[#allocation185_spill] sm:$0xff] }
 0x284   : > { %v2766_v6 = vmul.f32 %v8729_v26, %v9105_v50  ;;  %v3012_v29 = vpack.c.bf16 %v2968_v24, %v2966_v37  ;;  %v2398_v15 = vadd.f32 %v2334_v20, %v2257_v60  ;;  %v2768_v23 = vmul.f32 %v8729_v26, %v9141_v5 }
 0x285   : > { %v2907_v21 = vmul.f32 %v5805_v13, %v1243_v18  ;;  %v2396_v54 = vadd.f32 %v7160_v55, %v2255_v43  ;;  %v2909_v14 = vmul.f32 %v5805_v13, %v2550_v17  ;;  %v9166_v7 = vrot.slane %v9165_v62, 7 }
 0x286   : > { %v9167_v0 = vrot.slane %v9126_v63, 7  ;;  %v9170_v50 = vrot.slane %v9169_v28, 1  ;;  %v9171_v24 = vrot.slane %v9165_v62, 1  ;;  %3266 = vmatmul.mubr.bf16.gmra.mxu1 %v3012_v29  ;;  %v2691_v18 = vadd.f32 %v2627_v12, %v2398_v15 }
 0x287   : > { %v9174_v20 = vrot.slane %v9126_v63, 1  ;;  %v2689_v43 = vadd.f32 %v2625_v35, %v2396_v54  ;;  %v2767_v45 = vmul.f32 %v4039_v42, %v9165_v62 }
 0x288   : > { %v985_v47 = vsel %vm9168_vm8, %v9167_v0, %v9166_v7  ;;  %v7343_v5 = vsel %vm9172_vm2, %v9171_v24, %v9170_v50  ;;  %v9173_v55 = vmov %v9171_v24  ;;  %v9176_v7 = vld [vmem:[#allocation154_spill] sm:$0xff]  ;;  %v2832_v15 = vadd.f32 %v2768_v23, %v2691_v18 }
 0x289   : > { %v1242_v37 = vsel %vm9175_vm4, %v9174_v20, %v9173_v55  ;;  %v1408_v60 = vsel %vm7283_vm1, %v7343_v5, 0.0  ;;  %v1484_v17 = vmul.f32 %v3949_v8, %v985_v47  ;;  %v1681_v0 = vadd.f32 %v9176_v7, %v7053_v59  ;;  %v9177_v55 = vld [vmem:[#allocation190_spill] sm:$0xff] }
 0x28a   : > { %v1764_v29 = vmul.f32 %v8731_v56, %v1242_v37  ;;  %v7359_v12 = vmul.f32 %v8731_v56, %v1408_v60  ;;  %v1898_v24 = vsel %vm9154_vm6, %v9137_v52, 0.0  ;;  %v2830_v54 = vadd.f32 %v2766_v6, %v2689_v43 }
 0x28b   : > { %v7362_v50 = vadd.f32 %v1484_v17, %v3958_v10  ;;  %v1822_v59 = vadd.f32 %v7056_v4, %v1681_v0  ;;  %v2049_v60 = vmul.f32 %v4035_v40, %v1898_v24  ;;  %v2973_v23 = vadd.f32 %v2909_v14, %v2832_v15  ;;  %v9180_v4 = vld [vmem:[#allocation20_spill] sm:$0xff] }
 0x28c   : > { %v7372_v20 = vadd.f32 %v1764_v29, %v9177_v55  ;;  %v7376_v18 = vmul.f32 %v4035_v40, %v985_v47  ;;  %v9179_v52 = vsel %vm6980_vm12, %v7190_v48, 0.0  ;;  %v7384_v7 = vmul.f32 %v5747_v16, %v1242_v37  ;;  %v9181_v29 = vld [vmem:[#allocation180_spill] sm:$0xff] }
 0x28d   : > { %v2333_v17 = vmul.f32 %v5747_v16, %v9179_v52  ;;  %v2971_v6 = vadd.f32 %v2907_v21, %v2830_v54  ;;  %v2113_v43 = vadd.f32 %v2049_v60, %v9180_v4  ;;  %v2115_v0 = vadd.f32 %v7223_v34, %v1822_v59  ;;  %v9182_v54 = vld [vmem:[#allocation164_spill] sm:$0xff]  ;;  %v9183_v52 = vld [vmem:[#allocation170_spill] sm:$0xff] }
 0x28e   : > { %9178 = vst [vmem:[#allocation23_spill] sm:$0xff] %v7372_v20  ;;  %v2473_v14 = vsel %vm9154_vm6, %v9181_v29, 0.0  ;;  %v2549_v15 = vsel %vm6980_vm12, %v7343_v5, 0.0  ;;  %v2626_v24 = vmul.f32 %v5781_v61, %v985_v47  ;;  %v2765_v55 = vmul.f32 %v4039_v42, %v9126_v63  ;;  %vm9187_vm12 = vmmov %vm9144_vm5 }
 0x28f   : > { %v2624_v48 = vmul.f32 %v5781_v61, %v2473_v14  ;;  %v3015_v21 = vpack.c.bf16 %v2973_v23, %v2971_v6  ;;  %v2254_v60 = vadd.f32 %v9182_v54, %v2113_v43  ;;  %v2256_v34 = vadd.f32 %v9183_v52, %v2115_v0  ;;  %v9184_v14 = vld [vmem:[#allocation197_spill] sm:$0xff]  ;;  %v9188_v43 = vld [vmem:[#allocation206_spill] sm:$0xff]  ;;  %vm9212_vm5 = vmmov %vm9172_vm2 }
 0x290   : > { %v2906_v59 = vmul.f32 %v5802_v11, %v1242_v37  ;;  %v2908_v25 = vmul.f32 %v5802_v11, %v2549_v15  ;;  %v731_v4 = vadd.s32 216, %v3938_v3  ;;  %v9185_v35 = vrot.slane %v9184_v14, 7  ;;  %vm9235_vm6 = vmmov %vm9172_vm2 }
 0x291   : > { %v9186_v47 = vrot.slane %v9145_v27, 7  ;;  %3273 = vmatprep.mubr.bf16.mxu1 %v3015_v21  ;;  %v2395_v23 = vadd.f32 %v7232_v57, %v2254_v60  ;;  %v2397_v6 = vadd.f32 %v2333_v17, %v2256_v34  ;;  %v9189_v0 = vrot.slane %v9188_v43, 1  ;;  %v9195_v57 = vld [vmem:[#allocation174_spill] sm:$0xff] }
 0x292   : > { %v9190_v62 = vrot.slane %v9184_v14, 1  ;;  %v9193_v54 = vrot.slane %v9145_v27, 1  ;;  %v1686_v17 = vadd.f32 %v9195_v57, %v7128_v51 }
 0x293   : > { %v982_v63 = vsel %vm9187_vm12, %v9186_v47, %v9185_v35  ;;  %v763_v35 = vand.u32 15, %v731_v4  ;;  %v2688_v34 = vadd.f32 %v2624_v48, %v2395_v23  ;;  %v2690_v47 = vadd.f32 %v2626_v24, %v2397_v6  ;;  %vm9255_vm12 = vmmov %vm9212_vm5 }
 0x294   : > { %v7418_v37 = vsel %vm9191_vm14, %v9190_v62, %v9189_v0  ;;  %v9192_v15 = vmov %v9190_v62  ;;  %v1489_v21 = vmul.f32 %v3980_v19, %v982_v63  ;;  %v9196_v0 = vld [vmem:[#allocation151_spill] sm:$0xff]  ;;  %v1827_v51 = vadd.f32 %v7150_v41, %v1686_v17  ;;  %vm9258_vm14 = vmmov %vm9212_vm5 }
 0x295   : > { %v1239_v52 = vsel %vm9194_vm13, %v9193_v54, %v9192_v15  ;;  %vm9197_vm7 = vnez %v9196_v0  ;;  %vm7436_vm9 = vcmp.lt.s32.totalorder %v763_v35, 15  ;;  %v9200_v54 = vld [vmem:[#allocation210_spill] sm:$0xff]  ;;  %v2829_v24 = vadd.f32 %v2765_v55, %v2688_v34 }
 0x296   : > { %v1769_v60 = vmul.f32 %v4022_v36, %v1239_v52  ;;  %v1903_v62 = vsel %vm9197_vm7, %v9163_v1, 0.0  ;;  %v7441_v4 = vadd.f32 %v1489_v21, %v4010_v32  ;;  %v2831_v23 = vadd.f32 %v2767_v45, %v2690_v47  ;;  %v9202_v47 = vld [vmem:[#allocation189_spill] sm:$0xff] }
 0x297   : > { %v1413_v1 = vsel %vm7436_vm9, %v7418_v37, 0.0  ;;  %v2054_v6 = vmul.f32 %v8735_v38, %v1903_v62  ;;  %v7455_v57 = vmul.f32 %v8735_v38, %v982_v63  ;;  %v2120_v21 = vadd.f32 %v7302_v58, %v1827_v51 }
 0x298   : > { %v7445_v48 = vadd.f32 %v1769_v60, %v9200_v54  ;;  %v7452_v35 = vmul.f32 %v4022_v36, %v1413_v1  ;;  %v9201_v41 = vsel %vm7134_vm3, %v7264_v33, 0.0  ;;  %v2970_v45 = vadd.f32 %v2906_v59, %v2829_v24  ;;  %v9203_v54 = vld [vmem:[#allocation200_spill] sm:$0xff]  ;;  %v9204_v59 = vld [vmem:[#allocation182_spill] sm:$0xff] }
 0x299   : > { %v2338_v55 = vmul.f32 %v5750_v9, %v9201_v41  ;;  %v2972_v17 = vadd.f32 %v2908_v25, %v2831_v23  ;;  %v2118_v60 = vadd.f32 %v2054_v6, %v7139_v39  ;;  %v7465_v34 = vmul.f32 %v5750_v9, %v1239_v52 }
 0x29a   : > { %v2261_v62 = vadd.f32 %v9202_v47, %v2120_v21  ;;  %v2478_v1 = vsel %vm9197_vm7, %v9203_v54, 0.0  ;;  %v2554_v58 = vsel %vm7134_vm3, %v7418_v37, 0.0  ;;  %v2631_v33 = vmul.f32 %v5784_v30, %v982_v63  ;;  %v9205_v63 = vld [vmem:[#allocation195_spill] sm:$0xff] }
 0x29b   : > { %v3014_v51 = vpack.c.bf16 %v2972_v17, %v2970_v45  ;;  %v2259_v25 = vadd.f32 %v9204_v59, %v2118_v60  ;;  %v2629_v39 = vmul.f32 %v5784_v30, %v2478_v1  ;;  %v2770_v24 = vmul.f32 %v8729_v26, %v9145_v27  ;;  %v9209_v1 = vld [vmem:[#allocation205_spill] sm:$0xff] }
 0x29c   : > { %v2402_v23 = vadd.f32 %v2338_v55, %v2261_v62  ;;  %v2772_v6 = vmul.f32 %v8729_v26, %v9184_v14  ;;  %v2911_v21 = vmul.f32 %v5805_v13, %v1239_v52  ;;  %v2913_v41 = vmul.f32 %v5805_v13, %v2554_v58 }
 0x29d   : > { %3274 = vmatmul.mubr.bf16.gmra.mxu1 %v3014_v51  ;;  %v2400_v47 = vadd.f32 %v7312_v2, %v2259_v25  ;;  %v9206_v45 = vrot.slane %v9205_v63, 7  ;;  %v9207_v17 = vrot.slane %v9169_v28, 7  ;;  %v9210_v27 = vrot.slane %v9209_v1, 1  ;;  %v9216_v25 = vld [vmem:[#allocation169_spill] sm:$0xff] }
 0x29e   : > { %v9211_v55 = vrot.slane %v9205_v63, 1  ;;  %v9214_v62 = vrot.slane %v9169_v28, 1  ;;  %v2695_v58 = vadd.f32 %v2631_v33, %v2402_v23  ;;  %v2771_v0 = vmul.f32 %v4039_v42, %v9205_v63 }
 0x29f   : > { %v981_v60 = vsel %vm9208_vm15, %v9207_v17, %v9206_v45  ;;  %v1685_v45 = vadd.f32 %v9216_v25, %v7206_v46  ;;  %v2693_v17 = vadd.f32 %v2629_v39, %v2400_v47  ;;  %v9218_v47 = vld [vmem:[#allocation204_spill] sm:$0xff] }
 0x2a0   : > { %v7496_v14 = vsel %vm9212_vm5, %v9211_v55, %v9210_v27  ;;  %v9213_v52 = vmov %v9211_v55  ;;  %v1488_v59 = vmul.f32 %v3949_v8, %v981_v60  ;;  %v2836_v33 = vadd.f32 %v2772_v6, %v2695_v58 }
 0x2a1   : > { %v1238_v2 = vsel %vm9215_vm10, %v9214_v62, %v9213_v52  ;;  %v1412_v51 = vsel %vm7436_vm9, %v7496_v14, 0.0  ;;  %v1902_v52 = vsel %vm9197_vm7, %v9181_v29, 0.0  ;;  %v1826_v62 = vadd.f32 %v7209_v22, %v1685_v45  ;;  %v9221_v45 = vld [vmem:[#allocation9_spill] sm:$0xff] }
 0x2a2   : > { %v1768_v27 = vmul.f32 %v8731_v56, %v1238_v2  ;;  %v7512_v55 = vmul.f32 %v8731_v56, %v1412_v51  ;;  %v7518_v23 = vadd.f32 %v1488_v59, %v3958_v10  ;;  %v2834_v39 = vadd.f32 %v2770_v24, %v2693_v17 }
 0x2a3   : > { %v2053_v51 = vmul.f32 %v4035_v40, %v1902_v52  ;;  %v7529_v20 = vmul.f32 %v4035_v40, %v981_v60  ;;  %v2977_v29 = vadd.f32 %v2913_v41, %v2836_v33  ;;  %v2119_v6 = vadd.f32 %v7376_v18, %v1826_v62  ;;  %v9223_v41 = vld [vmem:[#allocation187_spill] sm:$0xff] }
 0x2a4   : > { %9217 = vst [vmem:[#allocation30_spill] sm:$0xff] %v7512_v55  ;;  %v7525_v25 = vadd.f32 %v1768_v27, %v9218_v47  ;;  %v9220_v22 = vsel %vm7134_vm3, %v7343_v5, 0.0  ;;  %v7538_v59 = vmul.f32 %v5747_v16, %v1238_v2  ;;  %v2975_v24 = vadd.f32 %v2911_v21, %v2834_v39  ;;  %v9222_v27 = vld [vmem:[#allocation193_spill] sm:$0xff]  ;;  %v9224_v39 = vld [vmem:[#allocation178_spill] sm:$0xff] }
 0x2a5   : > { %v2337_v58 = vmul.f32 %v5747_v16, %v9220_v22  ;;  %v2117_v17 = vadd.f32 %v2053_v51, %v9221_v45  ;;  %v2477_v52 = vsel %vm9197_vm7, %v9222_v27, 0.0  ;;  %v2553_v18 = vsel %vm7134_vm3, %v7496_v14, 0.0  ;;  %vm9228_vm3 = vmmov %vm9168_vm8 }
 0x2a6   : > { %9219 = vst [vmem:[#allocation25_spill] sm:$0xff] %v7525_v25  ;;  %v2260_v33 = vadd.f32 %v9223_v41, %v2119_v6  ;;  %v2628_v5 = vmul.f32 %v5781_v61, %v2477_v52  ;;  %v2630_v62 = vmul.f32 %v5781_v61, %v981_v60  ;;  %v2769_v47 = vmul.f32 %v4039_v42, %v9169_v28  ;;  %v9225_v41 = vld [vmem:[#allocation216_spill] sm:$0xff]  ;;  %v9237_v25 = vld [vmem:[#allocation163_spill] sm:$0xff]  ;;  %vm9251_vm4 = vmmov %vm9228_vm3 }
 0x2a7   : > { %v3017_v21 = vpack.c.bf16 %v2977_v29, %v2975_v24  ;;  %v2258_v51 = vadd.f32 %v9224_v39, %v2117_v17  ;;  %v2910_v22 = vmul.f32 %v5802_v11, %v1238_v2  ;;  %v2912_v49 = vmul.f32 %v5802_v11, %v2553_v18  ;;  %v9229_v24 = vld [vmem:[#allocation218_spill] sm:$0xff] }
 0x2a8   : > { %v2401_v45 = vadd.f32 %v2337_v58, %v2260_v33  ;;  %v733_v6 = vadd.s32 232, %v3938_v3  ;;  %v9226_v52 = vrot.slane %v9225_v41, 7  ;;  %v9227_v60 = vrot.slane %v9188_v43, 7 }
 0x2a9   : > { %3281 = vmatprep.mubr.bf16.mxu1 %v3017_v21  ;;  %v2399_v29 = vadd.f32 %v7384_v7, %v2258_v51  ;;  %v9230_v17 = vrot.slane %v9229_v24, 1  ;;  %v9231_v63 = vrot.slane %v9225_v41, 1  ;;  %v9234_v18 = vrot.slane %v9188_v43, 1  ;;  %v7580_v21 = vpop.f32.mrf.mxu1 }
 0x2aa   : > { %v978_v28 = vsel %vm9228_vm3, %v9227_v60, %v9226_v52  ;;  %v2694_v7 = vadd.f32 %v2630_v62, %v2401_v45  ;;  %v765_v51 = vand.u32 15, %v733_v6  ;;  %v9236_v52 = vld [vmem:[#allocation188_spill] sm:$0xff]  ;;  %vm9238_vm8 = vnez %v9237_v25  ;;  %v9241_v45 = vld [vmem:[#allocation223_spill] sm:$0xff] }
 0x2ab   : > { %v7571_v2 = vsel %vm9232_vm11, %v9231_v63, %v9230_v17  ;;  %v9233_v58 = vmov %v9231_v63  ;;  %v1493_v39 = vmul.f32 %v3980_v19, %v978_v28  ;;  %v1690_v60 = vadd.f32 %v9236_v52, %v7288_v31  ;;  %v9248_v19 = vld [vmem:[#allocation207_spill] sm:$0xff]  ;;  %v9321_v62 = vld [vmem:[#allocation12_spill] sm:$0xff] }
 0x2ac   : > { %v1235_v33 = vsel %vm9235_vm6, %v9234_v18, %v9233_v58  ;;  %v2692_v17 = vadd.f32 %v2628_v5, %v2399_v29  ;;  %v1907_v55 = vsel %vm9238_vm8, %v9203_v54, 0.0  ;;  %v2835_v58 = vadd.f32 %v2771_v0, %v2694_v7  ;;  %v7609_v0 = vpop.f32.mrf.mxu1 }
 0x2ad   : > { %v1773_v46 = vmul.f32 %v4022_v36, %v1235_v33  ;;  %v7586_v63 = vadd.f32 %v1493_v39, %v4010_v32  ;;  %vm7594_vm2 = vcmp.lt.s32.totalorder %v765_v51, 15  ;;  %v1831_v31 = vadd.f32 %v7299_v44, %v1690_v60  ;;  %v9243_v51 = vld [vmem:[#allocation43_spill] sm:$0xff]  ;;  %v9244_v60 = vld [vmem:[#allocation213_spill] sm:$0xff] }
 0x2ae   : > { %v2833_v32 = vadd.f32 %v2769_v47, %v2692_v17  ;;  %v1417_v6 = vsel %vm7594_vm2, %v7571_v2, 0.0  ;;  %v2058_v54 = vmul.f32 %v8735_v38, %v1907_v55  ;;  %v7607_v29 = vmul.f32 %v8735_v38, %v978_v28  ;;  %v9245_v17 = vld [vmem:[#allocation203_spill] sm:$0xff] }
 0x2af   : > { %v7600_v5 = vadd.f32 %v1773_v46, %v9241_v45  ;;  %v2976_v18 = vadd.f32 %v2912_v49, %v2835_v58  ;;  %v7612_v39 = vmul.f32 %v4022_v36, %v1417_v6  ;;  %v2124_v44 = vadd.f32 %v7455_v57, %v1831_v31  ;;  %v9246_v45 = vld [vmem:[#allocation198_spill] sm:$0xff] }
 0x2b0   : > { %v9242_v46 = vsel %vm7283_vm1, %v7418_v37, 0.0  ;;  %v2974_v7 = vadd.f32 %v2910_v22, %v2833_v32  ;;  %v2122_v55 = vadd.f32 %v2058_v54, %v9243_v51  ;;  %v7622_v52 = vmul.f32 %v5750_v9, %v1235_v33 }
 0x2b1   : > { %v2342_v47 = vmul.f32 %v5750_v9, %v9242_v46  ;;  %v2482_v49 = vsel %vm9238_vm8, %v9244_v60, 0.0  ;;  %v2265_v58 = vadd.f32 %v9245_v17, %v2124_v44  ;;  %v2558_v57 = vsel %vm7283_vm1, %v7571_v2, 0.0  ;;  %v7638_v46 = vpop.f32.mrf.mxu1 }
 0x2b2   : > { %v2633_v37 = vmul.f32 %v5784_v30, %v2482_v49  ;;  %v2635_v31 = vmul.f32 %v5784_v30, %v978_v28  ;;  %v3016_v22 = vpack.c.bf16 %v2976_v18, %v2974_v7  ;;  %v2263_v32 = vadd.f32 %v9246_v45, %v2122_v55  ;;  %9247 = vst [vmem:[#allocation19_spill] sm:$0xff] %v7638_v46  ;;  %v9252_v7 = vld [vmem:[#allocation217_spill] sm:$0xff] }
 0x2b3   : > { %v2774_v6 = vmul.f32 %v8729_v26, %v9188_v43  ;;  %v2776_v54 = vmul.f32 %v8729_v26, %v9225_v41  ;;  %v2406_v44 = vadd.f32 %v2342_v47, %v2265_v58  ;;  %v2915_v51 = vmul.f32 %v5805_v13, %v1235_v33 }
 0x2b4   : > { %v2917_v17 = vmul.f32 %v5805_v13, %v2558_v57  ;;  %v9249_v49 = vrot.slane %v9248_v19, 7  ;;  %v9250_v28 = vrot.slane %v9209_v1, 7  ;;  %3282 = vmatmul.mubr.bf16.gmra.mxu1 %v3016_v22  ;;  %v2404_v43 = vadd.f32 %v7465_v34, %v2263_v32  ;;  %v9259_v32 = vld [vmem:[#allocation186_spill] sm:$0xff] }
 0x2b5   : > { %v9253_v55 = vrot.slane %v9252_v7, 1  ;;  %v9254_v41 = vrot.slane %v9248_v19, 1  ;;  %v9257_v58 = vrot.slane %v9209_v1, 1  ;;  %v2699_v22 = vadd.f32 %v2635_v31, %v2406_v44  ;;  %v7679_v31 = vpop.f32.mrf.mxu1 }
 0x2b6   : > { %v977_v18 = vsel %vm9251_vm4, %v9250_v28, %v9249_v49  ;;  %v1689_v49 = vadd.f32 %v9259_v32, %v7362_v50  ;;  %v9262_v32 = vld [vmem:[#allocation211_spill] sm:$0xff]  ;;  %v2775_v25 = vmul.f32 %v4039_v42, %v9248_v19 }
 0x2b7   : > { %v7655_v47 = vsel %vm9255_vm12, %v9254_v41, %v9253_v55  ;;  %v9256_v33 = vmov %v9254_v41  ;;  %v1492_v45 = vmul.f32 %v3949_v8, %v977_v18  ;;  %v2697_v55 = vadd.f32 %v2633_v37, %v2404_v43 }
 0x2b8   : > { %v1234_v57 = vsel %vm9258_vm14, %v9257_v58, %v9256_v33  ;;  %v1416_v34 = vsel %vm7594_vm2, %v7655_v47, 0.0  ;;  %v1906_v8 = vsel %vm9238_vm8, %v9222_v27, 0.0  ;;  %v2840_v44 = vadd.f32 %v2776_v54, %v2699_v22  ;;  %v9260_v58 = vld [vmem:[#allocation221_spill] sm:$0xff] }
 0x2b9   : > { %v1772_v28 = vmul.f32 %v8731_v56, %v1234_v57  ;;  %v7671_v41 = vadd.f32 %v1492_v45, %v3958_v10  ;;  %v7674_v46 = vmul.f32 %v8731_v56, %v1416_v34  ;;  %v1830_v33 = vadd.f32 %v7359_v12, %v1689_v49 }
 0x2ba   : > { %v2838_v37 = vadd.f32 %v2774_v6, %v2697_v55  ;;  %v2057_v43 = vmul.f32 %v4035_v40, %v1906_v8  ;;  %v7690_v45 = vmul.f32 %v4035_v40, %v977_v18  ;;  %v9261_v27 = vsel %vm7283_vm1, %v7496_v14, 0.0 }
 0x2bb   : > { %v7683_v50 = vadd.f32 %v1772_v28, %v9260_v58  ;;  %v2341_v54 = vmul.f32 %v5747_v16, %v9261_v27  ;;  %v2981_v12 = vadd.f32 %v2917_v17, %v2840_v44  ;;  %v2123_v22 = vadd.f32 %v7529_v20, %v1830_v33  ;;  %v9263_v28 = vld [vmem:[#allocation23_spill] sm:$0xff]  ;;  %v7709_v58 = vpop.f32.mrf.mxu1  ;;  %v9264_v17 = vld [vmem:[#allocation201_spill] sm:$0xff] }
 0x2bc   : > { %v7699_v34 = vmul.f32 %v5747_v16, %v1234_v57  ;;  %v2481_v6 = vsel %vm9238_vm8, %v9262_v32, 0.0  ;;  %v2979_v49 = vadd.f32 %v2915_v51, %v2838_v37  ;;  %v2121_v55 = vadd.f32 %v2057_v43, %v9263_v28  ;;  %v9265_v37 = vld [vmem:[#allocation191_spill] sm:$0xff]  ;;  %v9266_v28 = vld [vmem:[#allocation233_spill] sm:$0xff] }
 0x2bd   : > { %v2557_v8 = vsel %vm7283_vm1, %v7655_v47, 0.0  ;;  %v2632_v14 = vmul.f32 %v5781_v61, %v2481_v6  ;;  %v2264_v20 = vadd.f32 %v9264_v17, %v2123_v22  ;;  %v2634_v44 = vmul.f32 %v5781_v61, %v977_v18  ;;  %vm9268_vm1 = vmmov %vm9212_vm5  ;;  %v9269_v22 = vld [vmem:[#allocation202_spill] sm:$0xff]  ;;  %v9270_v17 = vld [vmem:[#allocation175_spill] sm:$0xff] }
 0x2be   : > { %v2773_v33 = vmul.f32 %v4039_v42, %v9209_v1  ;;  %v3019_v51 = vpack.c.bf16 %v2981_v12, %v2979_v49  ;;  %v2262_v43 = vadd.f32 %v9265_v37, %v2121_v55  ;;  %v2914_v53 = vmul.f32 %v5802_v11, %v1234_v57  ;;  %v9272_v49 = vld [vmem:[#allocation241_spill] sm:$0xff]  ;;  %vm9274_vm7 = vmmov %vm9268_vm1 }
 0x2bf   : > { %v2916_v27 = vmul.f32 %v5802_v11, %v2557_v8  ;;  %v2405_v6 = vadd.f32 %v2341_v54, %v2264_v20  ;;  %v9267_v10 = vrot.slane %v9229_v24, 1  ;;  %v1694_v1 = vadd.f32 %v9269_v22, %v7441_v4  ;;  %v7738_v8 = vpop.f32.mrf.mxu1  ;;  %v9276_v37 = vld [vmem:[#allocation237_spill] sm:$0xff]  ;;  %vm9284_vm15 = vmmov %vm9268_vm1 }
 0x2c0   : > { %vm9271_vm13 = vnez %v9270_v17  ;;  %3289 = vmatprep.mubr.bf16.mxu1 %v3019_v51  ;;  %v2403_v12 = vadd.f32 %v7538_v59, %v2262_v43  ;;  %v9273_v54 = vrot.slane %v9272_v49, 1  ;;  %vm9289_vm5 = vmmov %vm9268_vm1  ;;  %v9297_v17 = vld [vmem:[#allocation227_spill] sm:$0xff] }
 0x2c1   : > { %v1231_v18 = vsel %vm9268_vm1, %v9267_v10, %v9266_v28  ;;  %v1911_v19 = vsel %vm9271_vm13, %v9244_v60, 0.0  ;;  %v2698_v4 = vadd.f32 %v2634_v44, %v2405_v6  ;;  %v1835_v20 = vadd.f32 %v7452_v35, %v1694_v1  ;;  %v9277_v1 = vld [vmem:[#allocation225_spill] sm:$0xff]  ;;  %vm9303_vm10 = vmmov %vm9268_vm1 }
 0x2c2   : > { %v1777_v57 = vmul.f32 %v4022_v36, %v1231_v18  ;;  %v1929_v55 = vsel %vm9274_vm7, %v9266_v28, %v9273_v54  ;;  %v2062_v10 = vmul.f32 %v8735_v38, %v1911_v19  ;;  %v9275_v36 = vsel %vm7436_vm9, %v7571_v2, 0.0  ;;  %v7766_v54 = vpop.f32.mrf.mxu1  ;;  %vm9306_vm3 = vmmov %vm9268_vm1 }
 0x2c3   : > { %v1991_v60 = vsel %vm7594_vm2, %v1929_v55, 0.0  ;;  %v2346_v59 = vmul.f32 %v5750_v9, %v9275_v36  ;;  %v2696_v51 = vadd.f32 %v2632_v14, %v2403_v12  ;;  %v7753_v22 = vmul.f32 %v5750_v9, %v1231_v18  ;;  %v9278_v14 = vld [vmem:[#allocation212_spill] sm:$0xff]  ;;  %vm9313_vm11 = vmmov %vm9268_vm1 }
 0x2c4   : > { %v7749_v43 = vadd.f32 %v1777_v57, %v9276_v37  ;;  %v2126_v28 = vadd.f32 %v2062_v10, %v7445_v48  ;;  %v2839_v44 = vadd.f32 %v2775_v25, %v2698_v4  ;;  %v2128_v35 = vadd.f32 %v7607_v29, %v1835_v20  ;;  %v9279_v10 = vld [vmem:[#allocation220_spill] sm:$0xff]  ;;  %vm9315_vm6 = vmmov %vm9268_vm1 }
 0x2c5   : > { %v7757_v6 = vmul.f32 %v5750_v9, %v1991_v60  ;;  %v2486_v2 = vsel %vm9271_vm13, %v9277_v1, 0.0  ;;  %v2837_v19 = vadd.f32 %v2773_v33, %v2696_v51  ;;  %v2562_v57 = vsel %vm7436_vm9, %v1929_v55, 0.0  ;;  %v9280_v4 = vld [vmem:[#allocation236_spill] sm:$0xff]  ;;  %v9281_v51 = vld [vmem:[#allocation229_spill] sm:$0xff]  ;;  %vm9340_vm4 = vmmov %vm9268_vm1 }
 0x2c6   : > { %v2267_v12 = vadd.f32 %v9278_v14, %v2126_v28  ;;  %v2637_v48 = vmul.f32 %v5784_v30, %v2486_v2  ;;  %v2980_v25 = vadd.f32 %v2916_v27, %v2839_v44  ;;  %v2269_v29 = vadd.f32 %v9279_v10, %v2128_v35  ;;  %v9282_v27 = vld [vmem:[#allocation231_spill] sm:$0xff] }
 0x2c7   : > { %v2639_v20 = vmul.f32 %v5784_v30, %v9280_v4  ;;  %v2778_v60 = vmul.f32 %v8729_v26, %v9229_v24  ;;  %v2978_v36 = vadd.f32 %v2914_v53, %v2837_v19  ;;  %v2780_v37 = vmul.f32 %v8729_v26, %v9281_v51  ;;  %v9285_v14 = vld [vmem:[#allocation199_spill] sm:$0xff] }
 0x2c8   : > { %v2408_v33 = vadd.f32 %v7622_v52, %v2267_v12  ;;  %v2919_v55 = vmul.f32 %v5805_v13, %v1231_v18  ;;  %v2410_v28 = vadd.f32 %v2346_v59, %v2269_v29  ;;  %v2921_v2 = vmul.f32 %v5805_v13, %v2562_v57  ;;  %v7789_v59 = vpop.f32.mrf.mxu1  ;;  %v9286_v57 = vld [vmem:[#allocation30_spill] sm:$0xff] }
 0x2c9   : > { %v9283_v44 = vrot.slane %v9252_v7, 1  ;;  %v1693_v24 = vadd.f32 %v9285_v14, %v7518_v23  ;;  %v3018_v53 = vpack.c.bf16 %v2980_v25, %v2978_v36  ;;  %v1910_v18 = vsel %vm9271_vm13, %v9262_v32, 0.0  ;;  %v9287_v29 = vld [vmem:[#allocation230_spill] sm:$0xff] }
 0x2ca   : > { %v2701_v19 = vadd.f32 %v2637_v48, %v2408_v33  ;;  %v2703_v12 = vadd.f32 %v2639_v20, %v2410_v28  ;;  %v9288_v51 = vrot.slane %v9287_v29, 1  ;;  %v2061_v23 = vmul.f32 %v4035_v40, %v1910_v18  ;;  %v9292_v28 = vld [vmem:[#allocation25_spill] sm:$0xff]  ;;  %v7821_v18 = vpop.f32.mrf.mxu1 }
 0x2cb   : > { %v1230_v35 = vsel %vm9284_vm15, %v9283_v44, %v9282_v27  ;;  %v1834_v10 = vadd.f32 %v9286_v57, %v1693_v24  ;;  %3290 = vmatmul.mubr.bf16.gmra.mxu1 %v3018_v53  ;;  %v9291_v20 = vsel %vm7436_vm9, %v7655_v47, 0.0 }
 0x2cc   : > { %v1776_v52 = vmul.f32 %v8731_v56, %v1230_v35  ;;  %v1928_v44 = vsel %vm9289_vm5, %v9282_v27, %v9288_v51  ;;  %v2842_v48 = vadd.f32 %v2778_v60, %v2701_v19  ;;  %v9290_v56 = vld [vmem:[#allocation235_spill] sm:$0xff]  ;;  %v2345_v36 = vmul.f32 %v5747_v16, %v9291_v20  ;;  %v9293_v19 = vld [vmem:[#allocation224_spill] sm:$0xff] }
 0x2cd   : > { %v1990_v32 = vsel %vm7594_vm2, %v1928_v44, 0.0  ;;  %v2844_v33 = vadd.f32 %v2780_v37, %v2703_v12  ;;  %v2125_v14 = vadd.f32 %v2061_v23, %v9292_v28  ;;  %v2127_v27 = vadd.f32 %v7690_v45, %v1834_v10  ;;  %v9294_v12 = vld [vmem:[#allocation209_spill] sm:$0xff]  ;;  %v9295_v45 = vld [vmem:[#allocation215_spill] sm:$0xff] }
 0x2ce   : > { %v7799_v25 = vadd.f32 %v1776_v52, %v9290_v56  ;;  %v7811_v24 = vmul.f32 %v5747_v16, %v1230_v35  ;;  %v2983_v60 = vadd.f32 %v2919_v55, %v2842_v48  ;;  %v7814_v53 = vmul.f32 %v5747_v16, %v1990_v32  ;;  %v9296_v55 = vld [vmem:[#allocation234_spill] sm:$0xff] }
 0x2cf   : > { %v2485_v52 = vsel %vm9271_vm13, %v9293_v19, 0.0  ;;  %v2561_v47 = vsel %vm7436_vm9, %v1928_v44, 0.0  ;;  %v2985_v37 = vadd.f32 %v2921_v2, %v2844_v33  ;;  %v2266_v57 = vadd.f32 %v9294_v12, %v2125_v14  ;;  %v9298_v33 = vld [vmem:[#allocation219_spill] sm:$0xff]  ;;  %v9299_v14 = vld [vmem:[#allocation196_spill] sm:$0xff] }
 0x2d0   : > { %v2268_v10 = vadd.f32 %v9295_v45, %v2127_v27  ;;  %v2636_v51 = vmul.f32 %v5781_v61, %v2485_v52  ;;  %v2638_v23 = vmul.f32 %v5781_v61, %v9296_v55  ;;  %v2777_v48 = vmul.f32 %v4039_v42, %v9252_v7  ;;  %v9301_v52 = vld [vmem:[#allocation248_spill] sm:$0xff]  ;;  %v9307_v45 = vld [vmem:[#allocation250_spill] sm:$0xff] }
 0x2d1   : > { %v2779_v56 = vmul.f32 %v4039_v42, %v9297_v17  ;;  %v2918_v15 = vmul.f32 %v5802_v11, %v1230_v35  ;;  %v3021_v44 = vpack.c.bf16 %v2985_v37, %v2983_v60  ;;  %v2407_v2 = vadd.f32 %v7699_v34, %v2266_v57  ;;  %v7847_v34 = vpop.f32.mrf.mxu1  ;;  %v9304_v37 = vld [vmem:[#allocation11_spill] sm:$0xff]  ;;  %v9305_v57 = vld [vmem:[#allocation10_spill] sm:$0xff] }
 0x2d2   : > { %v2409_v32 = vadd.f32 %v2345_v36, %v2268_v10  ;;  %v2920_v20 = vmul.f32 %v5802_v11, %v2561_v47  ;;  %v1698_v28 = vadd.f32 %v9298_v33, %v7586_v63  ;;  %vm9300_vm9 = vnez %v9299_v14  ;;  %v9316_v14 = vld [vmem:[#allocation247_spill] sm:$0xff] }
 0x2d3   : > { %v1915_v27 = vsel %vm9300_vm9, %v9277_v1, 0.0  ;;  %v9302_v7 = vrot.slane %v9272_v49, 1  ;;  %v2068_v35 = vmul.f32 %v8735_v38, %v9280_v4  ;;  %3297 = vmatprep.mubr.bf16.mxu1 %v3021_v44  ;;  %v2700_v36 = vadd.f32 %v2636_v51, %v2407_v2  ;;  %v7867_v33 = vpop.f32.mrf.mxu1 }
 0x2d4   : > { %v2702_v60 = vadd.f32 %v2638_v23, %v2409_v32  ;;  %v2066_v63 = vmul.f32 %v8735_v38, %v1915_v27  ;;  %v1839_v1 = vadd.f32 %v7612_v39, %v1698_v28  ;;  %v2490_v49 = vsel %vm9300_vm9, %v9304_v37, 0.0 }
 0x2d5   : > { %v1927_v12 = vsel %vm9303_vm10, %v9302_v7, %v9301_v52  ;;  %v2504_v4 = vsel %vm9306_vm3, %v9301_v52, %v9305_v57  ;;  %v2643_v10 = vmul.f32 %v5784_v30, %v9307_v45  ;;  %v2841_v51 = vadd.f32 %v2777_v48, %v2700_v36  ;;  %v9308_v52 = vld [vmem:[#allocation226_spill] sm:$0xff]  ;;  %v7897_v45 = vpop.f32.mrf.mxu1 }
 0x2d6   : > { %v2352_v47 = vmul.f32 %v5750_v9, %v1927_v12  ;;  %v2843_v23 = vadd.f32 %v2779_v56, %v2702_v60  ;;  %v2130_v38 = vadd.f32 %v2066_v63, %v7600_v5  ;;  %v2566_v17 = vsel %vm7594_vm2, %v2504_v4, 0.0  ;;  %v9309_v48 = vld [vmem:[#allocation214_spill] sm:$0xff]  ;;  %v9311_v60 = vld [vmem:[#allocation245_spill] sm:$0xff] }
 0x2d7   : > { %v2132_v39 = vadd.f32 %v2068_v35, %v1839_v1  ;;  %v2641_v44 = vmul.f32 %v5784_v30, %v2490_v49  ;;  %v2923_v2 = vmul.f32 %v5805_v13, %v1927_v12  ;;  %v2925_v32 = vmul.f32 %v5805_v13, %v2566_v17  ;;  %v9310_v5 = vld [vmem:[#allocation238_spill] sm:$0xff] }
 0x2d8   : > { %v2982_v28 = vadd.f32 %v2918_v15, %v2841_v51  ;;  %v2984_v27 = vadd.f32 %v2920_v20, %v2843_v23  ;;  %v2271_v7 = vadd.f32 %v9308_v52, %v2130_v38  ;;  %v1697_v56 = vadd.f32 %v9309_v48, %v7671_v41  ;;  %v9314_v4 = vld [vmem:[#allocation242_spill] sm:$0xff]  ;;  %v9320_v48 = vld [vmem:[#allocation249_spill] sm:$0xff] }
 0x2d9   : > { %v2273_v36 = vadd.f32 %v9310_v5, %v2132_v39  ;;  %v1914_v35 = vsel %vm9300_vm9, %v9293_v19, 0.0  ;;  %v9312_v12 = vrot.slane %v9287_v29, 1  ;;  %v2067_v15 = vmul.f32 %v4035_v40, %v9296_v55  ;;  %v9317_v39 = vld [vmem:[#allocation15_spill] sm:$0xff]  ;;  %v7973_v5 = vld [vmem:[%s8112_s6] ss:$0 sm:$0xff] }
 0x2da   : > { %v3020_v20 = vpack.c.bf16 %v2984_v27, %v2982_v28  ;;  %v2412_v1 = vadd.f32 %v7753_v22, %v2271_v7  ;;  %v1838_v41 = vadd.f32 %v7674_v46, %v1697_v56  ;;  %v2065_v37 = vmul.f32 %v4035_v40, %v1914_v35  ;;  %v9318_v27 = vld [vmem:[#allocation222_spill] sm:$0xff]  ;;  %v9319_v7 = vld [vmem:[#allocation232_spill] sm:$0xff] }
 0x2db   : > { %v1926_v63 = vsel %vm9313_vm11, %v9312_v12, %v9311_v60  ;;  %v2414_v49 = vadd.f32 %v7757_v6, %v2273_v36  ;;  %v2489_v29 = vsel %vm9300_vm9, %v9314_v4, 0.0  ;;  %v2503_v55 = vsel %vm9315_vm6, %v9311_v60, %v9305_v57  ;;  %v9323_v36 = vld [vmem:[#allocation21_spill] sm:$0xff]  ;;  %v9325_v12 = vld [vmem:[#allocation251_spill] sm:$0xff] }
 0x2dc   : > { %v7888_v19 = vmul.f32 %v5747_v16, %v1926_v63  ;;  %3298 = vmatmul.mubr.bf16.gmra.mxu1 %v3020_v20  ;;  %v2705_v46 = vadd.f32 %v2641_v44, %v2412_v1  ;;  %v2129_v40 = vadd.f32 %v2065_v37, %v7683_v50  ;;  %v2131_v22 = vadd.f32 %v2067_v15, %v1838_v41  ;;  %v7921_v20 = vpop.f32.mrf.mxu1 }
 0x2dd   : > { %v2565_v6 = vsel %vm7594_vm2, %v2503_v55, 0.0  ;;  %v2707_v51 = vadd.f32 %v2643_v10, %v2414_v49  ;;  %v2640_v23 = vmul.f32 %v5781_v61, %v2489_v29  ;;  %v2642_v38 = vmul.f32 %v5781_v61, %v9316_v14  ;;  %v9328_v49 = vld [vmem:[#allocation62_spill] sm:$0xff]  ;;  %vm9329_vm2 = vmmov %vm9268_vm1  ;;  %v9330_v29 = vld [vmem:[#allocation244_spill] sm:$0xff] }
 0x2de   : > { %v2922_v17 = vmul.f32 %v5802_v11, %v1926_v63  ;;  %v2846_v28 = vadd.f32 %v9317_v39, %v2705_v46  ;;  %v2270_v52 = vadd.f32 %v9318_v27, %v2129_v40  ;;  %v2272_v44 = vadd.f32 %v9319_v7, %v2131_v22  ;;  %v9326_v63 = vld [vmem:[#allocation208_spill] sm:$0xff]  ;;  %v9334_v7 = vld [vmem:[#allocation246_spill] sm:$0xff] }
 0x2df   : > { %v2924_v50 = vmul.f32 %v5802_v11, %v2565_v6  ;;  %v2848_v56 = vadd.f32 %v9320_v48, %v2707_v51  ;;  %v2134_v10 = vadd.f32 %v9321_v62, %v7749_v43  ;;  %v9324_v35 = vsel %vm5512_vm0, %v9323_v36, 0.0  ;;  %v9333_v27 = vld [vmem:[#allocation240_spill] sm:$0xff] }
 0x2e0   : > { %v2354_v60 = vmul.f32 %v5750_v9, %v9324_v35  ;;  %vm9327_vm8 = vnez %v9326_v63  ;;  %v2987_v1 = vadd.f32 %v2923_v2, %v2846_v28  ;;  %v2411_v41 = vadd.f32 %v7811_v24, %v2270_v52  ;;  %v9331_v9 = vld [vmem:[#allocation39_spill] sm:$0xff]  ;;  %v3520_v28 = vpop.f32.mrf.mxu1 }
 0x2e1   : > { %v2494_v15 = vsel %vm9327_vm8, %v9325_v12, 0.0  ;;  %v2413_v37 = vadd.f32 %v7814_v53, %v2272_v44  ;;  %v2506_v43 = vsel %vm9329_vm2, %v9305_v57, %v9328_v49  ;;  %v2989_v4 = vadd.f32 %v2925_v32, %v2848_v56  ;;  %v9332_v24 = vld [vmem:[#allocation7_spill] sm:$0xff]  ;;  %v9339_v12 = vld [vmem:[#allocation32_spill] sm:$0xff] }
 0x2e2   : > { %v2275_v55 = vadd.f32 %v9330_v29, %v2134_v10  ;;  %v2418_v46 = vadd.f32 %v2354_v60, %v9331_v9  ;;  %v2570_v40 = vsel %vm5512_vm0, %v2506_v43, 0.0  ;;  %v2704_v22 = vadd.f32 %v2640_v23, %v2411_v41  ;;  %v9335_v56 = vld [vmem:[#allocation243_spill] sm:$0xff]  ;;  %v9338_v10 = vld [vmem:[#allocation18_spill] sm:$0xff]  ;;  %v3522_v63 = vpop.f32.mrf.mxu1 }
 0x2e3   : > { %v2706_v6 = vadd.f32 %v2642_v38, %v2413_v37  ;;  %v2645_v2 = vmul.f32 %v5784_v30, %v2494_v15  ;;  %v2647_v53 = vmul.f32 %v5784_v30, %v9332_v24  ;;  %v3023_v51 = vpack.c.bf16 %v2989_v4, %v2987_v1  ;;  %v9341_v1 = vld [vmem:[#allocation239_spill] sm:$0xff]  ;;  %v9342_v37 = vld [vmem:[#allocation252_spill] sm:$0xff] }
 0x2e4   : > { %v2416_v14 = vadd.f32 %v2352_v47, %v2275_v55  ;;  %v2786_v39 = vmul.f32 0.0, %v8729_v26  ;;  %v2927_v32 = vmul.f32 %v5805_v13, %v9305_v57  ;;  %v2845_v52 = vadd.f32 %v9333_v27, %v2704_v22  ;;  %v9336_v47 = vld [vmem:[#allocation17_spill] sm:$0xff]  ;;  %v9343_v22 = vld [vmem:[#allocation19_spill] sm:$0xff] }
 0x2e5   : > { %v2847_v44 = vadd.f32 %v9334_v7, %v2706_v6  ;;  %v2711_v23 = vadd.f32 %v2647_v53, %v2418_v46  ;;  %v2929_v38 = vmul.f32 %v5805_v13, %v2570_v40  ;;  %3305 = vmatprep.mubr.bf16.mxu1 %v3023_v51  ;;  %v2133_v30 = vadd.f32 %v9335_v56, %v7799_v25 }
 0x2e6   : > { %v2709_v48 = vadd.f32 %v2645_v2, %v2416_v14  ;;  %v9337_v26 = vsel %vm5512_vm0, %v9336_v47, 0.0  ;;  %v2493_v36 = vsel %vm9327_vm8, %v9338_v10, 0.0  ;;  %v2986_v35 = vadd.f32 %v2922_v17, %v2845_v52 }
 0x2e7   : > { %v2353_v62 = vmul.f32 %v5747_v16, %v9337_v26  ;;  %v2988_v60 = vadd.f32 %v2924_v50, %v2847_v44  ;;  %v2852_v13 = vadd.f32 %v2786_v39, %v2711_v23  ;;  %v2505_v25 = vsel %vm9340_vm4, %v9305_v57, %v9339_v12 }
 0x2e8   : > { %v2850_v15 = vadd.f32 %v2786_v39, %v2709_v48  ;;  %v2274_v41 = vadd.f32 %v9341_v1, %v2133_v30  ;;  %v2569_v16 = vsel %vm5512_vm0, %v2505_v25, 0.0  ;;  %v2644_v17 = vmul.f32 %v5781_v61, %v2493_v36 }
 0x2e9   : > { %v2417_v49 = vadd.f32 %v2353_v62, %v9342_v37  ;;  %v3022_v43 = vpack.c.bf16 %v2988_v60, %v2986_v35  ;;  %v2993_v4 = vadd.f32 %v2929_v38, %v2852_v13  ;;  %v2646_v50 = vmul.f32 %v5781_v61, %v9332_v24  ;;  %v3523_v24 = vpop.f32.mrf.mxu1 }
 0x2ea   : > { %v2991_v3 = vadd.f32 %v2927_v32, %v2850_v15  ;;  %v2415_v29 = vadd.f32 %v7888_v19, %v2274_v41  ;;  %v2785_v55 = vmul.f32 0.0, %v4039_v42  ;;  %v2926_v9 = vmul.f32 %v5802_v11, %v9305_v57 }
 0x2eb   : > { %3306 = vmatmul.mubr.bf16.gmra.mxu1 %v3022_v43  ;;  %v2710_v46 = vadd.f32 %v2646_v50, %v2417_v49  ;;  %v2928_v40 = vmul.f32 %v5802_v11, %v2569_v16  ;;  %v3503_v61 = vadd.f32 %v7609_v0, %v7580_v21  ;;  %v3506_v19 = vadd.f32 %v7679_v31, %v9343_v22 }
 0x2ec   : > { %v3025_v6 = vpack.c.bf16 %v2993_v4, %v2991_v3  ;;  %v2708_v42 = vadd.f32 %v2644_v17, %v2415_v29  ;;  %v3509_v57 = vadd.f32 %v7738_v8, %v7709_v58  ;;  %v3512_v2 = vadd.f32 %v7789_v59, %v7766_v54 }
 0x2ed   : > { %v2851_v53 = vadd.f32 %v2785_v55, %v2710_v46  ;;  %v3196_v51 = vadd.f32 %v3503_v61, %v7973_v5  ;;  %v3199_v11 = vadd.f32 %v3506_v19, %v7973_v5  ;;  %v3515_v21 = vadd.f32 %v7847_v34, %v7821_v18 }
 0x2ee   : > { %3313 = vmatprep.mubr.bf16.mxu1 %v3025_v6  ;;  %v2849_v0 = vadd.f32 %v2785_v55, %v2708_v42  ;;  %v3204_v31 = vadd.f32 %v3509_v57, %v7973_v5  ;;  %v3207_v14 = vadd.f32 %v3512_v2, %v7973_v5  ;;  %v3518_v58 = vadd.f32 %v7897_v45, %v7867_v33  ;;  %v3525_v45 = vpop.f32.mrf.mxu1 }
 0x2ef   : > { %v2992_v8 = vadd.f32 %v2928_v40, %v2851_v53  ;;  %3322 = vst [vmem:[%s7992_s29] sm:$0xff] %v3196_v51  ;;  %3323 = vst [vmem:[%s7992_s29 + $0x8] sm:$0xff] %v3199_v11  ;;  %v3212_v54 = vadd.f32 %v3515_v21, %v7973_v5  ;;  %v3521_v59 = vadd.f32 %v3520_v28, %v7921_v20 }
 0x2f0   : > { %v3524_v18 = vadd.f32 %v3523_v24, %v3522_v63  ;;  %v2990_v34 = vadd.f32 %v2926_v9, %v2849_v0  ;;  %3324 = vst [vmem:[%s7992_s29 + $0x10] sm:$0xff] %v3204_v31  ;;  %3325 = vst [vmem:[%s7992_s29 + $0x18] sm:$0xff] %v3207_v14  ;;  %v3215_v33 = vadd.f32 %v3518_v58, %v7973_v5  ;;  %v3526_v52 = vpop.f32.mrf.mxu1 }
 0x2f1   : > { %3326 = vst [vmem:[%s7992_s29 + $0x20] sm:$0xff] %v3212_v54  ;;  %v3220_v39 = vadd.f32 %v3521_v59, %v7973_v5  ;;  %v3527_v20 = vadd.f32 %v3526_v52, %v3525_v45 }
 0x2f2   : > { %v3223_v32 = vadd.f32 %v3524_v18, %v7973_v5  ;;  %v3024_v27 = vpack.c.bf16 %v2992_v8, %v2990_v34  ;;  %3327 = vst [vmem:[%s7992_s29 + $0x28] sm:$0xff] %v3215_v33  ;;  %v3528_v28 = vpop.f32.mrf.mxu1 }
 0x2f3   : > { %3328 = vst [vmem:[%s7992_s29 + $0x30] sm:$0xff] %v3220_v39  ;;  %v3228_v7 = vadd.f32 %v3527_v20, %v7973_v5 }
 0x2f4   : > { %3329 = vst [vmem:[%s7992_s29 + $0x38] sm:$0xff] %v3223_v32  ;;  %3314 = vmatmul.mubr.bf16.gmra.mxu1 %v3024_v27  ;;  %v3529_v44 = vpop.f32.mrf.mxu1 }
 0x2f5   : > { %3330 = vst [vmem:[%s7992_s29 + $0x40] sm:$0xff] %v3228_v7  ;;  %v3530_v23 = vadd.f32 %v3529_v44, %v3528_v28 }
 0x2f6   : > { %v3531_v48 = vpop.f32.mrf.mxu1 }
 0x2f7   : > { %v3231_v38 = vadd.f32 %v3530_v23, %v7973_v5 }
 0x2f8   : > { %v3532_v56 = vpop.f32.mrf.mxu1 }
 0x2f9   : > { %3331 = vst [vmem:[%s7992_s29 + $0x48] sm:$0xff] %v3231_v38  ;;  %v3533_v30 = vadd.f32 %v3532_v56, %v3531_v48 }
 0x2fa   : > { %v3534_v47 = vpop.f32.mrf.mxu1 }
 0x2fb   : > { %v3236_v26 = vadd.f32 %v3533_v30, %v7973_v5 }
 0x2fc   : > { %v3535_v62 = vpop.f32.mrf.mxu1 }
 0x2fd   : > { %3332 = vst [vmem:[%s7992_s29 + $0x50] sm:$0xff] %v3236_v26  ;;  %v3536_v10 = vadd.f32 %v3535_v62, %v3534_v47 }
 0x2ff   : > { %v3239_v36 = vadd.f32 %v3536_v10, %v7973_v5  ;;  %v3537_v35 = vpop.f32.mrf.mxu1 }
 0x301   : > { %3333 = vst [vmem:[%s7992_s29 + $0x58] sm:$0xff] %v3239_v36  ;;  %v3538_v60 = vpop.f32.mrf.mxu1 }
 0x302   : > { %v3539_v13 = vadd.f32 %v3538_v60, %v3537_v35 }
 0x303   : > { %v3540_v12 = vpop.f32.mrf.mxu1 }
 0x304   : > { %v3244_v25 = vadd.f32 %v3539_v13, %v7973_v5 }
 0x305   : > { %v3541_v15 = vpop.f32.mrf.mxu1 }
 0x306   : > { %3334 = vst [vmem:[%s7992_s29 + $0x60] sm:$0xff] %v3244_v25  ;;  %v3542_v1 = vadd.f32 %v3541_v15, %v3540_v12 }
 0x308   : > { %v3247_v41 = vadd.f32 %v3542_v1, %v7973_v5 }
 0x30a   : > { %3335 = vst [vmem:[%s7992_s29 + $0x68] sm:$0xff] %v3247_v41 }
 0x317   : > { %v3543_v37 = vpop.f32.mrf.mxu1 }
 0x319   : > { %v3544_v49 = vpop.f32.mrf.mxu1 }
 0x31a   : > { %v3545_v16 = vadd.f32 %v3544_v49, %v3543_v37 }
 0x31b   : > { %v3546_v63 = vpop.f32.mrf.mxu1 }
 0x31c   : > { %v3252_v43 = vadd.f32 %v3545_v16, %v7973_v5 }
 0x31d   : > { %v3547_v4 = vpop.f32.mrf.mxu1 }
 0x31e   : > { %3336 = vst [vmem:[%s7992_s29 + $0x70] sm:$0xff] %v3252_v43  ;;  %v3548_v17 = vadd.f32 %v3547_v4, %v3546_v63 }
 0x320   : > { %v3255_v50 = vadd.f32 %v3548_v17, %v7973_v5 }
 0x322   : > { %3337 = vst [vmem:[%s7992_s29 + $0x78] sm:$0xff] %v3255_v50 }
 0x32e   : > { %v3549_v3 = vpop.f32.mrf.mxu1 }
 0x330   : > { %v3550_v29 = vpop.f32.mrf.mxu1 }
 0x331   : > { %v3551_v55 = vadd.f32 %v3550_v29, %v3549_v3 }
 0x332   : > { %v3552_v9 = vpop.f32.mrf.mxu1 }
 0x333   : > { %v3260_v46 = vadd.f32 %v3551_v55, %v7973_v5 }
 0x334   : > { %v3553_v40 = vpop.f32.mrf.mxu1 }
 0x335   : > { %3338 = vst [vmem:[%s7992_s29 + $0x80] sm:$0xff] %v3260_v46  ;;  %v3554_v61 = vadd.f32 %v3553_v40, %v3552_v9 }
 0x337   : > { %v3263_v22 = vadd.f32 %v3554_v61, %v7973_v5 }
 0x339   : > { %3339 = vst [vmem:[%s7992_s29 + $0x88] sm:$0xff] %v3263_v22 }
 0x346   : > { %v3555_v19 = vpop.f32.mrf.mxu1 }
 0x348   : > { %v3556_v6 = vpop.f32.mrf.mxu1 }
 0x349   : > { %v3557_v42 = vadd.f32 %v3556_v6, %v3555_v19 }
 0x34a   : > { %v3558_v57 = vpop.f32.mrf.mxu1 }
 0x34b   : > { %v3268_v2 = vadd.f32 %v3557_v42, %v7973_v5 }
 0x34c   : > { %v3559_v24 = vpop.f32.mrf.mxu1 }
 0x34d   : > { %3340 = vst [vmem:[%s7992_s29 + $0x90] sm:$0xff] %v3268_v2  ;;  %v3560_v53 = vadd.f32 %v3559_v24, %v3558_v57 }
 0x34f   : > { %v3271_v51 = vadd.f32 %v3560_v53, %v7973_v5 }
 0x351   : > { %3341 = vst [vmem:[%s7992_s29 + $0x98] sm:$0xff] %v3271_v51 }
 0x35d   : > { %v3561_v11 = vpop.f32.mrf.mxu1 }
 0x35f   : > { %v3562_v21 = vpop.f32.mrf.mxu1 }
 0x360   : > { %v3563_v0 = vadd.f32 %v3562_v21, %v3561_v11 }
 0x361   : > { %v3564_v31 = vpop.f32.mrf.mxu1 }
 0x362   : > { %v3276_v14 = vadd.f32 %v3563_v0, %v7973_v5 }
 0x363   : > { %v3565_v58 = vpop.f32.mrf.mxu1 }
 0x364   : > { %3342 = vst [vmem:[%s7992_s29 + $0xa0] sm:$0xff] %v3276_v14  ;;  %v3566_v8 = vadd.f32 %v3565_v58, %v3564_v31 }
 0x366   : > { %v3279_v54 = vadd.f32 %v3566_v8, %v7973_v5 }
 0x368   : > { %3343 = vst [vmem:[%s7992_s29 + $0xa8] sm:$0xff] %v3279_v54 }
 0x374   : > { %v3567_v59 = vpop.f32.mrf.mxu1 }
 0x376   : > { %v3568_v18 = vpop.f32.mrf.mxu1 }
 0x377   : > { %v3569_v34 = vadd.f32 %v3568_v18, %v3567_v59 }
 0x378   : > { %v3570_v33 = vpop.f32.mrf.mxu1 }
 0x379   : > { %v3284_v45 = vadd.f32 %v3569_v34, %v7973_v5 }
 0x37a   : > { %v3571_v39 = vpop.f32.mrf.mxu1 }
 0x37b   : > { %3344 = vst [vmem:[%s7992_s29 + $0xb0] sm:$0xff] %v3284_v45  ;;  %v3572_v32 = vadd.f32 %v3571_v39, %v3570_v33 }
 0x37d   : > { %v3287_v27 = vadd.f32 %v3572_v32, %v7973_v5 }
 0x37f   : > { %3345 = vst [vmem:[%s7992_s29 + $0xb8] sm:$0xff] %v3287_v27 }
 0x38b   : > { %v3573_v52 = vpop.f32.mrf.mxu1 }
 0x38d   : > { %v3574_v20 = vpop.f32.mrf.mxu1 }
 0x38e   : > { %v3575_v28 = vadd.f32 %v3574_v20, %v3573_v52 }
 0x38f   : > { %v3576_v7 = vpop.f32.mrf.mxu1 }
 0x390   : > { %v3292_v44 = vadd.f32 %v3575_v28, %v7973_v5 }
 0x391   : > { %v3577_v23 = vpop.f32.mrf.mxu1 }
 0x392   : > { %3346 = vst [vmem:[%s7992_s29 + $0xc0] sm:$0xff] %v3292_v44  ;;  %v3578_v38 = vadd.f32 %v3577_v23, %v3576_v7 }
 0x394   : > { %v3295_v48 = vadd.f32 %v3578_v38, %v7973_v5 }
 0x396   : > { %3347 = vst [vmem:[%s7992_s29 + $0xc8] sm:$0xff] %v3295_v48 }
 0x39c   : > { %v3579_v56 = vpop.f32.mrf.mxu1 }
 0x39e   : > { %v3580_v30 = vpop.f32.mrf.mxu1 }
 0x39f   : > { %v3581_v47 = vadd.f32 %v3580_v30, %v3579_v56 }
 0x3a0   : > { %v3582_v26 = vpop.f32.mrf.mxu1 }
 0x3a1   : > { %v3300_v62 = vadd.f32 %v3581_v47, %v7973_v5 }
 0x3a2   : > { %v3583_v10 = vpop.f32.mrf.mxu1 }
 0x3a3   : > { %3348 = vst [vmem:[%s7992_s29 + $0xd0] sm:$0xff] %v3300_v62  ;;  %v3584_v36 = vadd.f32 %v3583_v10, %v3582_v26 }
 0x3a5   : > { %v3303_v35 = vadd.f32 %v3584_v36, %v7973_v5 }
 0x3a7   : > { %3349 = vst [vmem:[%s7992_s29 + $0xd8] sm:$0xff] %v3303_v35 }
 0x3ab   : > { %v3585_v60 = vpop.f32.mrf.mxu1 }
 0x3ad   : > { %v3586_v13 = vpop.f32.mrf.mxu1 }
 0x3ae   : > { %v3587_v12 = vadd.f32 %v3586_v13, %v3585_v60 }
 0x3af   : > { %v3588_v25 = vpop.f32.mrf.mxu1 }
 0x3b0   : > { %v3308_v15 = vadd.f32 %v3587_v12, %v7973_v5 }
 0x3b1   : > { %v3589_v1 = vpop.f32.mrf.mxu1 }
 0x3b2   : > { %3350 = vst [vmem:[%s7992_s29 + $0xe0] sm:$0xff] %v3308_v15  ;;  %v3590_v41 = vadd.f32 %v3589_v1, %v3588_v25 }
 0x3b4   : > { %v3311_v37 = vadd.f32 %v3590_v41, %v7973_v5  ;;  %v3591_v49 = vpop.f32.mrf.mxu1 }
 0x3b6   : > { %3351 = vst [vmem:[%s7992_s29 + $0xe8] sm:$0xff] %v3311_v37  ;;  %v3592_v16 = vpop.f32.mrf.mxu1 }
 0x3b7   : > { %v3593_v63 = vadd.f32 %v3592_v16, %v3591_v49 }
 0x3b8   : > { %v3594_v43 = vpop.f32.mrf.mxu1 }
 0x3b9   : > { %v3316_v4 = vadd.f32 %v3593_v63, %v7973_v5 }
 0x3ba   : > { %v3595_v17 = vpop.f32.mrf.mxu1 }
 0x3bb   : > { %3352 = vst [vmem:[%s7992_s29 + $0xf0] sm:$0xff] %v3316_v4  ;;  %v3596_v50 = vadd.f32 %v3595_v17, %v3594_v43 }
 0x3bd   : > { %v3319_v3 = vadd.f32 %v3596_v50, %v7973_v5 }
 0x3bf   : > { %3353 = vst [vmem:[%s7992_s29 + $0xf8] sm:$0xff] %v3319_v3 }
 0x3c0   : > { %3693 = shalt.err (!%p3690_p3)
}
 0x3c1   : > { %s3694_s19 = scalar_lea.hbm %s8058_s15, 4096  ;;  %s3698_s23 = scalar_lea.hbm %s8113_s7, 8192 }
 0x3c2   : > { %p3695_p4 = scmp.ne.s32.totalorder %s8058_s15, %s3694_s19  ;;  %p3699_p9 = scmp.lt.s32.totalorder %s8058_s15, %s8113_s7 }
 0x3c3   : > { %p3700_p10 = scmp.lt.s32.totalorder %s3698_s23, %s3694_s19 }
 0x3c4   : > { %p3696_p7 = pnand %p3695_p4, %p3825_p5 }
 0x3c5   : > { %p3701_p11 = por %p3700_p10, %p3699_p9 }
 0x3c6   : > { %p3697_p8 = pneg %p3696_p7 }
 0x3c8   : > { %p3702_p12 = pnand %p3701_p11, %p3697_p8 }
 0x3ca   : > { %3705 = shalt.err (!%p3702_p12)
}
 0x3cb   : > { %s3745_s13 = smov 128   ;;  %s3746_s14 = smov 8  }
 0x3cc   : > { %3597 = dma.vmem_to_hbm [thread:$0]  (%p3825_p5), %s8060_s9, 4096, %s8058_s15, %s8066_s16, %s3745_s13, %s3745_s13, %s3746_s14  }
 0x3cd PF: > { %p3603_p13 = scmp.ge.s32.totalorder %s3740_s27, 2  ;;  %s3383_s28 = sand.u32 1, %s3728_s24  }
 0x3ce   : > { %s3384_s17 = scalar_lea.sflag [#allocation4], %s3383_s28 }
 0x3cf   : > { %p3600_p0 = pnand %p3603_p13, %p3829_p6 }
 0x3d1   : > { %p3601_p1 = pneg %p3600_p0 }
 0x3d3   : > { %3723 = dma.done.wait (%p3601_p1), %s3384_s17, 4096  }
 0x3d4   : > { %3725 = vsyncadd (%p3601_p1), %s3384_s17, 4294963200  ;;  %p17_p2 = scmp.ge.s32.totalorder %s3812_s30, 4   ;;  %s9344_s24 = smov %s3732_s25 }
 0x3d5   : > { %s9345_s25 = smov %s3736_s26  ;;  %s9346_s26 = smov %s3823_s10 }
 0x3d6   : > { %s9347_s27 = smov %s3812_s30  ;;  %19 = sbr.rel (!%p17_p2) target bundleno = 3 (0x3), region = 91 }
 0x3db   :  { %3389 = vsyncpa [#allocation4], 1 }
 0x3dc   :  { %3391 = vsyncpa [#allocation4 + $0x1], 1 }

</bundles_post_ra>
